<compile_context>
chip_gen: v5e
topology: v5e:2x2
jax: 0.10.0
libtpu: 0.0.40
codegen_flags: <defaults>
</compile_context>

<pallas_src>
import jax
import jax.numpy as jnp
from jax.experimental import pallas as pl
from jax.experimental.pallas import tpu as pltpu

LN_EPS = 1e-5
H1 = 100      # real fc1 width
H1P = 128     # padded fc1 width (lane-aligned contraction dim for fc2)
H2 = 400
OUT = 6
IN = 12

_SPLIT_ROWS = 512     # split a single-tile batch in two when it has >= this many rows
_VMEM_LIMIT = 48 * 1024 * 1024   # scoped VMEM; safe on v7x (64 MiB physical)


def _round_up(x, m):
    return ((x + m - 1) // m) * m


def _pick_bt(batch, block_b):
    """Batch rows per grid step (always a multiple of 8)."""
    rows = max(8, _round_up(batch, 8))
    if rows <= block_b:
        if rows >= _SPLIT_ROWS:
            # >=2 grid steps so both v7x TensorCores get work under
            # dimension_semantics=("parallel",).
            return max(8, _round_up((rows + 1) // 2, 8))
        return rows
    return block_b


def _actor_kernel(xs_ref, w1_ref, b1_ref, g1_ref, be1_ref,
                  w2_ref, b2_ref, g2_ref, be2_ref,
                  wmu_ref, bmu_ref, out_ref):
    bt = xs_ref.shape[1]

    # ---- fc1 on all four input groups at once: (4*bt, 12) @ (12, 128) ----
    # The (4, bt, 12) block flattens to (4*bt, 12) with group g at rows
    # [g*bt, (g+1)*bt); free relayout because bt % 8 == 0.
    xs = xs_ref[...].reshape(4 * bt, IN)
    h = jnp.dot(xs, w1_ref[...],
                preferred_element_type=jnp.float32) + b1_ref[...]

    # ---- LayerNorm(100), two-pass (mean, then centered variance).
    # Lanes 100..127 of h are exact zeros (w1/b1 zero-padded), so the
    # full-lane sum equals the sum over the 100 real features; the pad lanes
    # are masked out of the centered variance so the stats stay exact.
    real1 = jax.lax.broadcasted_iota(jnp.int32, (1, H1P), 1) < H1
    mu1 = jnp.sum(h, axis=-1, keepdims=True) * (1.0 / H1)
    d1 = jnp.where(real1, h - mu1, 0.0)
    var1 = jnp.sum(d1 * d1, axis=-1, keepdims=True) * (1.0 / H1)
    hn = d1 * jax.lax.rsqrt(var1 + LN_EPS)
    hn = jnp.maximum(hn * g1_ref[...] + be1_ref[...], 0.0)        # (4*bt, 128)

    # ---- fc2 on the (virtual) concat: sum of 4 partial matmuls against the
    # zero-padded (128, 400) slabs of the (400, 400) weight.  The four bt-row
    # groups are contiguous, sublane-aligned slices of hn (bt % 8 == 0).
    # Keep the dots adjacent (no interleaved elementwise) so v7x can use
    # in-place MRB accumulation.
    acc = jnp.dot(hn[0 * bt:1 * bt], w2_ref[0],
                  preferred_element_type=jnp.float32)
    acc = acc + jnp.dot(hn[1 * bt:2 * bt], w2_ref[1],
                        preferred_element_type=jnp.float32)
    acc = acc + jnp.dot(hn[2 * bt:3 * bt], w2_ref[2],
                        preferred_element_type=jnp.float32)
    acc = acc + jnp.dot(hn[3 * bt:4 * bt], w2_ref[3],
                        preferred_element_type=jnp.float32)
    h2 = acc + b2_ref[...]                                        # (bt, 400)

    # ---- LayerNorm(400), two-pass ----
    mu2 = jnp.sum(h2, axis=-1, keepdims=True) * (1.0 / H2)
    d2 = h2 - mu2
    var2 = jnp.sum(d2 * d2, axis=-1, keepdims=True) * (1.0 / H2)
    h2n = d2 * jax.lax.rsqrt(var2 + LN_EPS)
    h2n = jnp.maximum(h2n * g2_ref[...] + be2_ref[...], 0.0)

    # ---- mu head + sigmoid (exp on EUP, exact reciprocal) ----
    logits = jnp.dot(h2n, wmu_ref[...],
                     preferred_element_type=jnp.float32) + bmu_ref[...]
    out_ref[...] = pl.reciprocal(1.0 + jnp.exp(-logits), approx=False)


def actor_forward(car_D, scooter_D, car_S, scooter_S, params, block_b=1024):
    """Fused Actor forward.

    block_b = max batch rows per grid step.  Default 1024 keeps the per-step
    VMEM footprint ~18 MiB (safe on all generations incl. v7x); on v6e
    (128 MiB VMEM, single TC) block_b=2048 amortizes grid overhead a bit
    more; on v5e keep <=1024.
    """
    B = car_D.shape[0]
    block_b = max(8, _round_up(block_b, 8))
    bt = _pick_bt(B, block_b)
    n_tiles = pl.cdiv(B, bt)
    b_pad = n_tiles * bt

    # Inputs: stack + batch-pad only -- NO transpose/reshape repack in HBM.
    x4 = jnp.stack([car_D, scooter_D, car_S, scooter_S],
                   axis=0).astype(jnp.float32)                       # (4, B, 12)
    if b_pad != B:
        x4 = jnp.pad(x4, ((0, 0), (0, b_pad - B), (0, 0)))

    # Pad fc1 out-dim (and fc2 contraction dim) 100 -> 128 with zeros.
    pad1 = H1P - H1
    w1p = jnp.pad(params["w1"], ((0, 0), (0, pad1)))                  # (12,128)
    b1p = jnp.pad(params["b1"].reshape(1, H1), ((0, 0), (0, pad1)))
    g1p = jnp.pad(params["g1"].reshape(1, H1), ((0, 0), (0, pad1)))
    be1p = jnp.pad(params["be1"].reshape(1, H1), ((0, 0), (0, pad1)))

    # fc2 weight (400,400) (in,out) -> 4 slabs of (100,400), K padded to 128.
    w2p = jnp.pad(params["w2"].reshape(4, H1, H2),
                  ((0, 0), (0, pad1), (0, 0)))                        # (4,128,400)
    b2 = params["b2"].reshape(1, H2)
    g2 = params["g2"].reshape(1, H2)
    be2 = params["be2"].reshape(1, H2)
    wmu = params["wmu"]                                               # (400,6)
    bmu = params["bmu"].reshape(1, OUT)

    def run(param_mode):
        def pspec(shape):
            zeros = (0,) * len(shape)
            idx = lambda i: zeros          # grid-invariant block
            if param_mode is None:
                return pl.BlockSpec(shape, idx)
            return pl.BlockSpec(shape, idx, pipeline_mode=param_mode)

        return pl.pallas_call(
            _actor_kernel,
            out_shape=jax.ShapeDtypeStruct((b_pad, OUT), jnp.float32),
            grid=(n_tiles,),
            in_specs=[
                pl.BlockSpec((4, bt, IN), lambda i: (0, i, 0)),   # packed inputs
                pspec((IN, H1P)),                                 # w1 (padded)
                pspec((1, H1P)),                                  # b1
                pspec((1, H1P)),                                  # gamma1
                pspec((1, H1P)),                                  # beta1
                pspec((4, H1P, H2)),                              # w2 slabs (padded)
                pspec((1, H2)),                                   # b2
                pspec((1, H2)),                                   # gamma2
                pspec((1, H2)),                                   # beta2
                pspec((H2, OUT)),                                 # wmu
                pspec((1, OUT)),                                  # bmu
            ],
            out_specs=pl.BlockSpec((bt, OUT), lambda i: (i, 0)),
            compiler_params=pltpu.CompilerParams(
                dimension_semantics=("parallel",),
                vmem_limit_bytes=_VMEM_LIMIT),
        )(x4, w1p, b1p, g1p, be1p, w2p, b2, g2, be2, wmu, bmu)

    # Grid-invariant parameter blocks never change across grid steps; single
    # buffering drops the dead second VMEM buffer (~1.3 MiB, mostly w2).  Fall
    # back to default double buffering on builds that reject buffer_count=1.
    try:
        out = run(pl.Buffered(1))
    except Exception:
        out = run(None)
    return out[:B]


def init_params(key):
    """PyTorch-default-style init; natural (unpadded) shapes, weights (in,out)."""
    ks = jax.random.split(key, 3)

    def lin(k, fan_in, fan_out):
        bound = 1.0 / (fan_in ** 0.5)
        kw, kb = jax.random.split(k)
        w = jax.random.uniform(kw, (fan_in, fan_out), jnp.float32, -bound, bound)
        b = jax.random.uniform(kb, (fan_out,), jnp.float32, -bound, bound)
        return w, b

    w1, b1 = lin(ks[0], IN, H1)
    w2, b2 = lin(ks[1], H2, H2)
    wmu, bmu = lin(ks[2], H2, OUT)
    return {
        "w1": w1, "b1": b1,
        "g1": jnp.ones((H1,), jnp.float32), "be1": jnp.zeros((H1,), jnp.float32),
        "w2": w2, "b2": b2,
        "g2": jnp.ones((H2,), jnp.float32), "be2": jnp.zeros((H2,), jnp.float32),
        "wmu": wmu, "bmu": bmu,
    }


def actor_reference(car_D, scooter_D, car_S, scooter_S, p):
    """Pure-JAX reference matching the PyTorch forward, for validation."""
    def ln(h, g, b):
        mu = h.mean(-1, keepdims=True)
        var = ((h - mu) ** 2).mean(-1, keepdims=True)
        return (h - mu) / jnp.sqrt(var + LN_EPS) * g + b

    def branch(x):
        return jnp.maximum(ln(x @ p["w1"] + p["b1"], p["g1"], p["be1"]), 0.0)

    xyzw = jnp.concatenate(
        [branch(car_D), branch(scooter_D), branch(car_S), branch(scooter_S)],
        axis=1)
    h2 = jnp.maximum(ln(xyzw @ p["w2"] + p["b2"], p["g2"], p["be2"]), 0.0)
    return jax.nn.sigmoid(h2 @ p["wmu"] + p["bmu"])


if __name__ == "__main__":
    key = jax.random.PRNGKey(0)
    kp, k1, k2, k3, k4 = jax.random.split(key, 5)
    params = init_params(kp)

    B = 2
    car_D = jax.random.normal(k1, (B, IN), jnp.float32)
    scooter_D = jax.random.normal(k2, (B, IN), jnp.float32)
    car_S = jax.random.normal(k3, (B, IN), jnp.float32)
    scooter_S = jax.random.normal(k4, (B, IN), jnp.float32)

    out = actor_forward(car_D, scooter_D, car_S, scooter_S, params)
    out = jax.block_until_ready(out)

    ref = actor_reference(car_D, scooter_D, car_S, scooter_S, params)
    assert out.shape == (B, OUT)
    assert jnp.allclose(out, ref, atol=2e-5, rtol=1e-5), "mismatch vs JAX reference"

    print("KERNEL_OK")
</pallas_src>

<mosaic_0001>
module attributes {stable_mosaic.version = 11 : i64} {
  func.func @_actor_kernel(%arg0: i32, %arg1: memref<4x8x12xf32, #tpu.memory_space<vmem>>, %arg2: memref<12x128xf32, #tpu.memory_space<vmem>>, %arg3: memref<1x128xf32, #tpu.memory_space<vmem>>, %arg4: memref<1x128xf32, #tpu.memory_space<vmem>>, %arg5: memref<1x128xf32, #tpu.memory_space<vmem>>, %arg6: memref<4x128x400xf32, #tpu.memory_space<vmem>>, %arg7: memref<1x400xf32, #tpu.memory_space<vmem>>, %arg8: memref<1x400xf32, #tpu.memory_space<vmem>>, %arg9: memref<1x400xf32, #tpu.memory_space<vmem>>, %arg10: memref<400x6xf32, #tpu.memory_space<vmem>>, %arg11: memref<1x6xf32, #tpu.memory_space<vmem>>, %arg12: memref<8x6xf32, #tpu.memory_space<vmem>>) attributes {dimension_semantics = [#tpu.dimension_semantics<parallel>], iteration_bounds = array<i64: 1>, scalar_prefetch = 0 : i64, scratch_operands = 0 : i64, tpu.core_type = #tpu.core_type<tc>, window_params = [{transform_indices = @transform_0, window_bounds = array<i64: 4, 8, 12>}, {pipeline_mode = #tpu.pipeline_mode<synchronous>, transform_indices = @transform_1, window_bounds = array<i64: 12, 128>}, {pipeline_mode = #tpu.pipeline_mode<synchronous>, transform_indices = @transform_2, window_bounds = array<i64: 1, 128>}, {pipeline_mode = #tpu.pipeline_mode<synchronous>, transform_indices = @transform_3, window_bounds = array<i64: 1, 128>}, {pipeline_mode = #tpu.pipeline_mode<synchronous>, transform_indices = @transform_4, window_bounds = array<i64: 1, 128>}, {pipeline_mode = #tpu.pipeline_mode<synchronous>, transform_indices = @transform_5, window_bounds = array<i64: 4, 128, 400>}, {pipeline_mode = #tpu.pipeline_mode<synchronous>, transform_indices = @transform_6, window_bounds = array<i64: 1, 400>}, {pipeline_mode = #tpu.pipeline_mode<synchronous>, transform_indices = @transform_7, window_bounds = array<i64: 1, 400>}, {pipeline_mode = #tpu.pipeline_mode<synchronous>, transform_indices = @transform_8, window_bounds = array<i64: 1, 400>}, {pipeline_mode = #tpu.pipeline_mode<synchronous>, transform_indices = @transform_9, window_bounds = array<i64: 400, 6>}, {pipeline_mode = #tpu.pipeline_mode<synchronous>, transform_indices = @transform_10, window_bounds = array<i64: 1, 6>}, {transform_indices = @transform_11, window_bounds = array<i64: 8, 6>}]} {
    %c0 = arith.constant 0 : index
    %c0_0 = arith.constant 0 : index
    %c0_1 = arith.constant 0 : index
    %0 = vector.load %arg1[%c0, %c0_0, %c0_1] : memref<4x8x12xf32, #tpu.memory_space<vmem>>, vector<4x8x12xf32>
    %1 = vector.shape_cast %0 : vector<4x8x12xf32> to vector<32x12xf32>
    %c0_2 = arith.constant 0 : index
    %c0_3 = arith.constant 0 : index
    %2 = vector.load %arg2[%c0_2, %c0_3] : memref<12x128xf32, #tpu.memory_space<vmem>>, vector<12x128xf32>
    %cst = arith.constant dense<0.000000e+00> : vector<32x128xf32>
    %3 = tpu.matmul %1, %2, %cst {dimension_numbers = #tpu.dot_dimension_numbers<[1], [0], [0], [1], [0, 0, 1, 1], [], []>} : vector<32x12xf32>, vector<12x128xf32>, vector<32x128xf32> -> vector<32x128xf32>
    %c0_4 = arith.constant 0 : index
    %c0_5 = arith.constant 0 : index
    %4 = vector.load %arg3[%c0_4, %c0_5] : memref<1x128xf32, #tpu.memory_space<vmem>>, vector<1x128xf32>
    %5 = vector.broadcast %4 : vector<1x128xf32> to vector<32x128xf32>
    %6 = arith.addf %3, %5 : vector<32x128xf32>
    %7 = tpu.iota {dimensions = array<i32: 1>} : vector<1x128xi32>
    %c100_i32 = arith.constant 100 : i32
    %8 = vector.broadcast %c100_i32 : i32 to vector<1x128xi32>
    %9 = arith.cmpi slt, %7, %8 : vector<1x128xi32>
    %cst_6 = arith.constant dense<0.000000e+00> : vector<32xf32>
    %10 = vector.multi_reduction <add>, %6, %cst_6 [1] : vector<32x128xf32> to vector<32xf32>
    %11 = vector.shape_cast %10 : vector<32xf32> to vector<32x1xf32>
    %cst_7 = arith.constant 0.00999999977 : f32
    %12 = vector.broadcast %cst_7 : f32 to vector<32x1xf32>
    %13 = arith.mulf %11, %12 : vector<32x1xf32>
    %14 = vector.broadcast %13 : vector<32x1xf32> to vector<32x128xf32>
    %15 = arith.subf %6, %14 : vector<32x128xf32>
    %cst_8 = arith.constant 0.000000e+00 : f32
    %16 = vector.shape_cast %9 : vector<1x128xi1> to vector<1x128xi1>
    %17 = vector.broadcast %16 : vector<1x128xi1> to vector<32x128xi1>
    %18 = vector.broadcast %cst_8 : f32 to vector<32x128xf32>
    %19 = arith.select %17, %15, %18 : vector<32x128xi1>, vector<32x128xf32>
    %20 = arith.mulf %19, %19 : vector<32x128xf32>
    %cst_9 = arith.constant dense<0.000000e+00> : vector<32xf32>
    %21 = vector.multi_reduction <add>, %20, %cst_9 [1] : vector<32x128xf32> to vector<32xf32>
    %22 = vector.shape_cast %21 : vector<32xf32> to vector<32x1xf32>
    %cst_10 = arith.constant 0.00999999977 : f32
    %23 = vector.broadcast %cst_10 : f32 to vector<32x1xf32>
    %24 = arith.mulf %22, %23 : vector<32x1xf32>
    %cst_11 = arith.constant 9.99999974E-6 : f32
    %25 = vector.broadcast %cst_11 : f32 to vector<32x1xf32>
    %26 = arith.addf %24, %25 : vector<32x1xf32>
    %27 = math.rsqrt %26 : vector<32x1xf32>
    %28 = vector.broadcast %27 : vector<32x1xf32> to vector<32x128xf32>
    %29 = arith.mulf %19, %28 : vector<32x128xf32>
    %c0_12 = arith.constant 0 : index
    %c0_13 = arith.constant 0 : index
    %30 = vector.load %arg4[%c0_12, %c0_13] : memref<1x128xf32, #tpu.memory_space<vmem>>, vector<1x128xf32>
    %31 = vector.broadcast %30 : vector<1x128xf32> to vector<32x128xf32>
    %32 = arith.mulf %29, %31 : vector<32x128xf32>
    %c0_14 = arith.constant 0 : index
    %c0_15 = arith.constant 0 : index
    %33 = vector.load %arg5[%c0_14, %c0_15] : memref<1x128xf32, #tpu.memory_space<vmem>>, vector<1x128xf32>
    %34 = vector.broadcast %33 : vector<1x128xf32> to vector<32x128xf32>
    %35 = arith.addf %32, %34 : vector<32x128xf32>
    %cst_16 = arith.constant 0.000000e+00 : f32
    %36 = vector.broadcast %cst_16 : f32 to vector<32x128xf32>
    %37 = arith.maximumf %35, %36 : vector<32x128xf32>
    %38 = vector.extract_strided_slice %37 {offsets = [0, 0], sizes = [8, 128], strides = [1, 1]} : vector<32x128xf32> to vector<8x128xf32>
    %c0_17 = arith.constant 0 : index
    %c0_18 = arith.constant 0 : index
    %c0_19 = arith.constant 0 : index
    %39 = vector.load %arg6[%c0_17, %c0_18, %c0_19] : memref<4x128x400xf32, #tpu.memory_space<vmem>>, vector<1x128x400xf32>
    %40 = vector.shape_cast %39 : vector<1x128x400xf32> to vector<128x400xf32>
    %cst_20 = arith.constant dense<0.000000e+00> : vector<8x400xf32>
    %41 = tpu.matmul %38, %40, %cst_20 {dimension_numbers = #tpu.dot_dimension_numbers<[1], [0], [0], [1], [0, 0, 1, 1], [], []>} : vector<8x128xf32>, vector<128x400xf32>, vector<8x400xf32> -> vector<8x400xf32>
    %42 = vector.extract_strided_slice %37 {offsets = [8, 0], sizes = [8, 128], strides = [1, 1]} : vector<32x128xf32> to vector<8x128xf32>
    %c1 = arith.constant 1 : index
    %c0_21 = arith.constant 0 : index
    %c0_22 = arith.constant 0 : index
    %43 = vector.load %arg6[%c1, %c0_21, %c0_22] : memref<4x128x400xf32, #tpu.memory_space<vmem>>, vector<1x128x400xf32>
    %44 = vector.shape_cast %43 : vector<1x128x400xf32> to vector<128x400xf32>
    %cst_23 = arith.constant dense<0.000000e+00> : vector<8x400xf32>
    %45 = tpu.matmul %42, %44, %cst_23 {dimension_numbers = #tpu.dot_dimension_numbers<[1], [0], [0], [1], [0, 0, 1, 1], [], []>} : vector<8x128xf32>, vector<128x400xf32>, vector<8x400xf32> -> vector<8x400xf32>
    %46 = arith.addf %41, %45 : vector<8x400xf32>
    %47 = vector.extract_strided_slice %37 {offsets = [16, 0], sizes = [8, 128], strides = [1, 1]} : vector<32x128xf32> to vector<8x128xf32>
    %c2 = arith.constant 2 : index
    %c0_24 = arith.constant 0 : index
    %c0_25 = arith.constant 0 : index
    %48 = vector.load %arg6[%c2, %c0_24, %c0_25] : memref<4x128x400xf32, #tpu.memory_space<vmem>>, vector<1x128x400xf32>
    %49 = vector.shape_cast %48 : vector<1x128x400xf32> to vector<128x400xf32>
    %cst_26 = arith.constant dense<0.000000e+00> : vector<8x400xf32>
    %50 = tpu.matmul %47, %49, %cst_26 {dimension_numbers = #tpu.dot_dimension_numbers<[1], [0], [0], [1], [0, 0, 1, 1], [], []>} : vector<8x128xf32>, vector<128x400xf32>, vector<8x400xf32> -> vector<8x400xf32>
    %51 = arith.addf %46, %50 : vector<8x400xf32>
    %52 = vector.extract_strided_slice %37 {offsets = [24, 0], sizes = [8, 128], strides = [1, 1]} : vector<32x128xf32> to vector<8x128xf32>
    %c3 = arith.constant 3 : index
    %c0_27 = arith.constant 0 : index
    %c0_28 = arith.constant 0 : index
    %53 = vector.load %arg6[%c3, %c0_27, %c0_28] : memref<4x128x400xf32, #tpu.memory_space<vmem>>, vector<1x128x400xf32>
    %54 = vector.shape_cast %53 : vector<1x128x400xf32> to vector<128x400xf32>
    %cst_29 = arith.constant dense<0.000000e+00> : vector<8x400xf32>
    %55 = tpu.matmul %52, %54, %cst_29 {dimension_numbers = #tpu.dot_dimension_numbers<[1], [0], [0], [1], [0, 0, 1, 1], [], []>} : vector<8x128xf32>, vector<128x400xf32>, vector<8x400xf32> -> vector<8x400xf32>
    %56 = arith.addf %51, %55 : vector<8x400xf32>
    %c0_30 = arith.constant 0 : index
    %c0_31 = arith.constant 0 : index
    %57 = vector.load %arg7[%c0_30, %c0_31] : memref<1x400xf32, #tpu.memory_space<vmem>>, vector<1x400xf32>
    %58 = vector.broadcast %57 : vector<1x400xf32> to vector<8x400xf32>
    %59 = arith.addf %56, %58 : vector<8x400xf32>
    %cst_32 = arith.constant dense<0.000000e+00> : vector<8xf32>
    %60 = vector.multi_reduction <add>, %59, %cst_32 [1] : vector<8x400xf32> to vector<8xf32>
    %61 = vector.shape_cast %60 : vector<8xf32> to vector<8x1xf32>
    %cst_33 = arith.constant 2.500000e-03 : f32
    %62 = vector.broadcast %cst_33 : f32 to vector<8x1xf32>
    %63 = arith.mulf %61, %62 : vector<8x1xf32>
    %64 = vector.broadcast %63 : vector<8x1xf32> to vector<8x400xf32>
    %65 = arith.subf %59, %64 : vector<8x400xf32>
    %66 = arith.mulf %65, %65 : vector<8x400xf32>
    %cst_34 = arith.constant dense<0.000000e+00> : vector<8xf32>
    %67 = vector.multi_reduction <add>, %66, %cst_34 [1] : vector<8x400xf32> to vector<8xf32>
    %68 = vector.shape_cast %67 : vector<8xf32> to vector<8x1xf32>
    %cst_35 = arith.constant 2.500000e-03 : f32
    %69 = vector.broadcast %cst_35 : f32 to vector<8x1xf32>
    %70 = arith.mulf %68, %69 : vector<8x1xf32>
    %cst_36 = arith.constant 9.99999974E-6 : f32
    %71 = vector.broadcast %cst_36 : f32 to vector<8x1xf32>
    %72 = arith.addf %70, %71 : vector<8x1xf32>
    %73 = math.rsqrt %72 : vector<8x1xf32>
    %74 = vector.broadcast %73 : vector<8x1xf32> to vector<8x400xf32>
    %75 = arith.mulf %65, %74 : vector<8x400xf32>
    %c0_37 = arith.constant 0 : index
    %c0_38 = arith.constant 0 : index
    %76 = vector.load %arg8[%c0_37, %c0_38] : memref<1x400xf32, #tpu.memory_space<vmem>>, vector<1x400xf32>
    %77 = vector.broadcast %76 : vector<1x400xf32> to vector<8x400xf32>
    %78 = arith.mulf %75, %77 : vector<8x400xf32>
    %c0_39 = arith.constant 0 : index
    %c0_40 = arith.constant 0 : index
    %79 = vector.load %arg9[%c0_39, %c0_40] : memref<1x400xf32, #tpu.memory_space<vmem>>, vector<1x400xf32>
    %80 = vector.broadcast %79 : vector<1x400xf32> to vector<8x400xf32>
    %81 = arith.addf %78, %80 : vector<8x400xf32>
    %cst_41 = arith.constant 0.000000e+00 : f32
    %82 = vector.broadcast %cst_41 : f32 to vector<8x400xf32>
    %83 = arith.maximumf %81, %82 : vector<8x400xf32>
    %c0_42 = arith.constant 0 : index
    %c0_43 = arith.constant 0 : index
    %84 = vector.load %arg10[%c0_42, %c0_43] : memref<400x6xf32, #tpu.memory_space<vmem>>, vector<400x6xf32>
    %cst_44 = arith.constant dense<0.000000e+00> : vector<8x6xf32>
    %85 = tpu.matmul %83, %84, %cst_44 {dimension_numbers = #tpu.dot_dimension_numbers<[1], [0], [0], [1], [0, 0, 1, 1], [], []>} : vector<8x400xf32>, vector<400x6xf32>, vector<8x6xf32> -> vector<8x6xf32>
    %c0_45 = arith.constant 0 : index
    %c0_46 = arith.constant 0 : index
    %86 = vector.load %arg11[%c0_45, %c0_46] : memref<1x6xf32, #tpu.memory_space<vmem>>, vector<1x6xf32>
    %87 = vector.broadcast %86 : vector<1x6xf32> to vector<8x6xf32>
    %88 = arith.addf %85, %87 : vector<8x6xf32>
    %cst_47 = arith.constant 0.000000e+00 : f32
    %89 = vector.broadcast %cst_47 : f32 to vector<8x6xf32>
    %90 = arith.subf %89, %88 : vector<8x6xf32>
    %91 = math.exp %90 : vector<8x6xf32>
    %cst_48 = arith.constant 1.000000e+00 : f32
    %92 = vector.broadcast %cst_48 : f32 to vector<8x6xf32>
    %93 = arith.addf %92, %91 : vector<8x6xf32>
    %94 = tpu.reciprocal %93 : vector<8x6xf32> -> vector<8x6xf32>
    %c0_49 = arith.constant 0 : index
    %c0_50 = arith.constant 0 : index
    %95 = vector.load %arg12[%c0_49, %c0_50] : memref<8x6xf32, #tpu.memory_space<vmem>>, vector<8x6xf32>
    tpu.vector_store %arg12[%c0_49, %c0_50], %94 {strides = array<i32>} : memref<8x6xf32, #tpu.memory_space<vmem>>, vector<8x6xf32>,
    return
  }
  func.func @transform_0(%arg0: i32) -> (i32, i32, i32) {
    %c0_i32 = arith.constant 0 : i32
    %c0_i32_0 = arith.constant 0 : i32
    %c0_i32_1 = arith.constant 0 : i32
    return %c0_i32, %arg0, %c0_i32_0 : i32, i32, i32
  }
  func.func @transform_1(%arg0: i32) -> (i32, i32) {
    %c0_i32 = arith.constant 0 : i32
    %c0_i32_0 = arith.constant 0 : i32
    %c0_i32_1 = arith.constant 0 : i32
    return %c0_i32, %c0_i32_0 : i32, i32
  }
  func.func @transform_2(%arg0: i32) -> (i32, i32) {
    %c0_i32 = arith.constant 0 : i32
    %c0_i32_0 = arith.constant 0 : i32
    %c0_i32_1 = arith.constant 0 : i32
    return %c0_i32, %c0_i32_0 : i32, i32
  }
  func.func @transform_3(%arg0: i32) -> (i32, i32) {
    %c0_i32 = arith.constant 0 : i32
    %c0_i32_0 = arith.constant 0 : i32
    %c0_i32_1 = arith.constant 0 : i32
    return %c0_i32, %c0_i32_0 : i32, i32
  }
  func.func @transform_4(%arg0: i32) -> (i32, i32) {
    %c0_i32 = arith.constant 0 : i32
    %c0_i32_0 = arith.constant 0 : i32
    %c0_i32_1 = arith.constant 0 : i32
    return %c0_i32, %c0_i32_0 : i32, i32
  }
  func.func @transform_5(%arg0: i32) -> (i32, i32, i32) {
    %c0_i32 = arith.constant 0 : i32
    %c0_i32_0 = arith.constant 0 : i32
    %c0_i32_1 = arith.constant 0 : i32
    %c0_i32_2 = arith.constant 0 : i32
    return %c0_i32, %c0_i32_0, %c0_i32_1 : i32, i32, i32
  }
  func.func @transform_6(%arg0: i32) -> (i32, i32) {
    %c0_i32 = arith.constant 0 : i32
    %c0_i32_0 = arith.constant 0 : i32
    %c0_i32_1 = arith.constant 0 : i32
    return %c0_i32, %c0_i32_0 : i32, i32
  }
  func.func @transform_7(%arg0: i32) -> (i32, i32) {
    %c0_i32 = arith.constant 0 : i32
    %c0_i32_0 = arith.constant 0 : i32
    %c0_i32_1 = arith.constant 0 : i32
    return %c0_i32, %c0_i32_0 : i32, i32
  }
  func.func @transform_8(%arg0: i32) -> (i32, i32) {
    %c0_i32 = arith.constant 0 : i32
    %c0_i32_0 = arith.constant 0 : i32
    %c0_i32_1 = arith.constant 0 : i32
    return %c0_i32, %c0_i32_0 : i32, i32
  }
  func.func @transform_9(%arg0: i32) -> (i32, i32) {
    %c0_i32 = arith.constant 0 : i32
    %c0_i32_0 = arith.constant 0 : i32
    %c0_i32_1 = arith.constant 0 : i32
    return %c0_i32, %c0_i32_0 : i32, i32
  }
  func.func @transform_10(%arg0: i32) -> (i32, i32) {
    %c0_i32 = arith.constant 0 : i32
    %c0_i32_0 = arith.constant 0 : i32
    %c0_i32_1 = arith.constant 0 : i32
    return %c0_i32, %c0_i32_0 : i32, i32
  }
  func.func @transform_11(%arg0: i32) -> (i32, i32) {
    %c0_i32 = arith.constant 0 : i32
    %c0_i32_0 = arith.constant 0 : i32
    return %arg0, %c0_i32 : i32, i32
  }
}

module attributes {stable_mosaic.version = 11 : i64} {
  func.func @_actor_kernel(%arg0: i32, %arg1: memref<4x8x12xf32, #tpu.memory_space<vmem>>, %arg2: memref<12x128xf32, #tpu.memory_space<vmem>>, %arg3: memref<1x128xf32, #tpu.memory_space<vmem>>, %arg4: memref<1x128xf32, #tpu.memory_space<vmem>>, %arg5: memref<1x128xf32, #tpu.memory_space<vmem>>, %arg6: memref<4x128x400xf32, #tpu.memory_space<vmem>>, %arg7: memref<1x400xf32, #tpu.memory_space<vmem>>, %arg8: memref<1x400xf32, #tpu.memory_space<vmem>>, %arg9: memref<1x400xf32, #tpu.memory_space<vmem>>, %arg10: memref<400x6xf32, #tpu.memory_space<vmem>>, %arg11: memref<1x6xf32, #tpu.memory_space<vmem>>, %arg12: memref<8x6xf32, #tpu.memory_space<vmem>>) attributes {dimension_semantics = [#tpu.dimension_semantics<parallel>], iteration_bounds = array<i64: 1>, scalar_prefetch = 0 : i64, scratch_operands = 0 : i64, tpu.core_type = #tpu.core_type<tc>, window_params = [{transform_indices = @transform_0, window_bounds = array<i64: 4, 8, 12>}, {pipeline_mode = #tpu.pipeline_mode<synchronous>, transform_indices = @transform_1, window_bounds = array<i64: 12, 128>}, {pipeline_mode = #tpu.pipeline_mode<synchronous>, transform_indices = @transform_2, window_bounds = array<i64: 1, 128>}, {pipeline_mode = #tpu.pipeline_mode<synchronous>, transform_indices = @transform_3, window_bounds = array<i64: 1, 128>}, {pipeline_mode = #tpu.pipeline_mode<synchronous>, transform_indices = @transform_4, window_bounds = array<i64: 1, 128>}, {pipeline_mode = #tpu.pipeline_mode<synchronous>, transform_indices = @transform_5, window_bounds = array<i64: 4, 128, 400>}, {pipeline_mode = #tpu.pipeline_mode<synchronous>, transform_indices = @transform_6, window_bounds = array<i64: 1, 400>}, {pipeline_mode = #tpu.pipeline_mode<synchronous>, transform_indices = @transform_7, window_bounds = array<i64: 1, 400>}, {pipeline_mode = #tpu.pipeline_mode<synchronous>, transform_indices = @transform_8, window_bounds = array<i64: 1, 400>}, {pipeline_mode = #tpu.pipeline_mode<synchronous>, transform_indices = @transform_9, window_bounds = array<i64: 400, 6>}, {pipeline_mode = #tpu.pipeline_mode<synchronous>, transform_indices = @transform_10, window_bounds = array<i64: 1, 6>}, {transform_indices = @transform_11, window_bounds = array<i64: 8, 6>}]} {
    %c0 = arith.constant 0 : index
    %c0_0 = arith.constant 0 : index
    %c0_1 = arith.constant 0 : index
    %0 = vector.load %arg1[%c0, %c0_0, %c0_1] : memref<4x8x12xf32, #tpu.memory_space<vmem>>, vector<4x8x12xf32>
    %1 = vector.shape_cast %0 : vector<4x8x12xf32> to vector<32x12xf32>
    %c0_2 = arith.constant 0 : index
    %c0_3 = arith.constant 0 : index
    %2 = vector.load %arg2[%c0_2, %c0_3] : memref<12x128xf32, #tpu.memory_space<vmem>>, vector<12x128xf32>
    %cst = arith.constant dense<0.000000e+00> : vector<32x128xf32>
    %3 = tpu.matmul %1, %2, %cst {dimension_numbers = #tpu.dot_dimension_numbers<[1], [0], [0], [1], [0, 0, 1, 1], [], []>} : vector<32x12xf32>, vector<12x128xf32>, vector<32x128xf32> -> vector<32x128xf32>
    %c0_4 = arith.constant 0 : index
    %c0_5 = arith.constant 0 : index
    %4 = vector.load %arg3[%c0_4, %c0_5] : memref<1x128xf32, #tpu.memory_space<vmem>>, vector<1x128xf32>
    %5 = vector.broadcast %4 : vector<1x128xf32> to vector<32x128xf32>
    %6 = arith.addf %3, %5 : vector<32x128xf32>
    %7 = tpu.iota {dimensions = array<i32: 1>} : vector<1x128xi32>
    %c100_i32 = arith.constant 100 : i32
    %8 = vector.broadcast %c100_i32 : i32 to vector<1x128xi32>
    %9 = arith.cmpi slt, %7, %8 : vector<1x128xi32>
    %cst_6 = arith.constant dense<0.000000e+00> : vector<32xf32>
    %10 = vector.multi_reduction <add>, %6, %cst_6 [1] : vector<32x128xf32> to vector<32xf32>
    %11 = vector.shape_cast %10 : vector<32xf32> to vector<32x1xf32>
    %cst_7 = arith.constant 0.00999999977 : f32
    %12 = vector.broadcast %cst_7 : f32 to vector<32x1xf32>
    %13 = arith.mulf %11, %12 : vector<32x1xf32>
    %14 = vector.broadcast %13 : vector<32x1xf32> to vector<32x128xf32>
    %15 = arith.subf %6, %14 : vector<32x128xf32>
    %cst_8 = arith.constant 0.000000e+00 : f32
    %16 = vector.shape_cast %9 : vector<1x128xi1> to vector<1x128xi1>
    %17 = vector.broadcast %16 : vector<1x128xi1> to vector<32x128xi1>
    %18 = vector.broadcast %cst_8 : f32 to vector<32x128xf32>
    %19 = arith.select %17, %15, %18 : vector<32x128xi1>, vector<32x128xf32>
    %20 = arith.mulf %19, %19 : vector<32x128xf32>
    %cst_9 = arith.constant dense<0.000000e+00> : vector<32xf32>
    %21 = vector.multi_reduction <add>, %20, %cst_9 [1] : vector<32x128xf32> to vector<32xf32>
    %22 = vector.shape_cast %21 : vector<32xf32> to vector<32x1xf32>
    %cst_10 = arith.constant 0.00999999977 : f32
    %23 = vector.broadcast %cst_10 : f32 to vector<32x1xf32>
    %24 = arith.mulf %22, %23 : vector<32x1xf32>
    %cst_11 = arith.constant 9.99999974E-6 : f32
    %25 = vector.broadcast %cst_11 : f32 to vector<32x1xf32>
    %26 = arith.addf %24, %25 : vector<32x1xf32>
    %27 = math.rsqrt %26 : vector<32x1xf32>
    %28 = vector.broadcast %27 : vector<32x1xf32> to vector<32x128xf32>
    %29 = arith.mulf %19, %28 : vector<32x128xf32>
    %c0_12 = arith.constant 0 : index
    %c0_13 = arith.constant 0 : index
    %30 = vector.load %arg4[%c0_12, %c0_13] : memref<1x128xf32, #tpu.memory_space<vmem>>, vector<1x128xf32>
    %31 = vector.broadcast %30 : vector<1x128xf32> to vector<32x128xf32>
    %32 = arith.mulf %29, %31 : vector<32x128xf32>
    %c0_14 = arith.constant 0 : index
    %c0_15 = arith.constant 0 : index
    %33 = vector.load %arg5[%c0_14, %c0_15] : memref<1x128xf32, #tpu.memory_space<vmem>>, vector<1x128xf32>
    %34 = vector.broadcast %33 : vector<1x128xf32> to vector<32x128xf32>
    %35 = arith.addf %32, %34 : vector<32x128xf32>
    %cst_16 = arith.constant 0.000000e+00 : f32
    %36 = vector.broadcast %cst_16 : f32 to vector<32x128xf32>
    %37 = arith.maximumf %35, %36 : vector<32x128xf32>
    %38 = vector.extract_strided_slice %37 {offsets = [0, 0], sizes = [8, 128], strides = [1, 1]} : vector<32x128xf32> to vector<8x128xf32>
    %c0_17 = arith.constant 0 : index
    %c0_18 = arith.constant 0 : index
    %c0_19 = arith.constant 0 : index
    %39 = vector.load %arg6[%c0_17, %c0_18, %c0_19] : memref<4x128x400xf32, #tpu.memory_space<vmem>>, vector<1x128x400xf32>
    %40 = vector.shape_cast %39 : vector<1x128x400xf32> to vector<128x400xf32>
    %cst_20 = arith.constant dense<0.000000e+00> : vector<8x400xf32>
    %41 = tpu.matmul %38, %40, %cst_20 {dimension_numbers = #tpu.dot_dimension_numbers<[1], [0], [0], [1], [0, 0, 1, 1], [], []>} : vector<8x128xf32>, vector<128x400xf32>, vector<8x400xf32> -> vector<8x400xf32>
    %42 = vector.extract_strided_slice %37 {offsets = [8, 0], sizes = [8, 128], strides = [1, 1]} : vector<32x128xf32> to vector<8x128xf32>
    %c1 = arith.constant 1 : index
    %c0_21 = arith.constant 0 : index
    %c0_22 = arith.constant 0 : index
    %43 = vector.load %arg6[%c1, %c0_21, %c0_22] : memref<4x128x400xf32, #tpu.memory_space<vmem>>, vector<1x128x400xf32>
    %44 = vector.shape_cast %43 : vector<1x128x400xf32> to vector<128x400xf32>
    %cst_23 = arith.constant dense<0.000000e+00> : vector<8x400xf32>
    %45 = tpu.matmul %42, %44, %cst_23 {dimension_numbers = #tpu.dot_dimension_numbers<[1], [0], [0], [1], [0, 0, 1, 1], [], []>} : vector<8x128xf32>, vector<128x400xf32>, vector<8x400xf32> -> vector<8x400xf32>
    %46 = arith.addf %41, %45 : vector<8x400xf32>
    %47 = vector.extract_strided_slice %37 {offsets = [16, 0], sizes = [8, 128], strides = [1, 1]} : vector<32x128xf32> to vector<8x128xf32>
    %c2 = arith.constant 2 : index
    %c0_24 = arith.constant 0 : index
    %c0_25 = arith.constant 0 : index
    %48 = vector.load %arg6[%c2, %c0_24, %c0_25] : memref<4x128x400xf32, #tpu.memory_space<vmem>>, vector<1x128x400xf32>
    %49 = vector.shape_cast %48 : vector<1x128x400xf32> to vector<128x400xf32>
    %cst_26 = arith.constant dense<0.000000e+00> : vector<8x400xf32>
    %50 = tpu.matmul %47, %49, %cst_26 {dimension_numbers = #tpu.dot_dimension_numbers<[1], [0], [0], [1], [0, 0, 1, 1], [], []>} : vector<8x128xf32>, vector<128x400xf32>, vector<8x400xf32> -> vector<8x400xf32>
    %51 = arith.addf %46, %50 : vector<8x400xf32>
    %52 = vector.extract_strided_slice %37 {offsets = [24, 0], sizes = [8, 128], strides = [1, 1]} : vector<32x128xf32> to vector<8x128xf32>
    %c3 = arith.constant 3 : index
    %c0_27 = arith.constant 0 : index
    %c0_28 = arith.constant 0 : index
    %53 = vector.load %arg6[%c3, %c0_27, %c0_28] : memref<4x128x400xf32, #tpu.memory_space<vmem>>, vector<1x128x400xf32>
    %54 = vector.shape_cast %53 : vector<1x128x400xf32> to vector<128x400xf32>
    %cst_29 = arith.constant dense<0.000000e+00> : vector<8x400xf32>
    %55 = tpu.matmul %52, %54, %cst_29 {dimension_numbers = #tpu.dot_dimension_numbers<[1], [0], [0], [1], [0, 0, 1, 1], [], []>} : vector<8x128xf32>, vector<128x400xf32>, vector<8x400xf32> -> vector<8x400xf32>
    %56 = arith.addf %51, %55 : vector<8x400xf32>
    %c0_30 = arith.constant 0 : index
    %c0_31 = arith.constant 0 : index
    %57 = vector.load %arg7[%c0_30, %c0_31] : memref<1x400xf32, #tpu.memory_space<vmem>>, vector<1x400xf32>
    %58 = vector.broadcast %57 : vector<1x400xf32> to vector<8x400xf32>
    %59 = arith.addf %56, %58 : vector<8x400xf32>
    %cst_32 = arith.constant dense<0.000000e+00> : vector<8xf32>
    %60 = vector.multi_reduction <add>, %59, %cst_32 [1] : vector<8x400xf32> to vector<8xf32>
    %61 = vector.shape_cast %60 : vector<8xf32> to vector<8x1xf32>
    %cst_33 = arith.constant 2.500000e-03 : f32
    %62 = vector.broadcast %cst_33 : f32 to vector<8x1xf32>
    %63 = arith.mulf %61, %62 : vector<8x1xf32>
    %64 = vector.broadcast %63 : vector<8x1xf32> to vector<8x400xf32>
    %65 = arith.subf %59, %64 : vector<8x400xf32>
    %66 = arith.mulf %65, %65 : vector<8x400xf32>
    %cst_34 = arith.constant dense<0.000000e+00> : vector<8xf32>
    %67 = vector.multi_reduction <add>, %66, %cst_34 [1] : vector<8x400xf32> to vector<8xf32>
    %68 = vector.shape_cast %67 : vector<8xf32> to vector<8x1xf32>
    %cst_35 = arith.constant 2.500000e-03 : f32
    %69 = vector.broadcast %cst_35 : f32 to vector<8x1xf32>
    %70 = arith.mulf %68, %69 : vector<8x1xf32>
    %cst_36 = arith.constant 9.99999974E-6 : f32
    %71 = vector.broadcast %cst_36 : f32 to vector<8x1xf32>
    %72 = arith.addf %70, %71 : vector<8x1xf32>
    %73 = math.rsqrt %72 : vector<8x1xf32>
    %74 = vector.broadcast %73 : vector<8x1xf32> to vector<8x400xf32>
    %75 = arith.mulf %65, %74 : vector<8x400xf32>
    %c0_37 = arith.constant 0 : index
    %c0_38 = arith.constant 0 : index
    %76 = vector.load %arg8[%c0_37, %c0_38] : memref<1x400xf32, #tpu.memory_space<vmem>>, vector<1x400xf32>
    %77 = vector.broadcast %76 : vector<1x400xf32> to vector<8x400xf32>
    %78 = arith.mulf %75, %77 : vector<8x400xf32>
    %c0_39 = arith.constant 0 : index
    %c0_40 = arith.constant 0 : index
    %79 = vector.load %arg9[%c0_39, %c0_40] : memref<1x400xf32, #tpu.memory_space<vmem>>, vector<1x400xf32>
    %80 = vector.broadcast %79 : vector<1x400xf32> to vector<8x400xf32>
    %81 = arith.addf %78, %80 : vector<8x400xf32>
    %cst_41 = arith.constant 0.000000e+00 : f32
    %82 = vector.broadcast %cst_41 : f32 to vector<8x400xf32>
    %83 = arith.maximumf %81, %82 : vector<8x400xf32>
    %c0_42 = arith.constant 0 : index
    %c0_43 = arith.constant 0 : index
    %84 = vector.load %arg10[%c0_42, %c0_43] : memref<400x6xf32, #tpu.memory_space<vmem>>, vector<400x6xf32>
    %cst_44 = arith.constant dense<0.000000e+00> : vector<8x6xf32>
    %85 = tpu.matmul %83, %84, %cst_44 {dimension_numbers = #tpu.dot_dimension_numbers<[1], [0], [0], [1], [0, 0, 1, 1], [], []>} : vector<8x400xf32>, vector<400x6xf32>, vector<8x6xf32> -> vector<8x6xf32>
    %c0_45 = arith.constant 0 : index
    %c0_46 = arith.constant 0 : index
    %86 = vector.load %arg11[%c0_45, %c0_46] : memref<1x6xf32, #tpu.memory_space<vmem>>, vector<1x6xf32>
    %87 = vector.broadcast %86 : vector<1x6xf32> to vector<8x6xf32>
    %88 = arith.addf %85, %87 : vector<8x6xf32>
    %cst_47 = arith.constant 0.000000e+00 : f32
    %89 = vector.broadcast %cst_47 : f32 to vector<8x6xf32>
    %90 = arith.subf %89, %88 : vector<8x6xf32>
    %91 = math.exp %90 : vector<8x6xf32>
    %cst_48 = arith.constant 1.000000e+00 : f32
    %92 = vector.broadcast %cst_48 : f32 to vector<8x6xf32>
    %93 = arith.addf %92, %91 : vector<8x6xf32>
    %94 = tpu.reciprocal %93 : vector<8x6xf32> -> vector<8x6xf32>
    %c0_49 = arith.constant 0 : index
    %c0_50 = arith.constant 0 : index
    %95 = vector.load %arg12[%c0_49, %c0_50] : memref<8x6xf32, #tpu.memory_space<vmem>>, vector<8x6xf32>
    tpu.vector_store %arg12[%c0_49, %c0_50], %94 {strides = array<i32>} : memref<8x6xf32, #tpu.memory_space<vmem>>, vector<8x6xf32>,
    return
  }
  func.func @transform_0(%arg0: i32) -> (i32, i32, i32) {
    %c0_i32 = arith.constant 0 : i32
    %c0_i32_0 = arith.constant 0 : i32
    %c0_i32_1 = arith.constant 0 : i32
    return %c0_i32, %arg0, %c0_i32_0 : i32, i32, i32
  }
  func.func @transform_1(%arg0: i32) -> (i32, i32) {
    %c0_i32 = arith.constant 0 : i32
    %c0_i32_0 = arith.constant 0 : i32
    %c0_i32_1 = arith.constant 0 : i32
    return %c0_i32, %c0_i32_0 : i32, i32
  }
  func.func @transform_2(%arg0: i32) -> (i32, i32) {
    %c0_i32 = arith.constant 0 : i32
    %c0_i32_0 = arith.constant 0 : i32
    %c0_i32_1 = arith.constant 0 : i32
    return %c0_i32, %c0_i32_0 : i32, i32
  }
  func.func @transform_3(%arg0: i32) -> (i32, i32) {
    %c0_i32 = arith.constant 0 : i32
    %c0_i32_0 = arith.constant 0 : i32
    %c0_i32_1 = arith.constant 0 : i32
    return %c0_i32, %c0_i32_0 : i32, i32
  }
  func.func @transform_4(%arg0: i32) -> (i32, i32) {
    %c0_i32 = arith.constant 0 : i32
    %c0_i32_0 = arith.constant 0 : i32
    %c0_i32_1 = arith.constant 0 : i32
    return %c0_i32, %c0_i32_0 : i32, i32
  }
  func.func @transform_5(%arg0: i32) -> (i32, i32, i32) {
    %c0_i32 = arith.constant 0 : i32
    %c0_i32_0 = arith.constant 0 : i32
    %c0_i32_1 = arith.constant 0 : i32
    %c0_i32_2 = arith.constant 0 : i32
    return %c0_i32, %c0_i32_0, %c0_i32_1 : i32, i32, i32
  }
  func.func @transform_6(%arg0: i32) -> (i32, i32) {
    %c0_i32 = arith.constant 0 : i32
    %c0_i32_0 = arith.constant 0 : i32
    %c0_i32_1 = arith.constant 0 : i32
    return %c0_i32, %c0_i32_0 : i32, i32
  }
  func.func @transform_7(%arg0: i32) -> (i32, i32) {
    %c0_i32 = arith.constant 0 : i32
    %c0_i32_0 = arith.constant 0 : i32
    %c0_i32_1 = arith.constant 0 : i32
    return %c0_i32, %c0_i32_0 : i32, i32
  }
  func.func @transform_8(%arg0: i32) -> (i32, i32) {
    %c0_i32 = arith.constant 0 : i32
    %c0_i32_0 = arith.constant 0 : i32
    %c0_i32_1 = arith.constant 0 : i32
    return %c0_i32, %c0_i32_0 : i32, i32
  }
  func.func @transform_9(%arg0: i32) -> (i32, i32) {
    %c0_i32 = arith.constant 0 : i32
    %c0_i32_0 = arith.constant 0 : i32
    %c0_i32_1 = arith.constant 0 : i32
    return %c0_i32, %c0_i32_0 : i32, i32
  }
  func.func @transform_10(%arg0: i32) -> (i32, i32) {
    %c0_i32 = arith.constant 0 : i32
    %c0_i32_0 = arith.constant 0 : i32
    %c0_i32_1 = arith.constant 0 : i32
    return %c0_i32, %c0_i32_0 : i32, i32
  }
  func.func @transform_11(%arg0: i32) -> (i32, i32) {
    %c0_i32 = arith.constant 0 : i32
    %c0_i32_0 = arith.constant 0 : i32
    return %arg0, %c0_i32 : i32, i32
  }
}

</mosaic_0001>

<bundles_post_ra>
// kernel: tpu_custom_call.1
= control target key start
LH: loop header
LB: loop body
LE: loop exit
PB: predicated region body
PF: predicated region fallthrough
CT: control target
= control target key end

     0   :  { %vm62_vm0 = vcmask 1043456   ;;  %vm49_vm1 = vcmask 97280   ;;  %s2416_s0 = inlined_call_operand.vmem [shape: f32[4,8,12], index: 0, kind: input, shape index: {}]   ;;  %s2417_s1 = inlined_call_operand.vmem [shape: f32[12,128], index: 1, kind: input, shape index: {}]   ;;  %s2418_s2 = inlined_call_operand.vmem [shape: f32[1,128], index: 2, kind: input, shape index: {}]   ;;  %s2419_s3 = inlined_call_operand.vmem [shape: f32[1,128], index: 3, kind: input, shape index: {}]   ;;  %s2420_s4 = inlined_call_operand.vmem [shape: f32[1,128], index: 4, kind: input, shape index: {}]   ;;  %s2421_s5 = inlined_call_operand.vmem [shape: f32[4,128,400], index: 5, kind: input, shape index: {}]   ;;  %s2422_s6 = inlined_call_operand.vmem [shape: f32[1,400], index: 6, kind: input, shape index: {}]   ;;  %s2423_s7 = inlined_call_operand.vmem [shape: f32[1,400], index: 7, kind: input, shape index: {}]   ;;  %s2424_s8 = inlined_call_operand.vmem [shape: f32[1,400], index: 8, kind: input, shape index: {}]   ;;  %s2425_s9 = inlined_call_operand.vmem [shape: f32[400,6], index: 9, kind: input, shape index: {}]   ;;  %s2426_s10 = inlined_call_operand.vmem [shape: f32[1,6], index: 10, kind: input, shape index: {}]   ;;  %s2427_s11 = inlined_call_operand.hbm [shape: f32[8,6], index: 11, kind: output, shape index: {}]  }
   0x1   :  { %v44_v0 = vld [vmem:[%s2417_s1 + $0x8] sm:$0xf]  ;;  %v43_v1 = vld [vmem:[%s2417_s1] sm:$0xff] }
   0x2   :  { %1048 = vmatpush.msk.msra.mxu0 %vm62_vm0, %v44_v0  ;;  %v39_v2 = vld [vmem:[%s2416_s0] sm:$0xff] }
   0x4   :  { %81 = vmatpush.msra.mxu0 %v43_v1 }
   0x5   :  { %16 = vsyncpa [#allocation3], 0  ;;  %1049 = vmatmul.msk.f32.vlgmr.msra.gmra.mxu0 %vm49_vm1, %v39_v2  ;;  %v40_v3 = vld [vmem:[%s2416_s0 + $0x8] sm:$0xff]  ;;  %v41_v4 = vld [vmem:[%s2416_s0 + $0x10] sm:$0xff]  ;;  %v95_v21 = vlaneseq  ;;  %vm807_vm15 = vcmask 130048   ;;  %s1039_s21 = sshll.u32 %s2427_s11, 4  ;;  %s1040_s21 = int_to_ptr.hbm [resolvable:$true] %s1039_s21 }
   0x6   :  { %v42_v5 = vld [vmem:[%s2416_s0 + $0x18] sm:$0xff]  ;;  %v1247_v7 = vld [vmem:[%s2418_s2] ss:$0 sm:$0xff]  ;;  %v1114_v16 = vld [vmem:[%s2421_s5 + $0x3e8] sm:$0xff] }
   0x7   :  { %v1113_v15 = vld [vmem:[%s2421_s5 + $0x3e0] sm:$0xff]  ;;  %v1115_v17 = vld [vmem:[%s2421_s5 + $0x3f0] sm:$0xff]  ;;  %353 = vmatpush.msra.mxu2 %v1114_v16  ;;  %v1116_v18 = vld [vmem:[%s2421_s5 + $0x3f8] sm:$0xff]  ;;  %v1433_v32 = vand.u32 127, %v95_v21 }
   0x8   :  { %333 = vmatpush.msra.mxu1 %v1113_v15  ;;  %v1109_v19 = vld [vmem:[%s2421_s5 + $0x3c0] sm:$0xff]  ;;  %v1110_v20 = vld [vmem:[%s2421_s5 + $0x3c8] sm:$0xff]  ;;  %373 = vmatpush.msra.mxu3 %v1115_v17  ;;  %v1111_v22 = vld [vmem:[%s2421_s5 + $0x3d0] sm:$0xff] }
   0x9   :  { %393 = vmatpush.msrb.mxu0 %v1116_v18  ;;  %v1112_v23 = vld [vmem:[%s2421_s5 + $0x3d8] sm:$0xff]  ;;  %v1105_v24 = vld [vmem:[%s2421_s5 + $0x3a0] sm:$0xff]  ;;  %354 = vmatpush.msra.mxu2 %v1110_v20  ;;  %v1106_v25 = vld [vmem:[%s2421_s5 + $0x3a8] sm:$0xff]  ;;  %vm97_vm2 = vcmp.lt.s32.totalorder %v1433_v32, 100 }
   0xa   :  { %334 = vmatpush.msra.mxu1 %v1109_v19  ;;  %v1107_v26 = vld [vmem:[%s2421_s5 + $0x3b0] sm:$0xff]  ;;  %v1108_v27 = vld [vmem:[%s2421_s5 + $0x3b8] sm:$0xff]  ;;  %374 = vmatpush.msra.mxu3 %v1111_v22  ;;  %v1101_v28 = vld [vmem:[%s2421_s5 + $0x380] sm:$0xff] }
   0xb   :  { %394 = vmatpush.msrb.mxu0 %v1112_v23  ;;  %v1102_v29 = vld [vmem:[%s2421_s5 + $0x388] sm:$0xff]  ;;  %355 = vmatpush.msra.mxu2 %v1106_v25  ;;  %v1103_v30 = vld [vmem:[%s2421_s5 + $0x390] sm:$0xff]  ;;  %v1104_v31 = vld [vmem:[%s2421_s5 + $0x398] sm:$0xff] }
   0xc   :  { %335 = vmatpush.msra.mxu1 %v1105_v24  ;;  %375 = vmatpush.msra.mxu3 %v1107_v26  ;;  %v1097_v33 = vld [vmem:[%s2421_s5 + $0x360] sm:$0xff]  ;;  %v1098_v34 = vld [vmem:[%s2421_s5 + $0x368] sm:$0xff]  ;;  %v1099_v35 = vld [vmem:[%s2421_s5 + $0x370] sm:$0xff] }
   0xd   :  { %1050 = vmatmul.msk.f32.gmra.mxu0 %vm49_vm1, %v40_v3  ;;  %356 = vmatpush.msra.mxu2 %v1102_v29  ;;  %v1100_v36 = vld [vmem:[%s2421_s5 + $0x378] sm:$0xff]  ;;  %v1093_v38 = vld [vmem:[%s2421_s5 + $0x340] sm:$0xff]  ;;  %v1094_v39 = vld [vmem:[%s2421_s5 + $0x348] sm:$0xff] }
   0xe   :  { %395 = vmatpush.msrb.mxu0 %v1108_v27  ;;  %336 = vmatpush.msra.mxu1 %v1101_v28  ;;  %v1095_v41 = vld [vmem:[%s2421_s5 + $0x350] sm:$0xff]  ;;  %v1096_v42 = vld [vmem:[%s2421_s5 + $0x358] sm:$0xff]  ;;  %v1089_v43 = vld [vmem:[%s2421_s5 + $0x320] sm:$0xff] }
   0xf   :  { %376 = vmatpush.msra.mxu3 %v1103_v30  ;;  %357 = vmatpush.msra.mxu2 %v1098_v34  ;;  %v1090_v44 = vld [vmem:[%s2421_s5 + $0x328] sm:$0xff]  ;;  %v1091_v46 = vld [vmem:[%s2421_s5 + $0x330] sm:$0xff]  ;;  %v1092_v47 = vld [vmem:[%s2421_s5 + $0x338] sm:$0xff] }
  0x10   :  { %396 = vmatpush.msrb.mxu0 %v1104_v31  ;;  %337 = vmatpush.msra.mxu1 %v1097_v33  ;;  %v1085_v48 = vld [vmem:[%s2421_s5 + $0x300] sm:$0xff]  ;;  %v1086_v49 = vld [vmem:[%s2421_s5 + $0x308] sm:$0xff]  ;;  %v1087_v51 = vld [vmem:[%s2421_s5 + $0x310] sm:$0xff] }
  0x11   :  { %377 = vmatpush.msra.mxu3 %v1099_v35  ;;  %358 = vmatpush.msra.mxu2 %v1094_v39  ;;  %v1088_v53 = vld [vmem:[%s2421_s5 + $0x318] sm:$0xff]  ;;  %v1081_v54 = vld [vmem:[%s2421_s5 + $0x2e0] sm:$0xff]  ;;  %v1082_v55 = vld [vmem:[%s2421_s5 + $0x2e8] sm:$0xff] }
  0x12   :  { %397 = vmatpush.msrb.mxu0 %v1100_v36  ;;  %338 = vmatpush.msra.mxu1 %v1093_v38  ;;  %v1083_v56 = vld [vmem:[%s2421_s5 + $0x2f0] sm:$0xff]  ;;  %v1084_v59 = vld [vmem:[%s2421_s5 + $0x2f8] sm:$0xff]  ;;  %v1077_v60 = vld [vmem:[%s2421_s5 + $0x2c0] sm:$0xff] }
  0x13   :  { %378 = vmatpush.msra.mxu3 %v1095_v41  ;;  %359 = vmatpush.msra.mxu2 %v1090_v44  ;;  %v1078_v63 = vld [vmem:[%s2421_s5 + $0x2c8] sm:$0xff]  ;;  %v1079_v0 = vld [vmem:[%s2421_s5 + $0x2d0] sm:$0xff]  ;;  %v1080_v1 = vld [vmem:[%s2421_s5 + $0x2d8] sm:$0xff] }
  0x14   :  { %398 = vmatpush.msrb.mxu0 %v1096_v42  ;;  %339 = vmatpush.msra.mxu1 %v1089_v43  ;;  %v1073_v2 = vld [vmem:[%s2421_s5 + $0x2a0] sm:$0xff]  ;;  %v1071_v15 = vld [vmem:[%s2421_s5 + $0x290] sm:$0xff]  ;;  %v1072_v16 = vld [vmem:[%s2421_s5 + $0x298] sm:$0xff] }
  0x15   :  { %1051 = vmatmul.msk.f32.gmra.mxu0 %vm49_vm1, %v41_v4  ;;  %379 = vmatpush.msra.mxu3 %v1091_v46  ;;  %v1065_v17 = vld [vmem:[%s2421_s5 + $0x260] sm:$0xff]  ;;  %v1066_v19 = vld [vmem:[%s2421_s5 + $0x268] sm:$0xff]  ;;  %v1067_v20 = vld [vmem:[%s2421_s5 + $0x270] sm:$0xff] }
  0x16   :  { %399 = vmatpush.msrb.mxu0 %v1092_v47  ;;  %340 = vmatpush.msra.mxu1 %v1085_v48  ;;  %v1068_v22 = vld [vmem:[%s2421_s5 + $0x278] sm:$0xff]  ;;  %v1061_v23 = vld [vmem:[%s2421_s5 + $0x240] sm:$0xff]  ;;  %v1062_v24 = vld [vmem:[%s2421_s5 + $0x248] sm:$0xff] }
  0x17   :  { %360 = vmatpush.msra.mxu2 %v1086_v49  ;;  %380 = vmatpush.msra.mxu3 %v1087_v51  ;;  %v1063_v25 = vld [vmem:[%s2421_s5 + $0x250] sm:$0xff]  ;;  %v1064_v27 = vld [vmem:[%s2421_s5 + $0x258] sm:$0xff]  ;;  %v1057_v28 = vld [vmem:[%s2421_s5 + $0x220] sm:$0xff] }
  0x18   :  { %400 = vmatpush.msrb.mxu0 %v1088_v53  ;;  %341 = vmatpush.msra.mxu1 %v1081_v54  ;;  %v1058_v29 = vld [vmem:[%s2421_s5 + $0x228] sm:$0xff]  ;;  %v1060_v31 = vld [vmem:[%s2421_s5 + $0x238] sm:$0xff]  ;;  %v1053_v34 = vld [vmem:[%s2421_s5 + $0x200] sm:$0xff] }
  0x19   :  { %361 = vmatpush.msra.mxu2 %v1082_v55  ;;  %381 = vmatpush.msra.mxu3 %v1083_v56  ;;  %v1054_v32 = vld [vmem:[%s2421_s5 + $0x208] sm:$0xff]  ;;  %v1055_v35 = vld [vmem:[%s2421_s5 + $0x210] sm:$0xff]  ;;  %v1056_v36 = vld [vmem:[%s2421_s5 + $0x218] sm:$0xff] }
  0x1a   :  { %401 = vmatpush.msrb.mxu0 %v1084_v59  ;;  %342 = vmatpush.msra.mxu1 %v1077_v60  ;;  %v265_v38 = vld [vmem:[%s2421_s5 + $0x1e8] sm:$0xff]  ;;  %v266_v39 = vld [vmem:[%s2421_s5 + $0x1f0] sm:$0xff]  ;;  %v260_v41 = vld [vmem:[%s2421_s5 + $0x1c0] sm:$0xff] }
  0x1b   :  { %362 = vmatpush.msra.mxu2 %v1078_v63  ;;  %382 = vmatpush.msra.mxu3 %v1079_v0  ;;  %v261_v42 = vld [vmem:[%s2421_s5 + $0x1c8] sm:$0xff]  ;;  %v262_v43 = vld [vmem:[%s2421_s5 + $0x1d0] sm:$0xff]  ;;  %v263_v44 = vld [vmem:[%s2421_s5 + $0x1d8] sm:$0xff] }
  0x1c   :  { %402 = vmatpush.msrb.mxu0 %v1080_v1  ;;  %343 = vmatpush.msra.mxu1 %v1073_v2  ;;  %v257_v46 = vld [vmem:[%s2421_s5 + $0x1a8] sm:$0xff]  ;;  %v258_v47 = vld [vmem:[%s2421_s5 + $0x1b0] sm:$0xff]  ;;  %v259_v48 = vld [vmem:[%s2421_s5 + $0x1b8] sm:$0xff] }
  0x1d   :  { %1052 = vmatmul.msk.f32.gmra.mxu0 %vm49_vm1, %v42_v5  ;;  %v1074_v5 = vld [vmem:[%s2421_s5 + $0x2a8] sm:$0xff]  ;;  %v252_v49 = vld [vmem:[%s2421_s5 + $0x180] sm:$0xff]  ;;  %v255_v53 = vld [vmem:[%s2421_s5 + $0x198] sm:$0xff] }
  0x1e   :  { %363 = vmatpush.msra.mxu2 %v1074_v5  ;;  %v253_v51 = vld [vmem:[%s2421_s5 + $0x188] sm:$0xff]  ;;  %v248_v54 = vld [vmem:[%s2421_s5 + $0x160] sm:$0xff]  ;;  %v250_v56 = vld [vmem:[%s2421_s5 + $0x170] sm:$0xff] }
  0x1f   :  { %v249_v55 = vld [vmem:[%s2421_s5 + $0x168] sm:$0xff]  ;;  %v246_v60 = vld [vmem:[%s2421_s5 + $0x150] sm:$0xff]  ;;  %v243_v1 = vld [vmem:[%s2421_s5 + $0x138] sm:$0xff] }
  0x20   :  { %v245_v59 = vld [vmem:[%s2421_s5 + $0x148] sm:$0xff]  ;;  %v242_v0 = vld [vmem:[%s2421_s5 + $0x130] sm:$0xff]  ;;  %v236_v2 = vld [vmem:[%s2421_s5 + $0x100] sm:$0xff] }
  0x21   :  { %v241_v63 = vld [vmem:[%s2421_s5 + $0x128] sm:$0xff]  ;;  %v239_v5 = vld [vmem:[%s2421_s5 + $0x118] sm:$0xff] }
  0x82   :  { %v83_v6 = vpop.f32.mrf.mxu0 }
  0x83   :  { %v1376_v11 = vadd.f32 %v1247_v7, %v83_v6  ;;  %v1075_v6 = vld [vmem:[%s2421_s5 + $0x2b0] sm:$0xff] }
  0x84   :  { %383 = vmatpush.msra.mxu3 %v1075_v6  ;;  %v232_v6 = vld [vmem:[%s2421_s5 + $0xe0] sm:$0xff] }
  0x86   :  { %384 = vmatpush.msra.mxu3 %v1071_v15  ;;  %v230_v15 = vld [vmem:[%s2421_s5 + $0xd0] sm:$0xff] }
  0x88   :  { %385 = vmatpush.msra.mxu3 %v1067_v20  ;;  %v227_v20 = vld [vmem:[%s2421_s5 + $0xb8] sm:$0xff] }
  0x8a   :  { %v86_v8 = vpop.f32.mrf.mxu0  ;;  %386 = vmatpush.msra.mxu3 %v1063_v25  ;;  %v216_v25 = vld [vmem:[%s2421_s5 + $0x60] sm:$0xff] }
  0x8b   :  { %v1373_v9 = vadd.f32 %v1247_v7, %v86_v8  ;;  %v1069_v8 = vld [vmem:[%s2421_s5 + $0x280] sm:$0xff] }
  0x8c   :  { %344 = vmatpush.msra.mxu1 %v1069_v8  ;;  %v234_v8 = vld [vmem:[%s2421_s5 + $0xf0] sm:$0xff] }
  0x8d   :  { %100 = vadd.xlane.f32.xlu0 %v1373_v9 }
  0x8e   :  { %345 = vmatpush.msra.mxu1 %v1065_v17  ;;  %v224_v17 = vld [vmem:[%s2421_s5 + $0xa0] sm:$0xff] }
  0x90   :  { %346 = vmatpush.msra.mxu1 %v1061_v23  ;;  %v222_v23 = vld [vmem:[%s2421_s5 + $0x90] sm:$0xff] }
  0x92   :  { %v89_v10 = vpop.f32.mrf.mxu0  ;;  %347 = vmatpush.msra.mxu1 %v1057_v28  ;;  %v219_v28 = vld [vmem:[%s2421_s5 + $0x78] sm:$0xff] }
  0x93   :  { %v1378_v12 = vadd.f32 %v1247_v7, %v89_v10 }
  0x94   :  { %348 = vmatpush.msra.mxu1 %v1053_v34  ;;  %v208_v34 = vld [vmem:[%s2421_s5 + $0x20] sm:$0xff] }
  0x95   :  { %102 = vadd.xlane.f32.xlu1 %v1378_v12  ;;  %98 = vadd.xlane.f32.xlu0 %v1376_v11 }
  0x9a   :  { %v92_v13 = vpop.f32.mrf.mxu0 }
  0x9b   :  { %v1382_v14 = vadd.f32 %v1247_v7, %v92_v13  ;;  %v1076_v7 = vld [vmem:[%s2421_s5 + $0x2b8] sm:$0xff]  ;;  %v1070_v13 = vld [vmem:[%s2421_s5 + $0x288] sm:$0xff] }
  0x9c   :  { %403 = vmatpush.msrb.mxu0 %v1076_v7  ;;  %364 = vmatpush.msra.mxu2 %v1070_v13  ;;  %v233_v7 = vld [vmem:[%s2421_s5 + $0xe8] sm:$0xff] }
  0x9d   :  { %104 = vadd.xlane.f32.xlu1 %v1382_v14  ;;  %v229_v13 = vld [vmem:[%s2421_s5 + $0xc8] sm:$0xff] }
  0x9e   :  { %404 = vmatpush.msrb.mxu0 %v1072_v16  ;;  %365 = vmatpush.msra.mxu2 %v1066_v19  ;;  %v231_v16 = vld [vmem:[%s2421_s5 + $0xd8] sm:$0xff]  ;;  %v226_v19 = vld [vmem:[%s2421_s5 + $0xb0] sm:$0xff] }
  0xa0   :  { %405 = vmatpush.msrb.mxu0 %v1068_v22  ;;  %366 = vmatpush.msra.mxu2 %v1062_v24  ;;  %v221_v22 = vld [vmem:[%s2421_s5 + $0x88] sm:$0xff]  ;;  %v223_v24 = vld [vmem:[%s2421_s5 + $0x98] sm:$0xff] }
  0xa2   :  { %406 = vmatpush.msrb.mxu0 %v1064_v27  ;;  %367 = vmatpush.msra.mxu2 %v1058_v29  ;;  %v218_v27 = vld [vmem:[%s2421_s5 + $0x70] sm:$0xff]  ;;  %v212_v29 = vld [vmem:[%s2421_s5 + $0x40] sm:$0xff] }
  0xa4   :  { %407 = vmatpush.msrb.mxu0 %v1060_v31  ;;  %368 = vmatpush.msra.mxu2 %v1054_v32  ;;  %v214_v31 = vld [vmem:[%s2421_s5 + $0x50] sm:$0xff]  ;;  %v209_v32 = vld [vmem:[%s2421_s5 + $0x28] sm:$0xff] }
  0xa6   :  { %408 = vmatpush.msrb.mxu0 %v1056_v36  ;;  %433 = vmatpush.msrb.mxu2 %v265_v38  ;;  %v211_v36 = vld [vmem:[%s2421_s5 + $0x38] sm:$0xff]  ;;  %v205_v38 = vld [vmem:[%s2421_s5 + $0x8] sm:$0xff] }
  0xa8   :  { %434 = vmatpush.msrb.mxu2 %v261_v42 }
  0xaa   :  { %435 = vmatpush.msrb.mxu2 %v257_v46 }
  0xac   :  { %436 = vmatpush.msrb.mxu2 %v253_v51 }
  0xae   :  { %437 = vmatpush.msrb.mxu2 %v249_v55 }
  0xb0   :  { %438 = vmatpush.msrb.mxu2 %v245_v59 }
  0xb2   :  { %439 = vmatpush.msrb.mxu2 %v241_v63 }
 0x100   :  { %v101_v37 = vpop.xlane.xlu0 %100 }
 0x101   :  { %v107_v40 = vmul.f32 0.01, %v101_v37  ;;  %v264_v37 = vld [vmem:[%s2421_s5 + $0x1e0] sm:$0xff] }
 0x102   :  { %413 = vmatpush.msrb.mxu1 %v264_v37  ;;  %v204_v37 = vld [vmem:[%s2421_s5] sm:$0xff] }
 0x103   :  { %v111_v45 = vsub.f32 %v1373_v9, %v107_v40  ;;  %v267_v40 = vld [vmem:[%s2421_s5 + $0x1f8] sm:$0xff] }
 0x104   :  { %473 = vmatpush.msra.mxu0 %v267_v40  ;;  %414 = vmatpush.msrb.mxu1 %v260_v41  ;;  %v207_v40 = vld [vmem:[%s2421_s5 + $0x18] sm:$0xff] }
 0x105   :  { %v1481_v50 = vsel %vm97_vm2, %v111_v45, 0.0  ;;  %v256_v45 = vld [vmem:[%s2421_s5 + $0x1a0] sm:$0xff] }
 0x106   :  { %v121_v52 = vmul.f32 %v1481_v50, %v1481_v50  ;;  %474 = vmatpush.msra.mxu0 %v263_v44  ;;  %415 = vmatpush.msrb.mxu1 %v256_v45 }
 0x108   :  { %v103_v57 = vpop.xlane.xlu1 %102  ;;  %126 = vadd.xlane.f32.xlu2 %v121_v52  ;;  %v99_v58 = vpop.xlane.xlu0 %98  ;;  %475 = vmatpush.msra.mxu0 %v259_v48  ;;  %v254_v52 = vld [vmem:[%s2421_s5 + $0x190] sm:$0xff] }
 0x109   :  { %v108_v61 = vmul.f32 0.01, %v103_v57  ;;  %v106_v62 = vmul.f32 0.01, %v99_v58  ;;  %416 = vmatpush.msrb.mxu1 %v252_v49  ;;  %v251_v57 = vld [vmem:[%s2421_s5 + $0x178] sm:$0xff]  ;;  %v244_v58 = vld [vmem:[%s2421_s5 + $0x140] sm:$0xff] }
 0x10a   :  { %476 = vmatpush.msra.mxu0 %v255_v53 }
 0x10b   :  { %v112_v3 = vsub.f32 %v1378_v12, %v108_v61  ;;  %v110_v4 = vsub.f32 %v1376_v11, %v106_v62  ;;  %417 = vmatpush.msrb.mxu1 %v248_v54  ;;  %v247_v61 = vld [vmem:[%s2421_s5 + $0x158] sm:$0xff]  ;;  %v240_v62 = vld [vmem:[%s2421_s5 + $0x120] sm:$0xff] }
 0x10c   :  { %477 = vmatpush.msra.mxu0 %v251_v57 }
 0x10d   :  { %v1534_v9 = vsel %vm97_vm2, %v112_v3, 0.0  ;;  %v1538_v10 = vsel %vm97_vm2, %v110_v4, 0.0  ;;  %418 = vmatpush.msrb.mxu1 %v244_v58  ;;  %v237_v3 = vld [vmem:[%s2421_s5 + $0x108] sm:$0xff]  ;;  %v238_v4 = vld [vmem:[%s2421_s5 + $0x110] sm:$0xff] }
 0x10e   :  { %v122_v11 = vmul.f32 %v1534_v9, %v1534_v9  ;;  %v120_v12 = vmul.f32 %v1538_v10, %v1538_v10  ;;  %478 = vmatpush.msra.mxu0 %v247_v61  ;;  %440 = vmatpush.msrb.mxu2 %v237_v3 }
 0x10f   :  { %419 = vmatpush.msrb.mxu1 %v240_v62  ;;  %v1806_v62 = vld [vmem:[%s2419_s3] ss:$0 sm:$0xff] }
 0x110   :  { %v105_v18 = vpop.xlane.xlu1 %104  ;;  %128 = vadd.xlane.f32.xlu0 %v122_v11  ;;  %124 = vadd.xlane.f32.xlu2 %v120_v12  ;;  %v235_v11 = vld [vmem:[%s2421_s5 + $0xf8] sm:$0xff]  ;;  %v228_v12 = vld [vmem:[%s2421_s5 + $0xc0] sm:$0xff] }
 0x111   :  { %v109_v21 = vmul.f32 0.01, %v105_v18  ;;  %479 = vmatpush.msra.mxu0 %v243_v1  ;;  %420 = vmatpush.msrb.mxu1 %v236_v2  ;;  %v225_v18 = vld [vmem:[%s2421_s5 + $0xa8] sm:$0xff]  ;;  %v1812_v2 = vld [vmem:[%s2420_s4] ss:$0 sm:$0xff] }
 0x112   :  { %441 = vmatpush.msrb.mxu2 %v233_v7 }
 0x113   :  { %v113_v26 = vsub.f32 %v1382_v14, %v109_v21  ;;  %v1059_v14 = vld [vmem:[%s2421_s5 + $0x230] sm:$0xff]  ;;  %480 = vmatpush.msra.mxu0 %v239_v5  ;;  %421 = vmatpush.msrb.mxu1 %v232_v6  ;;  %v220_v21 = vld [vmem:[%s2421_s5 + $0x80] sm:$0xff] }
 0x114   :  { %387 = vmatpush.msra.mxu3 %v1059_v14  ;;  %442 = vmatpush.msrb.mxu2 %v229_v13  ;;  %v213_v14 = vld [vmem:[%s2421_s5 + $0x48] sm:$0xff] }
 0x115   :  { %v1589_v30 = vsel %vm97_vm2, %v113_v26, 0.0  ;;  %481 = vmatpush.msra.mxu0 %v235_v11  ;;  %422 = vmatpush.msrb.mxu1 %v228_v12  ;;  %v217_v26 = vld [vmem:[%s2421_s5 + $0x68] sm:$0xff] }
 0x116   :  { %v123_v33 = vmul.f32 %v1589_v30, %v1589_v30  ;;  %388 = vmatpush.msra.mxu3 %v1055_v35  ;;  %443 = vmatpush.msrb.mxu2 %v225_v18  ;;  %v210_v35 = vld [vmem:[%s2421_s5 + $0x30] sm:$0xff]  ;;  %v1178_v18 = vld [vmem:[%s2421_s5 + $0x5e8] sm:$0xff] }
 0x117   :  { %482 = vmatpush.msra.mxu0 %v231_v16  ;;  %423 = vmatpush.msrb.mxu1 %v224_v17  ;;  %v1177_v17 = vld [vmem:[%s2421_s5 + $0x5e0] sm:$0xff] }
 0x118   :  { %130 = vadd.xlane.f32.xlu1 %v123_v33  ;;  %453 = vmatpush.msrb.mxu3 %v266_v39  ;;  %v215_v33 = vld [vmem:[%s2421_s5 + $0x58] sm:$0xff]  ;;  %v206_v39 = vld [vmem:[%s2421_s5 + $0x10] sm:$0xff] }
 0x119   :  { %483 = vmatpush.msra.mxu0 %v227_v20  ;;  %424 = vmatpush.msrb.mxu1 %v220_v21  ;;  %v1179_v20 = vld [vmem:[%s2421_s5 + $0x5f0] sm:$0xff]  ;;  %v1180_v21 = vld [vmem:[%s2421_s5 + $0x5f8] sm:$0xff] }
 0x11a   :  { %454 = vmatpush.msrb.mxu3 %v262_v43  ;;  %444 = vmatpush.msrb.mxu2 %v221_v22 }
 0x11b   :  { %484 = vmatpush.msra.mxu0 %v223_v24  ;;  %425 = vmatpush.msrb.mxu1 %v216_v25  ;;  %v1175_v24 = vld [vmem:[%s2421_s5 + $0x5d0] sm:$0xff]  ;;  %v1176_v25 = vld [vmem:[%s2421_s5 + $0x5d8] sm:$0xff] }
 0x11c   :  { %455 = vmatpush.msrb.mxu3 %v258_v47  ;;  %445 = vmatpush.msrb.mxu2 %v217_v26 }
 0x11d   :  { %485 = vmatpush.msra.mxu0 %v219_v28  ;;  %426 = vmatpush.msrb.mxu1 %v212_v29  ;;  %v1169_v29 = vld [vmem:[%s2421_s5 + $0x5a0] sm:$0xff] }
 0x11e   :  { %456 = vmatpush.msrb.mxu3 %v254_v52  ;;  %446 = vmatpush.msrb.mxu2 %v213_v14  ;;  %v1170_v14 = vld [vmem:[%s2421_s5 + $0x5a8] sm:$0xff] }
 0x11f   :  { %486 = vmatpush.msra.mxu0 %v215_v33  ;;  %427 = vmatpush.msrb.mxu1 %v208_v34  ;;  %v1172_v33 = vld [vmem:[%s2421_s5 + $0x5b8] sm:$0xff] }
 0x120   :  { %457 = vmatpush.msrb.mxu3 %v250_v56  ;;  %447 = vmatpush.msrb.mxu2 %v209_v32 }
 0x121   :  { %487 = vmatpush.msra.mxu0 %v211_v36  ;;  %428 = vmatpush.msrb.mxu1 %v204_v37  ;;  %v1166_v36 = vld [vmem:[%s2421_s5 + $0x588] sm:$0xff]  ;;  %v1167_v37 = vld [vmem:[%s2421_s5 + $0x590] sm:$0xff] }
 0x122   :  { %458 = vmatpush.msrb.mxu3 %v246_v60  ;;  %448 = vmatpush.msrb.mxu2 %v205_v38  ;;  %v1168_v38 = vld [vmem:[%s2421_s5 + $0x598] sm:$0xff] }
 0x123   :  { %488 = vmatpush.msra.mxu0 %v207_v40 }
 0x124   :  { %459 = vmatpush.msrb.mxu3 %v242_v0 }
 0x126   :  { %460 = vmatpush.msrb.mxu3 %v238_v4 }
 0x128   :  { %461 = vmatpush.msrb.mxu3 %v234_v8 }
 0x12a   :  { %462 = vmatpush.msrb.mxu3 %v230_v15 }
 0x12c   :  { %463 = vmatpush.msrb.mxu3 %v226_v19 }
 0x12e   :  { %464 = vmatpush.msrb.mxu3 %v222_v23  ;;  %v1173_v23 = vld [vmem:[%s2421_s5 + $0x5c0] sm:$0xff] }
 0x130   :  { %465 = vmatpush.msrb.mxu3 %v218_v27 }
 0x132   :  { %466 = vmatpush.msrb.mxu3 %v214_v31  ;;  %v1171_v31 = vld [vmem:[%s2421_s5 + $0x5b0] sm:$0xff] }
 0x134   :  { %467 = vmatpush.msrb.mxu3 %v210_v35  ;;  %v1165_v35 = vld [vmem:[%s2421_s5 + $0x580] sm:$0xff] }
 0x136   :  { %468 = vmatpush.msrb.mxu3 %v206_v39 }
 0x17b   :  { %v127_v41 = vpop.xlane.xlu2 %126 }
 0x17c   :  { %v133_v42 = vmul.f32 0.01, %v127_v41 }
 0x17e   :  { %v137_v43 = vadd.f32 1e-05, %v133_v42 }
 0x180   :  { %1251 = vrsqrt.f32 %v137_v43  ;;  %vm156_vm4 = vweird.f32 %v137_v43 }
 0x183   :  { %v125_v44 = vpop.xlane.xlu2 %124  ;;  %v129_v46 = vpop.xlane.xlu0 %128 }
 0x184   :  { %v132_v45 = vmul.f32 0.01, %v125_v44  ;;  %v134_v51 = vmul.f32 0.01, %v129_v46  ;;  %v1162_v44 = vld [vmem:[%s2421_s5 + $0x568] sm:$0xff] }
 0x186   :  { %v1252_v47 = vpop.eup %1251  ;;  %v136_v48 = vadd.f32 1e-05, %v132_v45  ;;  %v1800_v54 = vadd.f32 1e-05, %v134_v51  ;;  %v1163_v45 = vld [vmem:[%s2421_s5 + $0x570] sm:$0xff] }
 0x187   :  { %v151_v49 = vmul.f32 %v1252_v47, %v137_v43  ;;  %vm157_vm3 = vweird.f32 %v1252_v47  ;;  %v1161_v43 = vld [vmem:[%s2421_s5 + $0x560] sm:$0xff]  ;;  %v1159_v51 = vld [vmem:[%s2421_s5 + $0x550] sm:$0xff] }
 0x188   :  { %1253 = vrsqrt.f32 %v136_v48  ;;  %vm158_vm5 = vmor %vm156_vm4, %vm157_vm3  ;;  %vm146_vm7 = vweird.f32 %v136_v48  ;;  %vm166_vm13 = vweird.f32 %v1800_v54 }
 0x189   :  { %v152_v52 = vmul.f32 %v1252_v47, %v151_v49  ;;  %1255 = vrsqrt.f32 %v1800_v54  ;;  %v1158_v49 = vld [vmem:[%s2421_s5 + $0x548] sm:$0xff] }
 0x18b   :  { %v153_v53 = vmul.f32 0.5, %v152_v52  ;;  %v131_v55 = vpop.xlane.xlu1 %130  ;;  %v1160_v52 = vld [vmem:[%s2421_s5 + $0x558] sm:$0xff] }
 0x18c   :  { %v135_v56 = vmul.f32 0.01, %v131_v55  ;;  %v1153_v55 = vld [vmem:[%s2421_s5 + $0x520] sm:$0xff] }
 0x18d   :  { %v154_v57 = vsub.f32 1.5, %v153_v53 }
 0x18e   :  { %v1254_v58 = vpop.eup %1253  ;;  %v139_v59 = vadd.f32 1e-05, %v135_v56  ;;  %v1154_v56 = vld [vmem:[%s2421_s5 + $0x528] sm:$0xff] }
 0x18f   :  { %v155_v60 = vmul.f32 %v1252_v47, %v154_v57  ;;  %v141_v61 = vmul.f32 %v1254_v58, %v136_v48  ;;  %v1815_v5 = vpop.eup %1255  ;;  %vm147_vm6 = vweird.f32 %v1254_v58  ;;  %v1157_v48 = vld [vmem:[%s2421_s5 + $0x540] sm:$0xff]  ;;  %v1155_v57 = vld [vmem:[%s2421_s5 + $0x530] sm:$0xff] }
 0x190   :  { %1257 = vrsqrt.f32 %v139_v59  ;;  %vm148_vm8 = vmor %vm146_vm7, %vm147_vm6  ;;  %v161_v15 = vmul.f32 %v1815_v5, %v1800_v54  ;;  %vm176_vm10 = vweird.f32 %v139_v59  ;;  %vm167_vm12 = vweird.f32 %v1815_v5  ;;  %v1147_v54 = vld [vmem:[%s2421_s5 + $0x4f0] sm:$0xff] }
 0x191   :  { %v159_v63 = vsel %vm158_vm5, %v1252_v47, %v155_v60  ;;  %v142_v0 = vmul.f32 %v1254_v58, %v141_v61  ;;  %v1149_v60 = vld [vmem:[%s2421_s5 + $0x500] sm:$0xff]  ;;  %v1150_v61 = vld [vmem:[%s2421_s5 + $0x508] sm:$0xff]  ;;  %vm1935_vm14 = vmor %vm166_vm13, %vm167_vm12  ;;  %vm1030_vm6 = vcmask 48128  }
 0x192   :  { %v181_v1 = vmul.f32 %v159_v63, %v1481_v50  ;;  %v162_v27 = vmul.f32 %v1815_v5, %v161_v15  ;;  %v1151_v63 = vld [vmem:[%s2421_s5 + $0x510] sm:$0xff] }
 0x193   :  { %v143_v3 = vmul.f32 0.5, %v142_v0  ;;  %v1152_v0 = vld [vmem:[%s2421_s5 + $0x518] sm:$0xff] }
 0x194   :  { %v189_v4 = vmul.f32 %v1806_v62, %v181_v1  ;;  %v163_v40 = vmul.f32 0.5, %v162_v27  ;;  %v1145_v1 = vld [vmem:[%s2421_s5 + $0x4e0] sm:$0xff]  ;;  %v1127_v27 = vld [vmem:[%s2421_s5 + $0x450] sm:$0xff] }
 0x195   :  { %v144_v6 = vsub.f32 1.5, %v143_v3  ;;  %v1146_v3 = vld [vmem:[%s2421_s5 + $0x4e8] sm:$0xff] }
 0x196   :  { %v1258_v7 = vpop.eup %1257  ;;  %v197_v8 = vadd.f32 %v1812_v2, %v189_v4  ;;  %v164_v47 = vsub.f32 1.5, %v163_v40  ;;  %v1244_v40 = vld [vmem:[%s2421_s5 + $0x7f8] sm:$0xff] }
 0x197   :  { %v145_v11 = vmul.f32 %v1254_v58, %v144_v6  ;;  %v171_v12 = vmul.f32 %v1258_v7, %v139_v59  ;;  %vm177_vm9 = vweird.f32 %v1258_v7  ;;  %v1148_v6 = vld [vmem:[%s2421_s5 + $0x4f8] sm:$0xff] }
 0x198   :  { %v201_v50 = vmax.f32 %v197_v8, 0.0  ;;  %vm178_vm11 = vmor %vm176_vm10, %vm177_vm9  ;;  %v165_v59 = vmul.f32 %v1815_v5, %v164_v47  ;;  %v1141_v8 = vld [vmem:[%s2421_s5 + $0x4c0] sm:$0xff]  ;;  %v1236_v47 = vld [vmem:[%s2421_s5 + $0x7b8] sm:$0xff] }
 0x199   :  { %v149_v13 = vsel %vm148_vm8, %v1254_v58, %v145_v11  ;;  %v172_v16 = vmul.f32 %v1258_v7, %v171_v12  ;;  %v1156_v58 = vld [vmem:[%s2421_s5 + $0x538] sm:$0xff]  ;;  %v1142_v11 = vld [vmem:[%s2421_s5 + $0x4c8] sm:$0xff]  ;;  %v1143_v12 = vld [vmem:[%s2421_s5 + $0x4d0] sm:$0xff] }
 0x19a   :  { %v180_v19 = vmul.f32 %v149_v13, %v1538_v10  ;;  %349 = vmatmul.f32.vlgmr.msra.gmra.mxu1 %v201_v50  ;;  %369 = vmatmul.f32.vlgmr.msra.gmra.mxu2 %v201_v50  ;;  %v1174_v10 = vld [vmem:[%s2421_s5 + $0x5c8] sm:$0xff]  ;;  %v1220_v4 = vld [vmem:[%s2421_s5 + $0x738] sm:$0xff] }
 0x19b   :  { %v173_v22 = vmul.f32 0.5, %v172_v16  ;;  %389 = vmatmul.f32.vlgmr.msra.gmra.mxu3 %v201_v50  ;;  %409 = vmatmul.f32.vlgmr.msrb.gmra.mxu0 %v201_v50  ;;  %v1137_v50 = vld [vmem:[%s2421_s5 + $0x4a0] sm:$0xff]  ;;  %v1138_v13 = vld [vmem:[%s2421_s5 + $0x4a8] sm:$0xff]  ;;  %v1139_v16 = vld [vmem:[%s2421_s5 + $0x4b0] sm:$0xff] }
 0x19c   :  { %558 = vmatpush.msra.mxu1 %v1177_v17  ;;  %578 = vmatpush.msra.mxu2 %v1178_v18  ;;  %v188_v26 = vmul.f32 %v1806_v62, %v180_v19  ;;  %v1140_v17 = vld [vmem:[%s2421_s5 + $0x4b8] sm:$0xff]  ;;  %v1133_v18 = vld [vmem:[%s2421_s5 + $0x480] sm:$0xff]  ;;  %v1135_v19 = vld [vmem:[%s2421_s5 + $0x490] sm:$0xff] }
 0x19d   :  { %v174_v28 = vsub.f32 1.5, %v173_v22  ;;  %598 = vmatpush.msra.mxu3 %v1179_v20  ;;  %618 = vmatpush.msrb.mxu0 %v1180_v21  ;;  %v1136_v20 = vld [vmem:[%s2421_s5 + $0x498] sm:$0xff]  ;;  %v1129_v21 = vld [vmem:[%s2421_s5 + $0x460] sm:$0xff]  ;;  %v1130_v22 = vld [vmem:[%s2421_s5 + $0x468] sm:$0xff] }
 0x19e   :  { %559 = vmatpush.msra.mxu1 %v1173_v23  ;;  %579 = vmatpush.msra.mxu2 %v1174_v10  ;;  %v196_v34 = vadd.f32 %v1812_v2, %v188_v26  ;;  %v1131_v23 = vld [vmem:[%s2421_s5 + $0x470] sm:$0xff]  ;;  %v1132_v10 = vld [vmem:[%s2421_s5 + $0x478] sm:$0xff]  ;;  %v1126_v26 = vld [vmem:[%s2421_s5 + $0x448] sm:$0xff] }
 0x19f   :  { %v175_v32 = vmul.f32 %v1258_v7, %v174_v28  ;;  %599 = vmatpush.msra.mxu3 %v1175_v24  ;;  %619 = vmatpush.msrb.mxu0 %v1176_v25  ;;  %v1125_v25 = vld [vmem:[%s2421_s5 + $0x440] sm:$0xff] }
 0x1a0   :  { %560 = vmatpush.msra.mxu1 %v1169_v29  ;;  %580 = vmatpush.msra.mxu2 %v1170_v14  ;;  %v200_v39 = vmax.f32 %v196_v34, 0.0  ;;  %v1121_v28 = vld [vmem:[%s2421_s5 + $0x420] sm:$0xff]  ;;  %v1122_v29 = vld [vmem:[%s2421_s5 + $0x428] sm:$0xff]  ;;  %v1123_v14 = vld [vmem:[%s2421_s5 + $0x430] sm:$0xff] }
 0x1a1   :  { %v179_v41 = vsel %vm178_vm11, %v1258_v7, %v175_v32  ;;  %600 = vmatpush.msra.mxu3 %v1171_v31  ;;  %620 = vmatpush.msrb.mxu0 %v1172_v33  ;;  %v169_v7 = vsel %vm1935_vm14, %v1815_v5, %v165_v59  ;;  %v1144_v5 = vld [vmem:[%s2421_s5 + $0x4d8] sm:$0xff]  ;;  %v1117_v34 = vld [vmem:[%s2421_s5 + $0x400] sm:$0xff]  ;;  %v1118_v32 = vld [vmem:[%s2421_s5 + $0x408] sm:$0xff] }
 0x1a2   :  { %v183_v42 = vmul.f32 %v179_v41, %v1589_v30  ;;  %561 = vmatpush.msra.mxu1 %v1165_v35  ;;  %581 = vmatpush.msra.mxu2 %v1166_v36  ;;  %v1164_v30 = vld [vmem:[%s2421_s5 + $0x578] sm:$0xff]  ;;  %v182_v15 = vmul.f32 %v169_v7, %v1534_v9  ;;  %v1134_v9 = vld [vmem:[%s2421_s5 + $0x488] sm:$0xff]  ;;  %v1119_v35 = vld [vmem:[%s2421_s5 + $0x410] sm:$0xff] }
 0x1a3   :  { %601 = vmatpush.msra.mxu3 %v1167_v37  ;;  %621 = vmatpush.msrb.mxu0 %v1168_v38  ;;  %v1124_v31 = vld [vmem:[%s2421_s5 + $0x438] sm:$0xff]  ;;  %v1241_v37 = vld [vmem:[%s2421_s5 + $0x7e0] sm:$0xff]  ;;  %v1242_v38 = vld [vmem:[%s2421_s5 + $0x7e8] sm:$0xff] }
 0x1a4   :  { %429 = vmatmul.f32.vlgmr.msrb.gmra.mxu1 %v200_v39  ;;  %449 = vmatmul.f32.vlgmr.msrb.gmra.mxu2 %v200_v39  ;;  %v191_v46 = vmul.f32 %v1806_v62, %v183_v42  ;;  %v190_v24 = vmul.f32 %v1806_v62, %v182_v15  ;;  %v1128_v62 = vld [vmem:[%s2421_s5 + $0x458] sm:$0xff]  ;;  %v1237_v41 = vld [vmem:[%s2421_s5 + $0x7c0] sm:$0xff]  ;;  %v1238_v42 = vld [vmem:[%s2421_s5 + $0x7c8] sm:$0xff] }
 0x1a5   :  { %469 = vmatmul.f32.vlgmr.msrb.gmra.mxu3 %v200_v39  ;;  %489 = vmatmul.f32.vlgmr.msra.gmra.mxu0 %v200_v39  ;;  %v1243_v39 = vld [vmem:[%s2421_s5 + $0x7f0] sm:$0xff]  ;;  %v1221_v59 = vld [vmem:[%s2421_s5 + $0x740] sm:$0xff]  ;;  %v1206_v15 = vld [vmem:[%s2421_s5 + $0x6c8] sm:$0xff] }
 0x1a6   :  { %562 = vmatpush.msra.mxu1 %v1161_v43  ;;  %582 = vmatpush.msra.mxu2 %v1162_v44  ;;  %v1900_v53 = vadd.f32 %v1812_v2, %v191_v46  ;;  %v198_v33 = vadd.f32 %v1812_v2, %v190_v24  ;;  %v1120_v2 = vld [vmem:[%s2421_s5 + $0x418] sm:$0xff]  ;;  %v1239_v43 = vld [vmem:[%s2421_s5 + $0x7d0] sm:$0xff]  ;;  %v1193_v24 = vld [vmem:[%s2421_s5 + $0x660] sm:$0xff] }
 0x1a7   :  { %602 = vmatpush.msra.mxu3 %v1163_v45  ;;  %622 = vmatpush.msrb.mxu0 %v1164_v30  ;;  %v1240_v44 = vld [vmem:[%s2421_s5 + $0x7d8] sm:$0xff]  ;;  %v1233_v45 = vld [vmem:[%s2421_s5 + $0x7a0] sm:$0xff]  ;;  %v1234_v30 = vld [vmem:[%s2421_s5 + $0x7a8] sm:$0xff] }
 0x1a8   :  { %563 = vmatpush.msra.mxu1 %v1157_v48  ;;  %583 = vmatpush.msra.mxu2 %v1158_v49  ;;  %v202_v36 = vmax.f32 %v198_v33, 0.0  ;;  %v1235_v46 = vld [vmem:[%s2421_s5 + $0x7b0] sm:$0xff]  ;;  %v1229_v48 = vld [vmem:[%s2421_s5 + $0x780] sm:$0xff]  ;;  %v1230_v49 = vld [vmem:[%s2421_s5 + $0x788] sm:$0xff] }
 0x1a9   :  { %603 = vmatpush.msra.mxu3 %v1159_v51  ;;  %623 = vmatpush.msrb.mxu0 %v1160_v52  ;;  %v1231_v51 = vld [vmem:[%s2421_s5 + $0x790] sm:$0xff]  ;;  %v1232_v52 = vld [vmem:[%s2421_s5 + $0x798] sm:$0xff]  ;;  %v1186_v33 = vld [vmem:[%s2421_s5 + $0x628] sm:$0xff] }
 0x1aa   :  { %564 = vmatpush.msra.mxu1 %v1153_v55  ;;  %584 = vmatpush.msra.mxu2 %v1154_v56  ;;  %v1225_v55 = vld [vmem:[%s2421_s5 + $0x760] sm:$0xff]  ;;  %v1226_v56 = vld [vmem:[%s2421_s5 + $0x768] sm:$0xff]  ;;  %v1215_v7 = vld [vmem:[%s2421_s5 + $0x710] sm:$0xff] }
 0x1ab   :  { %604 = vmatpush.msra.mxu3 %v1155_v57  ;;  %624 = vmatpush.msrb.mxu0 %v1156_v58  ;;  %v1227_v57 = vld [vmem:[%s2421_s5 + $0x770] sm:$0xff]  ;;  %v1228_v58 = vld [vmem:[%s2421_s5 + $0x778] sm:$0xff] }
 0x1ac   :  { %565 = vmatpush.msra.mxu1 %v1149_v60  ;;  %585 = vmatpush.msra.mxu2 %v1150_v61  ;;  %v1222_v60 = vld [vmem:[%s2421_s5 + $0x748] sm:$0xff]  ;;  %v1223_v61 = vld [vmem:[%s2421_s5 + $0x750] sm:$0xff] }
 0x1ad   :  { %605 = vmatpush.msra.mxu3 %v1151_v63  ;;  %625 = vmatpush.msrb.mxu0 %v1152_v0  ;;  %v1224_v63 = vld [vmem:[%s2421_s5 + $0x758] sm:$0xff]  ;;  %v1217_v0 = vld [vmem:[%s2421_s5 + $0x720] sm:$0xff] }
 0x1ae   :  { %566 = vmatpush.msra.mxu1 %v1145_v1  ;;  %586 = vmatpush.msra.mxu2 %v1146_v3  ;;  %v1218_v1 = vld [vmem:[%s2421_s5 + $0x728] sm:$0xff]  ;;  %v1219_v3 = vld [vmem:[%s2421_s5 + $0x730] sm:$0xff] }
 0x1af   :  { %606 = vmatpush.msra.mxu3 %v1147_v54  ;;  %626 = vmatpush.msrb.mxu0 %v1148_v6  ;;  %v1213_v54 = vld [vmem:[%s2421_s5 + $0x700] sm:$0xff]  ;;  %v1214_v6 = vld [vmem:[%s2421_s5 + $0x708] sm:$0xff] }
 0x1b0   :  { %567 = vmatpush.msra.mxu1 %v1141_v8  ;;  %587 = vmatpush.msra.mxu2 %v1142_v11  ;;  %v1216_v8 = vld [vmem:[%s2421_s5 + $0x718] sm:$0xff]  ;;  %v1209_v11 = vld [vmem:[%s2421_s5 + $0x6e0] sm:$0xff] }
 0x1b1   :  { %607 = vmatpush.msra.mxu3 %v1143_v12  ;;  %627 = vmatpush.msrb.mxu0 %v1144_v5  ;;  %v1210_v12 = vld [vmem:[%s2421_s5 + $0x6e8] sm:$0xff]  ;;  %v1211_v5 = vld [vmem:[%s2421_s5 + $0x6f0] sm:$0xff] }
 0x1b2   :  { %568 = vmatpush.msra.mxu1 %v1137_v50  ;;  %588 = vmatpush.msra.mxu2 %v1138_v13  ;;  %v1212_v50 = vld [vmem:[%s2421_s5 + $0x6f8] sm:$0xff]  ;;  %v1205_v13 = vld [vmem:[%s2421_s5 + $0x6c0] sm:$0xff] }
 0x1b3   :  { %608 = vmatpush.msra.mxu3 %v1139_v16  ;;  %628 = vmatpush.msrb.mxu0 %v1140_v17  ;;  %v1207_v16 = vld [vmem:[%s2421_s5 + $0x6d0] sm:$0xff]  ;;  %v1208_v17 = vld [vmem:[%s2421_s5 + $0x6d8] sm:$0xff] }
 0x1b4   :  { %569 = vmatpush.msra.mxu1 %v1133_v18  ;;  %589 = vmatpush.msra.mxu2 %v1134_v9  ;;  %v1201_v18 = vld [vmem:[%s2421_s5 + $0x6a0] sm:$0xff]  ;;  %v1202_v9 = vld [vmem:[%s2421_s5 + $0x6a8] sm:$0xff] }
 0x1b5   :  { %609 = vmatpush.msra.mxu3 %v1135_v19  ;;  %629 = vmatpush.msrb.mxu0 %v1136_v20  ;;  %v1203_v19 = vld [vmem:[%s2421_s5 + $0x6b0] sm:$0xff]  ;;  %v1204_v20 = vld [vmem:[%s2421_s5 + $0x6b8] sm:$0xff] }
 0x1b6   :  { %570 = vmatpush.msra.mxu1 %v1129_v21  ;;  %590 = vmatpush.msra.mxu2 %v1130_v22  ;;  %v1197_v21 = vld [vmem:[%s2421_s5 + $0x680] sm:$0xff]  ;;  %v1198_v22 = vld [vmem:[%s2421_s5 + $0x688] sm:$0xff] }
 0x1b7   :  { %610 = vmatpush.msra.mxu3 %v1131_v23  ;;  %630 = vmatpush.msrb.mxu0 %v1132_v10  ;;  %v1199_v23 = vld [vmem:[%s2421_s5 + $0x690] sm:$0xff]  ;;  %v1200_v10 = vld [vmem:[%s2421_s5 + $0x698] sm:$0xff] }
 0x1b8   :  { %571 = vmatpush.msra.mxu1 %v1125_v25  ;;  %591 = vmatpush.msra.mxu2 %v1126_v26  ;;  %v1194_v25 = vld [vmem:[%s2421_s5 + $0x668] sm:$0xff]  ;;  %v1195_v26 = vld [vmem:[%s2421_s5 + $0x670] sm:$0xff] }
 0x1b9   :  { %611 = vmatpush.msra.mxu3 %v1127_v27  ;;  %631 = vmatpush.msrb.mxu0 %v1128_v62  ;;  %v1196_v27 = vld [vmem:[%s2421_s5 + $0x678] sm:$0xff]  ;;  %v1189_v62 = vld [vmem:[%s2421_s5 + $0x640] sm:$0xff] }
 0x1ba   :  { %572 = vmatpush.msra.mxu1 %v1121_v28  ;;  %592 = vmatpush.msra.mxu2 %v1122_v29  ;;  %v1190_v28 = vld [vmem:[%s2421_s5 + $0x648] sm:$0xff]  ;;  %v1191_v29 = vld [vmem:[%s2421_s5 + $0x650] sm:$0xff] }
 0x1bb   :  { %612 = vmatpush.msra.mxu3 %v1123_v14  ;;  %632 = vmatpush.msrb.mxu0 %v1124_v31  ;;  %v1192_v14 = vld [vmem:[%s2421_s5 + $0x658] sm:$0xff]  ;;  %v1185_v31 = vld [vmem:[%s2421_s5 + $0x620] sm:$0xff] }
 0x1bc   :  { %573 = vmatpush.msra.mxu1 %v1117_v34  ;;  %593 = vmatpush.msra.mxu2 %v1118_v32  ;;  %v1187_v34 = vld [vmem:[%s2421_s5 + $0x630] sm:$0xff]  ;;  %v1188_v32 = vld [vmem:[%s2421_s5 + $0x638] sm:$0xff] }
 0x1bd   :  { %613 = vmatpush.msra.mxu3 %v1119_v35  ;;  %633 = vmatpush.msrb.mxu0 %v1120_v2  ;;  %v1181_v35 = vld [vmem:[%s2421_s5 + $0x600] sm:$0xff]  ;;  %v1182_v2 = vld [vmem:[%s2421_s5 + $0x608] sm:$0xff] }
 0x1be   :  { %574 = vmatmul.f32.vlgmr.msra.gmra.mxu1 %v202_v36  ;;  %594 = vmatmul.f32.vlgmr.msra.gmra.mxu2 %v202_v36 }
 0x1bf   :  { %614 = vmatmul.f32.vlgmr.msra.gmra.mxu3 %v202_v36  ;;  %634 = vmatmul.f32.vlgmr.msrb.gmra.mxu0 %v202_v36  ;;  %v1183_v36 = vld [vmem:[%s2421_s5 + $0x610] sm:$0xff] }
 0x1c0   :  { %707 = vmatpush.msrb.mxu1 %v1241_v37  ;;  %727 = vmatpush.msrb.mxu2 %v1242_v38  ;;  %v1184_v37 = vld [vmem:[%s2421_s5 + $0x618] sm:$0xff]  ;;  %v203_v38 = vmax.f32 %v1900_v53, 0.0 }
 0x1c1   :  { %747 = vmatpush.msrb.mxu3 %v1243_v39  ;;  %767 = vmatpush.msra.mxu0 %v1244_v40 }
 0x1c2   :  { %708 = vmatpush.msrb.mxu1 %v1237_v41  ;;  %728 = vmatpush.msrb.mxu2 %v1238_v42 }
 0x1c3   :  { %748 = vmatpush.msrb.mxu3 %v1239_v43  ;;  %768 = vmatpush.msra.mxu0 %v1240_v44 }
 0x1c4   :  { %709 = vmatpush.msrb.mxu1 %v1233_v45  ;;  %729 = vmatpush.msrb.mxu2 %v1234_v30 }
 0x1c5   :  { %749 = vmatpush.msrb.mxu3 %v1235_v46  ;;  %769 = vmatpush.msra.mxu0 %v1236_v47 }
 0x1c6   :  { %710 = vmatpush.msrb.mxu1 %v1229_v48  ;;  %730 = vmatpush.msrb.mxu2 %v1230_v49 }
 0x1c7   :  { %750 = vmatpush.msrb.mxu3 %v1231_v51  ;;  %770 = vmatpush.msra.mxu0 %v1232_v52 }
 0x1c8   :  { %711 = vmatpush.msrb.mxu1 %v1225_v55  ;;  %731 = vmatpush.msrb.mxu2 %v1226_v56  ;;  %v791_v55 = vld [vmem:[%s2422_s6] sm:$0xf] }
 0x1c9   :  { %751 = vmatpush.msrb.mxu3 %v1227_v57  ;;  %771 = vmatpush.msra.mxu0 %v1228_v58 }
 0x1ca   :  { %712 = vmatpush.msrb.mxu1 %v1221_v59  ;;  %732 = vmatpush.msrb.mxu2 %v1222_v60 }
 0x1cb   :  { %752 = vmatpush.msrb.mxu3 %v1223_v61  ;;  %772 = vmatpush.msra.mxu0 %v1224_v63 }
 0x1cc   :  { %713 = vmatpush.msrb.mxu1 %v1217_v0  ;;  %733 = vmatpush.msrb.mxu2 %v1218_v1  ;;  %v793_v0 = vperm.slane %v791_v55, 0  ;;  %v794_v1 = vperm.slane %v791_v55, 1 }
 0x1cd   :  { %753 = vmatpush.msrb.mxu3 %v1219_v3  ;;  %773 = vmatpush.msra.mxu0 %v1220_v4 }
 0x1ce   :  { %714 = vmatpush.msrb.mxu1 %v1213_v54  ;;  %734 = vmatpush.msrb.mxu2 %v1214_v6  ;;  %v796_v54 = vperm.slane %v791_v55, 3 }
 0x1cf   :  { %754 = vmatpush.msrb.mxu3 %v1215_v7  ;;  %774 = vmatpush.msra.mxu0 %v1216_v8 }
 0x1d0   :  { %715 = vmatpush.msrb.mxu1 %v1209_v11  ;;  %735 = vmatpush.msrb.mxu2 %v1210_v12  ;;  %v795_v11 = vperm.slane %v791_v55, 2  ;;  %v882_v55 = vld [vmem:[%s2425_s9 + $0x38] sm:$0xff] }
 0x1d1   :  { %755 = vmatpush.msrb.mxu3 %v1211_v5  ;;  %775 = vmatpush.msra.mxu0 %v1212_v50 }
 0x1d2   :  { %716 = vmatpush.msrb.mxu1 %v1205_v13  ;;  %736 = vmatpush.msrb.mxu2 %v1206_v15 }
 0x1d3   :  { %756 = vmatpush.msrb.mxu3 %v1207_v16  ;;  %776 = vmatpush.msra.mxu0 %v1208_v17 }
 0x1d4   :  { %717 = vmatpush.msrb.mxu1 %v1201_v18  ;;  %737 = vmatpush.msrb.mxu2 %v1202_v9 }
 0x1d5   :  { %757 = vmatpush.msrb.mxu3 %v1203_v19  ;;  %777 = vmatpush.msra.mxu0 %v1204_v20  ;;  %v890_v19 = vld [vmem:[%s2425_s9 + $0x78] sm:$0xff] }
 0x1d6   :  { %718 = vmatpush.msrb.mxu1 %v1197_v21  ;;  %738 = vmatpush.msrb.mxu2 %v1198_v22  ;;  %v906_v20 = vld [vmem:[%s2425_s9 + $0xf8] sm:$0xff] }
 0x1d7   :  { %758 = vmatpush.msrb.mxu3 %v1199_v23  ;;  %778 = vmatpush.msra.mxu0 %v1200_v10  ;;  %v922_v21 = vld [vmem:[%s2425_s9 + $0x178] sm:$0xff] }
 0x1d8   :  { %719 = vmatpush.msrb.mxu1 %v1193_v24  ;;  %739 = vmatpush.msrb.mxu2 %v1194_v25 }
 0x1d9   :  { %759 = vmatpush.msrb.mxu3 %v1195_v26  ;;  %779 = vmatpush.msra.mxu0 %v1196_v27 }
 0x1da   :  { %720 = vmatpush.msrb.mxu1 %v1189_v62  ;;  %740 = vmatpush.msrb.mxu2 %v1190_v28 }
 0x1db   :  { %760 = vmatpush.msrb.mxu3 %v1191_v29  ;;  %780 = vmatpush.msra.mxu0 %v1192_v14 }
 0x1dc   :  { %721 = vmatpush.msrb.mxu1 %v1185_v31  ;;  %741 = vmatpush.msrb.mxu2 %v1186_v33 }
 0x1dd   :  { %761 = vmatpush.msrb.mxu3 %v1187_v34  ;;  %781 = vmatpush.msra.mxu0 %v1188_v32  ;;  %v889_v32 = vld [vmem:[%s2425_s9 + $0x70] sm:$0xff] }
 0x1de   :  { %722 = vmatpush.msrb.mxu1 %v1181_v35  ;;  %742 = vmatpush.msrb.mxu2 %v1182_v2  ;;  %v905_v35 = vld [vmem:[%s2425_s9 + $0xf0] sm:$0xff] }
 0x1df   :  { %762 = vmatpush.msrb.mxu3 %v1183_v36  ;;  %782 = vmatpush.msra.mxu0 %v1184_v37  ;;  %v921_v2 = vld [vmem:[%s2425_s9 + $0x170] sm:$0xff]  ;;  %v888_v36 = vld [vmem:[%s2425_s9 + $0x68] sm:$0xff] }
 0x1e0   :  { %723 = vmatmul.f32.vlgmr.msrb.gmra.mxu1 %v203_v38  ;;  %743 = vmatmul.f32.vlgmr.msrb.gmra.mxu2 %v203_v38  ;;  %v904_v37 = vld [vmem:[%s2425_s9 + $0xe8] sm:$0xff] }
 0x1e1   :  { %763 = vmatmul.f32.vlgmr.msrb.gmra.mxu3 %v203_v38  ;;  %783 = vmatmul.f32.vlgmr.msra.gmra.mxu0 %v203_v38  ;;  %v920_v38 = vld [vmem:[%s2425_s9 + $0x168] sm:$0xff] }
 0x1e2   :  { %932 = vmatpush.msra.mxu1 %v890_v19  ;;  %952 = vmatpush.msra.mxu2 %v906_v20 }
 0x1e3   :  { %972 = vmatpush.msra.mxu3 %v922_v21 }
 0x1e4   :  { %933 = vmatpush.msra.mxu1 %v889_v32  ;;  %953 = vmatpush.msra.mxu2 %v905_v35 }
 0x1e5   :  { %973 = vmatpush.msra.mxu3 %v921_v2 }
 0x1e6   :  { %934 = vmatpush.msra.mxu1 %v888_v36  ;;  %954 = vmatpush.msra.mxu2 %v904_v37 }
 0x1e7   :  { %974 = vmatpush.msra.mxu3 %v920_v38 }
 0x217   :  { %v350_v39 = vpop.f32.mrf.mxu1 }
 0x218   :  { %v410_v40 = vpop.f32.mrf.mxu0 }
 0x21d   :  { %v370_v41 = vpop.f32.mrf.mxu2 }
 0x21e   :  { %v390_v42 = vpop.f32.mrf.mxu3 }
 0x221   :  { %v430_v43 = vpop.f32.mrf.mxu1 }
 0x222   :  { %v490_v44 = vpop.f32.mrf.mxu0  ;;  %v431_v51 = vadd.f32 %v430_v43, %v350_v39  ;;  %v887_v39 = vld [vmem:[%s2425_s9 + $0x60] sm:$0xff]  ;;  %v902_v43 = vld [vmem:[%s2425_s9 + $0xd8] sm:$0xff] }
 0x223   :  { %v491_v53 = vadd.f32 %v490_v44, %v410_v40  ;;  %v903_v40 = vld [vmem:[%s2425_s9 + $0xe0] sm:$0xff]  ;;  %935 = vmatpush.msra.mxu1 %v887_v39  ;;  %v918_v44 = vld [vmem:[%s2425_s9 + $0x158] sm:$0xff] }
 0x224   :  { %955 = vmatpush.msra.mxu2 %v903_v40 }
 0x226   :  { %956 = vmatpush.msra.mxu2 %v902_v43 }
 0x227   :  { %v450_v45 = vpop.f32.mrf.mxu2 }
 0x228   :  { %v470_v30 = vpop.f32.mrf.mxu3  ;;  %v451_v56 = vadd.f32 %v450_v45, %v370_v41  ;;  %v919_v41 = vld [vmem:[%s2425_s9 + $0x160] sm:$0xff]  ;;  %v885_v45 = vld [vmem:[%s2425_s9 + $0x50] sm:$0xff] }
 0x229   :  { %v471_v59 = vadd.f32 %v470_v30, %v390_v42  ;;  %975 = vmatpush.msra.mxu3 %v919_v41  ;;  %v886_v42 = vld [vmem:[%s2425_s9 + $0x58] sm:$0xff]  ;;  %v901_v30 = vld [vmem:[%s2425_s9 + $0xd0] sm:$0xff] }
 0x22a   :  { %936 = vmatpush.msra.mxu1 %v886_v42  ;;  %957 = vmatpush.msra.mxu2 %v901_v30 }
 0x22b   :  { %976 = vmatpush.msra.mxu3 %v918_v44 }
 0x22c   :  { %937 = vmatpush.msra.mxu1 %v885_v45 }
 0x23b   :  { %v575_v46 = vpop.f32.mrf.mxu1 }
 0x23c   :  { %v635_v47 = vpop.f32.mrf.mxu0  ;;  %v638_v57 = vadd.f32 %v575_v46, %v431_v51  ;;  %v917_v46 = vld [vmem:[%s2425_s9 + $0x150] sm:$0xff]  ;;  %v883_v51 = vld [vmem:[%s2425_s9 + $0x40] sm:$0xff] }
 0x23d   :  { %v641_v60 = vadd.f32 %v635_v47, %v491_v53  ;;  %977 = vmatpush.msra.mxu3 %v917_v46  ;;  %v884_v47 = vld [vmem:[%s2425_s9 + $0x48] sm:$0xff]  ;;  %v899_v53 = vld [vmem:[%s2425_s9 + $0xc0] sm:$0xff] }
 0x23e   :  { %938 = vmatpush.msra.mxu1 %v884_v47 }
 0x240   :  { %939 = vmatpush.msra.mxu1 %v883_v51 }
 0x241   :  { %v595_v48 = vpop.f32.mrf.mxu2 }
 0x242   :  { %v615_v49 = vpop.f32.mrf.mxu3  ;;  %v639_v61 = vadd.f32 %v595_v48, %v451_v56  ;;  %v900_v48 = vld [vmem:[%s2425_s9 + $0xc8] sm:$0xff]  ;;  %v898_v56 = vld [vmem:[%s2425_s9 + $0xb8] sm:$0xff]  ;;  %940 = vmatpush.msra.mxu1 %v882_v55 }
 0x243   :  { %v640_v3 = vadd.f32 %v615_v49, %v471_v59  ;;  %v916_v49 = vld [vmem:[%s2425_s9 + $0x148] sm:$0xff]  ;;  %958 = vmatpush.msra.mxu2 %v900_v48  ;;  %v897_v59 = vld [vmem:[%s2425_s9 + $0xb0] sm:$0xff] }
 0x244   :  { %978 = vmatpush.msra.mxu3 %v916_v49 }
 0x245   :  { %959 = vmatpush.msra.mxu2 %v899_v53 }
 0x247   :  { %960 = vmatpush.msra.mxu2 %v898_v56 }
 0x249   :  { %961 = vmatpush.msra.mxu2 %v897_v59 }
 0x25d   :  { %v724_v52 = vpop.f32.mrf.mxu1 }
 0x25e   :  { %v784_v58 = vpop.f32.mrf.mxu0  ;;  %v787_v63 = vadd.f32 %v724_v52, %v638_v57  ;;  %v915_v52 = vld [vmem:[%s2425_s9 + $0x140] sm:$0xff]  ;;  %v914_v57 = vld [vmem:[%s2425_s9 + $0x138] sm:$0xff] }
 0x25f   :  { %v790_v4 = vadd.f32 %v784_v58, %v641_v60  ;;  %979 = vmatpush.msra.mxu3 %v915_v52  ;;  %v881_v58 = vld [vmem:[%s2425_s9 + $0x30] sm:$0xff] }
 0x260   :  { %v801_v5 = vadd.f32 %v793_v0, %v787_v63  ;;  %v913_v60 = vld [vmem:[%s2425_s9 + $0x130] sm:$0xff]  ;;  %941 = vmatpush.msra.mxu1 %v881_v58  ;;  %v896_v63 = vld [vmem:[%s2425_s9 + $0xa8] sm:$0xff] }
 0x261   :  { %v804_v13 = vadd.f32 %v796_v54, %v790_v4  ;;  %980 = vmatpush.msra.mxu3 %v914_v57  ;;  %v912_v0 = vld [vmem:[%s2425_s9 + $0x128] sm:$0xff]  ;;  %962 = vmatpush.msra.mxu2 %v896_v63  ;;  %v911_v4 = vld [vmem:[%s2425_s9 + $0x120] sm:$0xff]  ;;  %v878_v54 = vld [vmem:[%s2425_s9 + $0x18] sm:$0xff] }
 0x263   :  { %v744_v6 = vpop.f32.mrf.mxu2  ;;  %v808_v18 = vsel %vm807_vm15, %v804_v13, 0.0  ;;  %981 = vmatpush.msra.mxu3 %v913_v60 }
 0x264   :  { %v788_v7 = vadd.f32 %v744_v6, %v639_v61  ;;  %v764_v8 = vpop.f32.mrf.mxu3  ;;  %v880_v61 = vld [vmem:[%s2425_s9 + $0x28] sm:$0xff]  ;;  %v894_v6 = vld [vmem:[%s2425_s9 + $0x98] sm:$0xff] }
 0x265   :  { %v789_v12 = vadd.f32 %v764_v8, %v640_v3  ;;  %942 = vmatpush.msra.mxu1 %v880_v61  ;;  %982 = vmatpush.msra.mxu3 %v912_v0  ;;  %v895_v3 = vld [vmem:[%s2425_s9 + $0xa0] sm:$0xff]  ;;  %v877_v8 = vld [vmem:[%s2425_s9 + $0x10] sm:$0xff] }
 0x266   :  { %v802_v50 = vadd.f32 %v794_v1, %v788_v7  ;;  %v879_v1 = vld [vmem:[%s2425_s9 + $0x20] sm:$0xff]  ;;  %963 = vmatpush.msra.mxu2 %v895_v3  ;;  %v910_v7 = vld [vmem:[%s2425_s9 + $0x118] sm:$0xff] }
 0x267   :  { %v803_v16 = vadd.f32 %v795_v11, %v789_v12  ;;  %943 = vmatpush.msra.mxu1 %v879_v1  ;;  %983 = vmatpush.msra.mxu3 %v911_v4  ;;  %v893_v11 = vld [vmem:[%s2425_s9 + $0x90] sm:$0xff] }
 0x268   :  { %v805_v15 = vadd.f32 %v802_v50, %v801_v5  ;;  %964 = vmatpush.msra.mxu2 %v894_v6  ;;  %v909_v12 = vld [vmem:[%s2425_s9 + $0x110] sm:$0xff] }
 0x269   :  { %944 = vmatpush.msra.mxu1 %v878_v54  ;;  %984 = vmatpush.msra.mxu3 %v910_v7 }
 0x26a   :  { %v806_v17 = vadd.f32 %v805_v15, %v803_v16  ;;  %965 = vmatpush.msra.mxu2 %v893_v11  ;;  %v924_v15 = vld [vmem:[%s2425_s9 + $0x188] sm:$0xff] }
 0x26b   :  { %945 = vmatpush.msra.mxu1 %v877_v8  ;;  %985 = vmatpush.msra.mxu3 %v909_v12 }
 0x26c   :  { %v809_v9 = vadd.f32 %v808_v18, %v806_v17  ;;  %1006 = vmatpush.msrb.mxu0 %v924_v15  ;;  %v891_v17 = vld [vmem:[%s2425_s9 + $0x80] sm:$0xff] }
 0x26d   :  { %v923_v18 = vld [vmem:[%s2425_s9 + $0x180] sm:$0xff] }
 0x26e   :  { %810 = vadd.xlane.f32.xlu2 %v809_v9  ;;  %v907_v9 = vld [vmem:[%s2425_s9 + $0x100] sm:$0xff]  ;;  %1007 = vmatpush.msrb.mxu0 %v923_v18 }
 0x2e1   :  { %v811_v22 = vpop.xlane.xlu2 %810 }
 0x2e2   :  { %v812_v23 = vmul.f32 0.0025, %v811_v22 }
 0x2e4   :  { %v2241_v10 = vsub.f32 %v801_v5, %v812_v23  ;;  %v2243_v24 = vsub.f32 %v802_v50, %v812_v23  ;;  %v2245_v25 = vsub.f32 %v803_v16, %v812_v23  ;;  %v2247_v26 = vsub.f32 %v804_v13, %v812_v23  ;;  %v876_v5 = vld [vmem:[%s2425_s9 + $0x8] sm:$0xff]  ;;  %v875_v16 = vld [vmem:[%s2425_s9] sm:$0xff] }
 0x2e5   :  { %v892_v50 = vld [vmem:[%s2425_s9 + $0x88] sm:$0xff]  ;;  %946 = vmatpush.msra.mxu1 %v876_v5 }
 0x2e6   :  { %v817_v27 = vmul.f32 %v2241_v10, %v2241_v10  ;;  %v818_v62 = vmul.f32 %v2243_v24, %v2243_v24  ;;  %v820_v28 = vmul.f32 %v2247_v26, %v2247_v26  ;;  %v819_v29 = vmul.f32 %v2245_v25, %v2245_v25  ;;  %v908_v13 = vld [vmem:[%s2425_s9 + $0x108] sm:$0xff]  ;;  %966 = vmatpush.msra.mxu2 %v892_v50 }
 0x2e7   :  { %986 = vmatpush.msra.mxu3 %v908_v13  ;;  %947 = vmatpush.msra.mxu1 %v875_v16 }
 0x2e8   :  { %v821_v14 = vadd.f32 %v818_v62, %v817_v27  ;;  %v823_v33 = vsel %vm807_vm15, %v820_v28, 0.0  ;;  %967 = vmatpush.msra.mxu2 %v891_v17  ;;  %v843_v28 = vld [vmem:[%s2423_s7] sm:$0xf] }
 0x2e9   :  { %987 = vmatpush.msra.mxu3 %v907_v9  ;;  %v846_v35 = vperm.slane %v843_v28, 1  ;;  %v847_v2 = vperm.slane %v843_v28, 2 }
 0x2ea   :  { %v822_v31 = vadd.f32 %v821_v14, %v819_v29  ;;  %v857_v14 = vld [vmem:[%s2424_s8] sm:$0xf] }
 0x2eb   :  { %v859_v32 = vperm.slane %v857_v14, 0  ;;  %v860_v37 = vperm.slane %v857_v14, 1  ;;  %v861_v38 = vperm.slane %v857_v14, 2  ;;  %v862_v39 = vperm.slane %v857_v14, 3 }
 0x2ec   :  { %v824_v34 = vadd.f32 %v823_v33, %v822_v31  ;;  %v848_v31 = vperm.slane %v843_v28, 3 }
 0x2ee   :  { %825 = vadd.xlane.f32.xlu0 %v824_v34  ;;  %v845_v34 = vperm.slane %v843_v28, 0 }
 0x361   :  { %v826_v19 = vpop.xlane.xlu0 %825 }
 0x362   :  { %v827_v20 = vmul.f32 0.0025, %v826_v19 }
 0x364   :  { %v828_v21 = vadd.f32 1e-05, %v827_v20 }
 0x366   :  { %1259 = vrsqrt.f32 %v828_v21  ;;  %vm835_vm1 = vweird.f32 %v828_v21 }
 0x36c   :  { %v1260_v22 = vpop.eup %1259 }
 0x36d   :  { %v830_v23 = vmul.f32 %v1260_v22, %v828_v21  ;;  %vm836_vm0 = vweird.f32 %v1260_v22 }
 0x36e   :  { %vm837_vm2 = vmor %vm835_vm1, %vm836_vm0 }
 0x36f   :  { %v831_v27 = vmul.f32 %v1260_v22, %v830_v23 }
 0x371   :  { %v832_v62 = vmul.f32 0.5, %v831_v27 }
 0x373   :  { %v833_v29 = vsub.f32 1.5, %v832_v62 }
 0x375   :  { %v834_v33 = vmul.f32 %v1260_v22, %v833_v29 }
 0x377   :  { %v838_v36 = vsel %vm837_vm2, %v1260_v22, %v834_v33 }
 0x378   :  { %v842_v40 = vmul.f32 %v838_v36, %v2247_v26  ;;  %v839_v41 = vmul.f32 %v838_v36, %v2241_v10  ;;  %v840_v42 = vmul.f32 %v838_v36, %v2243_v24  ;;  %v841_v43 = vmul.f32 %v838_v36, %v2245_v25  ;;  %v1250_v10 = vld [vmem:[%s2426_s10] ss:$0 sm:$0xff]  ;;  %s1291_s10 = smov [#allocation2]  }
 0x379   :  { %s1037_s19 = sshll.u32 %s1291_s10, 4  ;;  %s1038_s19 = int_to_ptr.vmem [resolvable:$true] %s1037_s19 }
 0x37a   :  { %v856_v44 = vmul.f32 %v848_v31, %v842_v40  ;;  %v853_v45 = vmul.f32 %v845_v34, %v839_v41  ;;  %v854_v30 = vmul.f32 %v846_v35, %v840_v42  ;;  %v855_v46 = vmul.f32 %v847_v2, %v841_v43 }
 0x37c   :  { %v867_v47 = vadd.f32 %v859_v32, %v853_v45  ;;  %v868_v48 = vadd.f32 %v860_v37, %v854_v30  ;;  %v869_v49 = vadd.f32 %v861_v38, %v855_v46  ;;  %v870_v51 = vadd.f32 %v862_v39, %v856_v44 }
 0x37e   :  { %v871_v53 = vmax.f32 %v867_v47, 0.0  ;;  %v872_v52 = vmax.f32 %v868_v48, 0.0  ;;  %v873_v55 = vmax.f32 %v869_v49, 0.0  ;;  %v874_v56 = vmax.f32 %v870_v51, 0.0 }
 0x380   :  { %948 = vmatmul.f32.vlgmr.msra.gmra.mxu1 %v871_v53  ;;  %968 = vmatmul.f32.vlgmr.msra.gmra.mxu2 %v872_v52 }
 0x381   :  { %988 = vmatmul.f32.vlgmr.msra.gmra.mxu3 %v873_v55  ;;  %1245 = vmatmul.msk.f32.vlgmr.msrb.gmra.mxu0 %vm807_vm15, %v874_v56 }
 0x3fd   :  { %v949_v24 = vpop.f32.mrf.mxu1 }
 0x3fe   :  { %v950_v25 = vadd.f32 %v1250_v10, %v949_v24  ;;  %v1009_v60 = vpop.f32.mrf.mxu0 }
 0x403   :  { %v969_v26 = vpop.f32.mrf.mxu2 }
 0x404   :  { %v970_v57 = vadd.f32 %v969_v26, %v950_v25  ;;  %v989_v58 = vpop.f32.mrf.mxu3 }
 0x406   :  { %v990_v59 = vadd.f32 %v989_v58, %v970_v57 }
 0x408   :  { %v1010_v61 = vadd.f32 %v1009_v60, %v990_v59 }
 0x40a   :  { %v1012_v63 = vsub.f32 0.0, %v1010_v61 }
 0x40c   :  { %v1013_v0 = vmul.f32 1.442695, %v1012_v63 }
 0x40e   :  { %1261 = vpow2.f32 %v1013_v0 }
 0x414   :  { %v1262_v1 = vpop.eup %1261 }
 0x415   :  { %v1015_v3 = vadd.f32 1.0, %v1262_v1 }
 0x417   :  { %1263 = vrcp.f32 %v1015_v3  ;;  %v1027_v7 = vand.u32 2147483648, %v1015_v3  ;;  %v1025_v11 = vand.u32 2147483647, %v1015_v3  ;;  %vm1021_vm4 = vweird.f32 %v1015_v3 }
 0x419   :  { %v1028_v5 = vor.u32 1.1754944e-38, %v1027_v7  ;;  %vm1026_vm7 = vcmp.eq.f32.partialorder %v1025_v11, 8.507059e+37 }
 0x41d   :  { %v1264_v4 = vpop.eup %1263 }
 0x41e   :  { %v1017_v54 = vmul.f32 %v1264_v4, %v1015_v3  ;;  %vm1022_vm3 = vweird.f32 %v1264_v4 }
 0x41f   :  { %vm1023_vm5 = vmor %vm1021_vm4, %vm1022_vm3 }
 0x420   :  { %v1018_v6 = vsub.f32 1.0, %v1017_v54 }
 0x422   :  { %v1019_v8 = vmul.f32 %v1264_v4, %v1018_v6 }
 0x424   :  { %v1020_v12 = vadd.f32 %v1264_v4, %v1019_v8 }
 0x426   :  { %v1024_v50 = vsel %vm1023_vm5, %v1264_v4, %v1020_v12 }
 0x427   :  { %v1029_v13 = vsel %vm1026_vm7, %v1028_v5, %v1024_v50 }
 0x428   :  { %1031 = vst.msk [vmem:[#allocation2] sm:$0xff] %vm1030_vm6, %v1029_v13 }
 0x429   :  { %1042 = dma.vmem_to_hbm [thread:$0]  %s1038_s19, 128, %s1040_s21, [#allocation3]  }
 0x42a   :  { %1289 = dma.done.wait [#allocation3], 128  }
 0x42b   :  { %1290 = vsyncadd [#allocation3], 4294967168 }
 0x42c   :  { %1047 = vsyncpa [#allocation3], 1 }

// kernel: tpu_custom_call.1
= control target key start
LH: loop header
LB: loop body
LE: loop exit
PB: predicated region body
PF: predicated region fallthrough
CT: control target
= control target key end

     0   :  { %vm62_vm0 = vcmask 1043456   ;;  %vm49_vm1 = vcmask 97280   ;;  %s2416_s0 = inlined_call_operand.vmem [shape: f32[4,8,12], index: 0, kind: input, shape index: {}]   ;;  %s2417_s1 = inlined_call_operand.vmem [shape: f32[12,128], index: 1, kind: input, shape index: {}]   ;;  %s2418_s2 = inlined_call_operand.vmem [shape: f32[1,128], index: 2, kind: input, shape index: {}]   ;;  %s2419_s3 = inlined_call_operand.vmem [shape: f32[1,128], index: 3, kind: input, shape index: {}]   ;;  %s2420_s4 = inlined_call_operand.vmem [shape: f32[1,128], index: 4, kind: input, shape index: {}]   ;;  %s2421_s5 = inlined_call_operand.vmem [shape: f32[4,128,400], index: 5, kind: input, shape index: {}]   ;;  %s2422_s6 = inlined_call_operand.vmem [shape: f32[1,400], index: 6, kind: input, shape index: {}]   ;;  %s2423_s7 = inlined_call_operand.vmem [shape: f32[1,400], index: 7, kind: input, shape index: {}]   ;;  %s2424_s8 = inlined_call_operand.vmem [shape: f32[1,400], index: 8, kind: input, shape index: {}]   ;;  %s2425_s9 = inlined_call_operand.vmem [shape: f32[400,6], index: 9, kind: input, shape index: {}]   ;;  %s2426_s10 = inlined_call_operand.vmem [shape: f32[1,6], index: 10, kind: input, shape index: {}]   ;;  %s2427_s11 = inlined_call_operand.hbm [shape: f32[8,6], index: 11, kind: output, shape index: {}]  }
   0x1   :  { %v44_v0 = vld [vmem:[%s2417_s1 + $0x8] sm:$0xf]  ;;  %v43_v1 = vld [vmem:[%s2417_s1] sm:$0xff] }
   0x2   :  { %1048 = vmatpush.msk.msra.mxu0 %vm62_vm0, %v44_v0  ;;  %v39_v2 = vld [vmem:[%s2416_s0] sm:$0xff] }
   0x4   :  { %81 = vmatpush.msra.mxu0 %v43_v1 }
   0x5   :  { %16 = vsyncpa [#allocation3], 0  ;;  %1049 = vmatmul.msk.f32.vlgmr.msra.gmra.mxu0 %vm49_vm1, %v39_v2  ;;  %v40_v3 = vld [vmem:[%s2416_s0 + $0x8] sm:$0xff]  ;;  %v41_v4 = vld [vmem:[%s2416_s0 + $0x10] sm:$0xff]  ;;  %v95_v21 = vlaneseq  ;;  %vm807_vm15 = vcmask 130048   ;;  %s1039_s21 = sshll.u32 %s2427_s11, 4  ;;  %s1040_s21 = int_to_ptr.hbm [resolvable:$true] %s1039_s21 }
   0x6   :  { %v42_v5 = vld [vmem:[%s2416_s0 + $0x18] sm:$0xff]  ;;  %v1247_v7 = vld [vmem:[%s2418_s2] ss:$0 sm:$0xff]  ;;  %v1114_v16 = vld [vmem:[%s2421_s5 + $0x3e8] sm:$0xff] }
   0x7   :  { %v1113_v15 = vld [vmem:[%s2421_s5 + $0x3e0] sm:$0xff]  ;;  %v1115_v17 = vld [vmem:[%s2421_s5 + $0x3f0] sm:$0xff]  ;;  %353 = vmatpush.msra.mxu2 %v1114_v16  ;;  %v1116_v18 = vld [vmem:[%s2421_s5 + $0x3f8] sm:$0xff]  ;;  %v1433_v32 = vand.u32 127, %v95_v21 }
   0x8   :  { %333 = vmatpush.msra.mxu1 %v1113_v15  ;;  %v1109_v19 = vld [vmem:[%s2421_s5 + $0x3c0] sm:$0xff]  ;;  %v1110_v20 = vld [vmem:[%s2421_s5 + $0x3c8] sm:$0xff]  ;;  %373 = vmatpush.msra.mxu3 %v1115_v17  ;;  %v1111_v22 = vld [vmem:[%s2421_s5 + $0x3d0] sm:$0xff] }
   0x9   :  { %393 = vmatpush.msrb.mxu0 %v1116_v18  ;;  %v1112_v23 = vld [vmem:[%s2421_s5 + $0x3d8] sm:$0xff]  ;;  %v1105_v24 = vld [vmem:[%s2421_s5 + $0x3a0] sm:$0xff]  ;;  %354 = vmatpush.msra.mxu2 %v1110_v20  ;;  %v1106_v25 = vld [vmem:[%s2421_s5 + $0x3a8] sm:$0xff]  ;;  %vm97_vm2 = vcmp.lt.s32.totalorder %v1433_v32, 100 }
   0xa   :  { %334 = vmatpush.msra.mxu1 %v1109_v19  ;;  %v1107_v26 = vld [vmem:[%s2421_s5 + $0x3b0] sm:$0xff]  ;;  %v1108_v27 = vld [vmem:[%s2421_s5 + $0x3b8] sm:$0xff]  ;;  %374 = vmatpush.msra.mxu3 %v1111_v22  ;;  %v1101_v28 = vld [vmem:[%s2421_s5 + $0x380] sm:$0xff] }
   0xb   :  { %394 = vmatpush.msrb.mxu0 %v1112_v23  ;;  %v1102_v29 = vld [vmem:[%s2421_s5 + $0x388] sm:$0xff]  ;;  %355 = vmatpush.msra.mxu2 %v1106_v25  ;;  %v1103_v30 = vld [vmem:[%s2421_s5 + $0x390] sm:$0xff]  ;;  %v1104_v31 = vld [vmem:[%s2421_s5 + $0x398] sm:$0xff] }
   0xc   :  { %335 = vmatpush.msra.mxu1 %v1105_v24  ;;  %375 = vmatpush.msra.mxu3 %v1107_v26  ;;  %v1097_v33 = vld [vmem:[%s2421_s5 + $0x360] sm:$0xff]  ;;  %v1098_v34 = vld [vmem:[%s2421_s5 + $0x368] sm:$0xff]  ;;  %v1099_v35 = vld [vmem:[%s2421_s5 + $0x370] sm:$0xff] }
   0xd   :  { %1050 = vmatmul.msk.f32.gmra.mxu0 %vm49_vm1, %v40_v3  ;;  %356 = vmatpush.msra.mxu2 %v1102_v29  ;;  %v1100_v36 = vld [vmem:[%s2421_s5 + $0x378] sm:$0xff]  ;;  %v1093_v38 = vld [vmem:[%s2421_s5 + $0x340] sm:$0xff]  ;;  %v1094_v39 = vld [vmem:[%s2421_s5 + $0x348] sm:$0xff] }
   0xe   :  { %395 = vmatpush.msrb.mxu0 %v1108_v27  ;;  %336 = vmatpush.msra.mxu1 %v1101_v28  ;;  %v1095_v41 = vld [vmem:[%s2421_s5 + $0x350] sm:$0xff]  ;;  %v1096_v42 = vld [vmem:[%s2421_s5 + $0x358] sm:$0xff]  ;;  %v1089_v43 = vld [vmem:[%s2421_s5 + $0x320] sm:$0xff] }
   0xf   :  { %376 = vmatpush.msra.mxu3 %v1103_v30  ;;  %357 = vmatpush.msra.mxu2 %v1098_v34  ;;  %v1090_v44 = vld [vmem:[%s2421_s5 + $0x328] sm:$0xff]  ;;  %v1091_v46 = vld [vmem:[%s2421_s5 + $0x330] sm:$0xff]  ;;  %v1092_v47 = vld [vmem:[%s2421_s5 + $0x338] sm:$0xff] }
  0x10   :  { %396 = vmatpush.msrb.mxu0 %v1104_v31  ;;  %337 = vmatpush.msra.mxu1 %v1097_v33  ;;  %v1085_v48 = vld [vmem:[%s2421_s5 + $0x300] sm:$0xff]  ;;  %v1086_v49 = vld [vmem:[%s2421_s5 + $0x308] sm:$0xff]  ;;  %v1087_v51 = vld [vmem:[%s2421_s5 + $0x310] sm:$0xff] }
  0x11   :  { %377 = vmatpush.msra.mxu3 %v1099_v35  ;;  %358 = vmatpush.msra.mxu2 %v1094_v39  ;;  %v1088_v53 = vld [vmem:[%s2421_s5 + $0x318] sm:$0xff]  ;;  %v1081_v54 = vld [vmem:[%s2421_s5 + $0x2e0] sm:$0xff]  ;;  %v1082_v55 = vld [vmem:[%s2421_s5 + $0x2e8] sm:$0xff] }
  0x12   :  { %397 = vmatpush.msrb.mxu0 %v1100_v36  ;;  %338 = vmatpush.msra.mxu1 %v1093_v38  ;;  %v1083_v56 = vld [vmem:[%s2421_s5 + $0x2f0] sm:$0xff]  ;;  %v1084_v59 = vld [vmem:[%s2421_s5 + $0x2f8] sm:$0xff]  ;;  %v1077_v60 = vld [vmem:[%s2421_s5 + $0x2c0] sm:$0xff] }
  0x13   :  { %378 = vmatpush.msra.mxu3 %v1095_v41  ;;  %359 = vmatpush.msra.mxu2 %v1090_v44  ;;  %v1078_v63 = vld [vmem:[%s2421_s5 + $0x2c8] sm:$0xff]  ;;  %v1079_v0 = vld [vmem:[%s2421_s5 + $0x2d0] sm:$0xff]  ;;  %v1080_v1 = vld [vmem:[%s2421_s5 + $0x2d8] sm:$0xff] }
  0x14   :  { %398 = vmatpush.msrb.mxu0 %v1096_v42  ;;  %339 = vmatpush.msra.mxu1 %v1089_v43  ;;  %v1073_v2 = vld [vmem:[%s2421_s5 + $0x2a0] sm:$0xff]  ;;  %v1071_v15 = vld [vmem:[%s2421_s5 + $0x290] sm:$0xff]  ;;  %v1072_v16 = vld [vmem:[%s2421_s5 + $0x298] sm:$0xff] }
  0x15   :  { %1051 = vmatmul.msk.f32.gmra.mxu0 %vm49_vm1, %v41_v4  ;;  %379 = vmatpush.msra.mxu3 %v1091_v46  ;;  %v1065_v17 = vld [vmem:[%s2421_s5 + $0x260] sm:$0xff]  ;;  %v1066_v19 = vld [vmem:[%s2421_s5 + $0x268] sm:$0xff]  ;;  %v1067_v20 = vld [vmem:[%s2421_s5 + $0x270] sm:$0xff] }
  0x16   :  { %399 = vmatpush.msrb.mxu0 %v1092_v47  ;;  %340 = vmatpush.msra.mxu1 %v1085_v48  ;;  %v1068_v22 = vld [vmem:[%s2421_s5 + $0x278] sm:$0xff]  ;;  %v1061_v23 = vld [vmem:[%s2421_s5 + $0x240] sm:$0xff]  ;;  %v1062_v24 = vld [vmem:[%s2421_s5 + $0x248] sm:$0xff] }
  0x17   :  { %360 = vmatpush.msra.mxu2 %v1086_v49  ;;  %380 = vmatpush.msra.mxu3 %v1087_v51  ;;  %v1063_v25 = vld [vmem:[%s2421_s5 + $0x250] sm:$0xff]  ;;  %v1064_v27 = vld [vmem:[%s2421_s5 + $0x258] sm:$0xff]  ;;  %v1057_v28 = vld [vmem:[%s2421_s5 + $0x220] sm:$0xff] }
  0x18   :  { %400 = vmatpush.msrb.mxu0 %v1088_v53  ;;  %341 = vmatpush.msra.mxu1 %v1081_v54  ;;  %v1058_v29 = vld [vmem:[%s2421_s5 + $0x228] sm:$0xff]  ;;  %v1060_v31 = vld [vmem:[%s2421_s5 + $0x238] sm:$0xff]  ;;  %v1053_v34 = vld [vmem:[%s2421_s5 + $0x200] sm:$0xff] }
  0x19   :  { %361 = vmatpush.msra.mxu2 %v1082_v55  ;;  %381 = vmatpush.msra.mxu3 %v1083_v56  ;;  %v1054_v32 = vld [vmem:[%s2421_s5 + $0x208] sm:$0xff]  ;;  %v1055_v35 = vld [vmem:[%s2421_s5 + $0x210] sm:$0xff]  ;;  %v1056_v36 = vld [vmem:[%s2421_s5 + $0x218] sm:$0xff] }
  0x1a   :  { %401 = vmatpush.msrb.mxu0 %v1084_v59  ;;  %342 = vmatpush.msra.mxu1 %v1077_v60  ;;  %v265_v38 = vld [vmem:[%s2421_s5 + $0x1e8] sm:$0xff]  ;;  %v266_v39 = vld [vmem:[%s2421_s5 + $0x1f0] sm:$0xff]  ;;  %v260_v41 = vld [vmem:[%s2421_s5 + $0x1c0] sm:$0xff] }
  0x1b   :  { %362 = vmatpush.msra.mxu2 %v1078_v63  ;;  %382 = vmatpush.msra.mxu3 %v1079_v0  ;;  %v261_v42 = vld [vmem:[%s2421_s5 + $0x1c8] sm:$0xff]  ;;  %v262_v43 = vld [vmem:[%s2421_s5 + $0x1d0] sm:$0xff]  ;;  %v263_v44 = vld [vmem:[%s2421_s5 + $0x1d8] sm:$0xff] }
  0x1c   :  { %402 = vmatpush.msrb.mxu0 %v1080_v1  ;;  %343 = vmatpush.msra.mxu1 %v1073_v2  ;;  %v257_v46 = vld [vmem:[%s2421_s5 + $0x1a8] sm:$0xff]  ;;  %v258_v47 = vld [vmem:[%s2421_s5 + $0x1b0] sm:$0xff]  ;;  %v259_v48 = vld [vmem:[%s2421_s5 + $0x1b8] sm:$0xff] }
  0x1d   :  { %1052 = vmatmul.msk.f32.gmra.mxu0 %vm49_vm1, %v42_v5  ;;  %v1074_v5 = vld [vmem:[%s2421_s5 + $0x2a8] sm:$0xff]  ;;  %v252_v49 = vld [vmem:[%s2421_s5 + $0x180] sm:$0xff]  ;;  %v255_v53 = vld [vmem:[%s2421_s5 + $0x198] sm:$0xff] }
  0x1e   :  { %363 = vmatpush.msra.mxu2 %v1074_v5  ;;  %v253_v51 = vld [vmem:[%s2421_s5 + $0x188] sm:$0xff]  ;;  %v248_v54 = vld [vmem:[%s2421_s5 + $0x160] sm:$0xff]  ;;  %v250_v56 = vld [vmem:[%s2421_s5 + $0x170] sm:$0xff] }
  0x1f   :  { %v249_v55 = vld [vmem:[%s2421_s5 + $0x168] sm:$0xff]  ;;  %v246_v60 = vld [vmem:[%s2421_s5 + $0x150] sm:$0xff]  ;;  %v243_v1 = vld [vmem:[%s2421_s5 + $0x138] sm:$0xff] }
  0x20   :  { %v245_v59 = vld [vmem:[%s2421_s5 + $0x148] sm:$0xff]  ;;  %v242_v0 = vld [vmem:[%s2421_s5 + $0x130] sm:$0xff]  ;;  %v236_v2 = vld [vmem:[%s2421_s5 + $0x100] sm:$0xff] }
  0x21   :  { %v241_v63 = vld [vmem:[%s2421_s5 + $0x128] sm:$0xff]  ;;  %v239_v5 = vld [vmem:[%s2421_s5 + $0x118] sm:$0xff] }
  0x82   :  { %v83_v6 = vpop.f32.mrf.mxu0 }
  0x83   :  { %v1376_v11 = vadd.f32 %v1247_v7, %v83_v6  ;;  %v1075_v6 = vld [vmem:[%s2421_s5 + $0x2b0] sm:$0xff] }
  0x84   :  { %383 = vmatpush.msra.mxu3 %v1075_v6  ;;  %v232_v6 = vld [vmem:[%s2421_s5 + $0xe0] sm:$0xff] }
  0x86   :  { %384 = vmatpush.msra.mxu3 %v1071_v15  ;;  %v230_v15 = vld [vmem:[%s2421_s5 + $0xd0] sm:$0xff] }
  0x88   :  { %385 = vmatpush.msra.mxu3 %v1067_v20  ;;  %v227_v20 = vld [vmem:[%s2421_s5 + $0xb8] sm:$0xff] }
  0x8a   :  { %v86_v8 = vpop.f32.mrf.mxu0  ;;  %386 = vmatpush.msra.mxu3 %v1063_v25  ;;  %v216_v25 = vld [vmem:[%s2421_s5 + $0x60] sm:$0xff] }
  0x8b   :  { %v1373_v9 = vadd.f32 %v1247_v7, %v86_v8  ;;  %v1069_v8 = vld [vmem:[%s2421_s5 + $0x280] sm:$0xff] }
  0x8c   :  { %344 = vmatpush.msra.mxu1 %v1069_v8  ;;  %v234_v8 = vld [vmem:[%s2421_s5 + $0xf0] sm:$0xff] }
  0x8d   :  { %100 = vadd.xlane.f32.xlu0 %v1373_v9 }
  0x8e   :  { %345 = vmatpush.msra.mxu1 %v1065_v17  ;;  %v224_v17 = vld [vmem:[%s2421_s5 + $0xa0] sm:$0xff] }
  0x90   :  { %346 = vmatpush.msra.mxu1 %v1061_v23  ;;  %v222_v23 = vld [vmem:[%s2421_s5 + $0x90] sm:$0xff] }
  0x92   :  { %v89_v10 = vpop.f32.mrf.mxu0  ;;  %347 = vmatpush.msra.mxu1 %v1057_v28  ;;  %v219_v28 = vld [vmem:[%s2421_s5 + $0x78] sm:$0xff] }
  0x93   :  { %v1378_v12 = vadd.f32 %v1247_v7, %v89_v10 }
  0x94   :  { %348 = vmatpush.msra.mxu1 %v1053_v34  ;;  %v208_v34 = vld [vmem:[%s2421_s5 + $0x20] sm:$0xff] }
  0x95   :  { %102 = vadd.xlane.f32.xlu1 %v1378_v12  ;;  %98 = vadd.xlane.f32.xlu0 %v1376_v11 }
  0x9a   :  { %v92_v13 = vpop.f32.mrf.mxu0 }
  0x9b   :  { %v1382_v14 = vadd.f32 %v1247_v7, %v92_v13  ;;  %v1076_v7 = vld [vmem:[%s2421_s5 + $0x2b8] sm:$0xff]  ;;  %v1070_v13 = vld [vmem:[%s2421_s5 + $0x288] sm:$0xff] }
  0x9c   :  { %403 = vmatpush.msrb.mxu0 %v1076_v7  ;;  %364 = vmatpush.msra.mxu2 %v1070_v13  ;;  %v233_v7 = vld [vmem:[%s2421_s5 + $0xe8] sm:$0xff] }
  0x9d   :  { %104 = vadd.xlane.f32.xlu1 %v1382_v14  ;;  %v229_v13 = vld [vmem:[%s2421_s5 + $0xc8] sm:$0xff] }
  0x9e   :  { %404 = vmatpush.msrb.mxu0 %v1072_v16  ;;  %365 = vmatpush.msra.mxu2 %v1066_v19  ;;  %v231_v16 = vld [vmem:[%s2421_s5 + $0xd8] sm:$0xff]  ;;  %v226_v19 = vld [vmem:[%s2421_s5 + $0xb0] sm:$0xff] }
  0xa0   :  { %405 = vmatpush.msrb.mxu0 %v1068_v22  ;;  %366 = vmatpush.msra.mxu2 %v1062_v24  ;;  %v221_v22 = vld [vmem:[%s2421_s5 + $0x88] sm:$0xff]  ;;  %v223_v24 = vld [vmem:[%s2421_s5 + $0x98] sm:$0xff] }
  0xa2   :  { %406 = vmatpush.msrb.mxu0 %v1064_v27  ;;  %367 = vmatpush.msra.mxu2 %v1058_v29  ;;  %v218_v27 = vld [vmem:[%s2421_s5 + $0x70] sm:$0xff]  ;;  %v212_v29 = vld [vmem:[%s2421_s5 + $0x40] sm:$0xff] }
  0xa4   :  { %407 = vmatpush.msrb.mxu0 %v1060_v31  ;;  %368 = vmatpush.msra.mxu2 %v1054_v32  ;;  %v214_v31 = vld [vmem:[%s2421_s5 + $0x50] sm:$0xff]  ;;  %v209_v32 = vld [vmem:[%s2421_s5 + $0x28] sm:$0xff] }
  0xa6   :  { %408 = vmatpush.msrb.mxu0 %v1056_v36  ;;  %433 = vmatpush.msrb.mxu2 %v265_v38  ;;  %v211_v36 = vld [vmem:[%s2421_s5 + $0x38] sm:$0xff]  ;;  %v205_v38 = vld [vmem:[%s2421_s5 + $0x8] sm:$0xff] }
  0xa8   :  { %434 = vmatpush.msrb.mxu2 %v261_v42 }
  0xaa   :  { %435 = vmatpush.msrb.mxu2 %v257_v46 }
  0xac   :  { %436 = vmatpush.msrb.mxu2 %v253_v51 }
  0xae   :  { %437 = vmatpush.msrb.mxu2 %v249_v55 }
  0xb0   :  { %438 = vmatpush.msrb.mxu2 %v245_v59 }
  0xb2   :  { %439 = vmatpush.msrb.mxu2 %v241_v63 }
 0x100   :  { %v101_v37 = vpop.xlane.xlu0 %100 }
 0x101   :  { %v107_v40 = vmul.f32 0.01, %v101_v37  ;;  %v264_v37 = vld [vmem:[%s2421_s5 + $0x1e0] sm:$0xff] }
 0x102   :  { %413 = vmatpush.msrb.mxu1 %v264_v37  ;;  %v204_v37 = vld [vmem:[%s2421_s5] sm:$0xff] }
 0x103   :  { %v111_v45 = vsub.f32 %v1373_v9, %v107_v40  ;;  %v267_v40 = vld [vmem:[%s2421_s5 + $0x1f8] sm:$0xff] }
 0x104   :  { %473 = vmatpush.msra.mxu0 %v267_v40  ;;  %414 = vmatpush.msrb.mxu1 %v260_v41  ;;  %v207_v40 = vld [vmem:[%s2421_s5 + $0x18] sm:$0xff] }
 0x105   :  { %v1481_v50 = vsel %vm97_vm2, %v111_v45, 0.0  ;;  %v256_v45 = vld [vmem:[%s2421_s5 + $0x1a0] sm:$0xff] }
 0x106   :  { %v121_v52 = vmul.f32 %v1481_v50, %v1481_v50  ;;  %474 = vmatpush.msra.mxu0 %v263_v44  ;;  %415 = vmatpush.msrb.mxu1 %v256_v45 }
 0x108   :  { %v103_v57 = vpop.xlane.xlu1 %102  ;;  %126 = vadd.xlane.f32.xlu2 %v121_v52  ;;  %v99_v58 = vpop.xlane.xlu0 %98  ;;  %475 = vmatpush.msra.mxu0 %v259_v48  ;;  %v254_v52 = vld [vmem:[%s2421_s5 + $0x190] sm:$0xff] }
 0x109   :  { %v108_v61 = vmul.f32 0.01, %v103_v57  ;;  %v106_v62 = vmul.f32 0.01, %v99_v58  ;;  %416 = vmatpush.msrb.mxu1 %v252_v49  ;;  %v251_v57 = vld [vmem:[%s2421_s5 + $0x178] sm:$0xff]  ;;  %v244_v58 = vld [vmem:[%s2421_s5 + $0x140] sm:$0xff] }
 0x10a   :  { %476 = vmatpush.msra.mxu0 %v255_v53 }
 0x10b   :  { %v112_v3 = vsub.f32 %v1378_v12, %v108_v61  ;;  %v110_v4 = vsub.f32 %v1376_v11, %v106_v62  ;;  %417 = vmatpush.msrb.mxu1 %v248_v54  ;;  %v247_v61 = vld [vmem:[%s2421_s5 + $0x158] sm:$0xff]  ;;  %v240_v62 = vld [vmem:[%s2421_s5 + $0x120] sm:$0xff] }
 0x10c   :  { %477 = vmatpush.msra.mxu0 %v251_v57 }
 0x10d   :  { %v1534_v9 = vsel %vm97_vm2, %v112_v3, 0.0  ;;  %v1538_v10 = vsel %vm97_vm2, %v110_v4, 0.0  ;;  %418 = vmatpush.msrb.mxu1 %v244_v58  ;;  %v237_v3 = vld [vmem:[%s2421_s5 + $0x108] sm:$0xff]  ;;  %v238_v4 = vld [vmem:[%s2421_s5 + $0x110] sm:$0xff] }
 0x10e   :  { %v122_v11 = vmul.f32 %v1534_v9, %v1534_v9  ;;  %v120_v12 = vmul.f32 %v1538_v10, %v1538_v10  ;;  %478 = vmatpush.msra.mxu0 %v247_v61  ;;  %440 = vmatpush.msrb.mxu2 %v237_v3 }
 0x10f   :  { %419 = vmatpush.msrb.mxu1 %v240_v62  ;;  %v1806_v62 = vld [vmem:[%s2419_s3] ss:$0 sm:$0xff] }
 0x110   :  { %v105_v18 = vpop.xlane.xlu1 %104  ;;  %128 = vadd.xlane.f32.xlu0 %v122_v11  ;;  %124 = vadd.xlane.f32.xlu2 %v120_v12  ;;  %v235_v11 = vld [vmem:[%s2421_s5 + $0xf8] sm:$0xff]  ;;  %v228_v12 = vld [vmem:[%s2421_s5 + $0xc0] sm:$0xff] }
 0x111   :  { %v109_v21 = vmul.f32 0.01, %v105_v18  ;;  %479 = vmatpush.msra.mxu0 %v243_v1  ;;  %420 = vmatpush.msrb.mxu1 %v236_v2  ;;  %v225_v18 = vld [vmem:[%s2421_s5 + $0xa8] sm:$0xff]  ;;  %v1812_v2 = vld [vmem:[%s2420_s4] ss:$0 sm:$0xff] }
 0x112   :  { %441 = vmatpush.msrb.mxu2 %v233_v7 }
 0x113   :  { %v113_v26 = vsub.f32 %v1382_v14, %v109_v21  ;;  %v1059_v14 = vld [vmem:[%s2421_s5 + $0x230] sm:$0xff]  ;;  %480 = vmatpush.msra.mxu0 %v239_v5  ;;  %421 = vmatpush.msrb.mxu1 %v232_v6  ;;  %v220_v21 = vld [vmem:[%s2421_s5 + $0x80] sm:$0xff] }
 0x114   :  { %387 = vmatpush.msra.mxu3 %v1059_v14  ;;  %442 = vmatpush.msrb.mxu2 %v229_v13  ;;  %v213_v14 = vld [vmem:[%s2421_s5 + $0x48] sm:$0xff] }
 0x115   :  { %v1589_v30 = vsel %vm97_vm2, %v113_v26, 0.0  ;;  %481 = vmatpush.msra.mxu0 %v235_v11  ;;  %422 = vmatpush.msrb.mxu1 %v228_v12  ;;  %v217_v26 = vld [vmem:[%s2421_s5 + $0x68] sm:$0xff] }
 0x116   :  { %v123_v33 = vmul.f32 %v1589_v30, %v1589_v30  ;;  %388 = vmatpush.msra.mxu3 %v1055_v35  ;;  %443 = vmatpush.msrb.mxu2 %v225_v18  ;;  %v210_v35 = vld [vmem:[%s2421_s5 + $0x30] sm:$0xff]  ;;  %v1178_v18 = vld [vmem:[%s2421_s5 + $0x5e8] sm:$0xff] }
 0x117   :  { %482 = vmatpush.msra.mxu0 %v231_v16  ;;  %423 = vmatpush.msrb.mxu1 %v224_v17  ;;  %v1177_v17 = vld [vmem:[%s2421_s5 + $0x5e0] sm:$0xff] }
 0x118   :  { %130 = vadd.xlane.f32.xlu1 %v123_v33  ;;  %453 = vmatpush.msrb.mxu3 %v266_v39  ;;  %v215_v33 = vld [vmem:[%s2421_s5 + $0x58] sm:$0xff]  ;;  %v206_v39 = vld [vmem:[%s2421_s5 + $0x10] sm:$0xff] }
 0x119   :  { %483 = vmatpush.msra.mxu0 %v227_v20  ;;  %424 = vmatpush.msrb.mxu1 %v220_v21  ;;  %v1179_v20 = vld [vmem:[%s2421_s5 + $0x5f0] sm:$0xff]  ;;  %v1180_v21 = vld [vmem:[%s2421_s5 + $0x5f8] sm:$0xff] }
 0x11a   :  { %454 = vmatpush.msrb.mxu3 %v262_v43  ;;  %444 = vmatpush.msrb.mxu2 %v221_v22 }
 0x11b   :  { %484 = vmatpush.msra.mxu0 %v223_v24  ;;  %425 = vmatpush.msrb.mxu1 %v216_v25  ;;  %v1175_v24 = vld [vmem:[%s2421_s5 + $0x5d0] sm:$0xff]  ;;  %v1176_v25 = vld [vmem:[%s2421_s5 + $0x5d8] sm:$0xff] }
 0x11c   :  { %455 = vmatpush.msrb.mxu3 %v258_v47  ;;  %445 = vmatpush.msrb.mxu2 %v217_v26 }
 0x11d   :  { %485 = vmatpush.msra.mxu0 %v219_v28  ;;  %426 = vmatpush.msrb.mxu1 %v212_v29  ;;  %v1169_v29 = vld [vmem:[%s2421_s5 + $0x5a0] sm:$0xff] }
 0x11e   :  { %456 = vmatpush.msrb.mxu3 %v254_v52  ;;  %446 = vmatpush.msrb.mxu2 %v213_v14  ;;  %v1170_v14 = vld [vmem:[%s2421_s5 + $0x5a8] sm:$0xff] }
 0x11f   :  { %486 = vmatpush.msra.mxu0 %v215_v33  ;;  %427 = vmatpush.msrb.mxu1 %v208_v34  ;;  %v1172_v33 = vld [vmem:[%s2421_s5 + $0x5b8] sm:$0xff] }
 0x120   :  { %457 = vmatpush.msrb.mxu3 %v250_v56  ;;  %447 = vmatpush.msrb.mxu2 %v209_v32 }
 0x121   :  { %487 = vmatpush.msra.mxu0 %v211_v36  ;;  %428 = vmatpush.msrb.mxu1 %v204_v37  ;;  %v1166_v36 = vld [vmem:[%s2421_s5 + $0x588] sm:$0xff]  ;;  %v1167_v37 = vld [vmem:[%s2421_s5 + $0x590] sm:$0xff] }
 0x122   :  { %458 = vmatpush.msrb.mxu3 %v246_v60  ;;  %448 = vmatpush.msrb.mxu2 %v205_v38  ;;  %v1168_v38 = vld [vmem:[%s2421_s5 + $0x598] sm:$0xff] }
 0x123   :  { %488 = vmatpush.msra.mxu0 %v207_v40 }
 0x124   :  { %459 = vmatpush.msrb.mxu3 %v242_v0 }
 0x126   :  { %460 = vmatpush.msrb.mxu3 %v238_v4 }
 0x128   :  { %461 = vmatpush.msrb.mxu3 %v234_v8 }
 0x12a   :  { %462 = vmatpush.msrb.mxu3 %v230_v15 }
 0x12c   :  { %463 = vmatpush.msrb.mxu3 %v226_v19 }
 0x12e   :  { %464 = vmatpush.msrb.mxu3 %v222_v23  ;;  %v1173_v23 = vld [vmem:[%s2421_s5 + $0x5c0] sm:$0xff] }
 0x130   :  { %465 = vmatpush.msrb.mxu3 %v218_v27 }
 0x132   :  { %466 = vmatpush.msrb.mxu3 %v214_v31  ;;  %v1171_v31 = vld [vmem:[%s2421_s5 + $0x5b0] sm:$0xff] }
 0x134   :  { %467 = vmatpush.msrb.mxu3 %v210_v35  ;;  %v1165_v35 = vld [vmem:[%s2421_s5 + $0x580] sm:$0xff] }
 0x136   :  { %468 = vmatpush.msrb.mxu3 %v206_v39 }
 0x17b   :  { %v127_v41 = vpop.xlane.xlu2 %126 }
 0x17c   :  { %v133_v42 = vmul.f32 0.01, %v127_v41 }
 0x17e   :  { %v137_v43 = vadd.f32 1e-05, %v133_v42 }
 0x180   :  { %1251 = vrsqrt.f32 %v137_v43  ;;  %vm156_vm4 = vweird.f32 %v137_v43 }
 0x183   :  { %v125_v44 = vpop.xlane.xlu2 %124  ;;  %v129_v46 = vpop.xlane.xlu0 %128 }
 0x184   :  { %v132_v45 = vmul.f32 0.01, %v125_v44  ;;  %v134_v51 = vmul.f32 0.01, %v129_v46  ;;  %v1162_v44 = vld [vmem:[%s2421_s5 + $0x568] sm:$0xff] }
 0x186   :  { %v1252_v47 = vpop.eup %1251  ;;  %v136_v48 = vadd.f32 1e-05, %v132_v45  ;;  %v1800_v54 = vadd.f32 1e-05, %v134_v51  ;;  %v1163_v45 = vld [vmem:[%s2421_s5 + $0x570] sm:$0xff] }
 0x187   :  { %v151_v49 = vmul.f32 %v1252_v47, %v137_v43  ;;  %vm157_vm3 = vweird.f32 %v1252_v47  ;;  %v1161_v43 = vld [vmem:[%s2421_s5 + $0x560] sm:$0xff]  ;;  %v1159_v51 = vld [vmem:[%s2421_s5 + $0x550] sm:$0xff] }
 0x188   :  { %1253 = vrsqrt.f32 %v136_v48  ;;  %vm158_vm5 = vmor %vm156_vm4, %vm157_vm3  ;;  %vm146_vm7 = vweird.f32 %v136_v48  ;;  %vm166_vm13 = vweird.f32 %v1800_v54 }
 0x189   :  { %v152_v52 = vmul.f32 %v1252_v47, %v151_v49  ;;  %1255 = vrsqrt.f32 %v1800_v54  ;;  %v1158_v49 = vld [vmem:[%s2421_s5 + $0x548] sm:$0xff] }
 0x18b   :  { %v153_v53 = vmul.f32 0.5, %v152_v52  ;;  %v131_v55 = vpop.xlane.xlu1 %130  ;;  %v1160_v52 = vld [vmem:[%s2421_s5 + $0x558] sm:$0xff] }
 0x18c   :  { %v135_v56 = vmul.f32 0.01, %v131_v55  ;;  %v1153_v55 = vld [vmem:[%s2421_s5 + $0x520] sm:$0xff] }
 0x18d   :  { %v154_v57 = vsub.f32 1.5, %v153_v53 }
 0x18e   :  { %v1254_v58 = vpop.eup %1253  ;;  %v139_v59 = vadd.f32 1e-05, %v135_v56  ;;  %v1154_v56 = vld [vmem:[%s2421_s5 + $0x528] sm:$0xff] }
 0x18f   :  { %v155_v60 = vmul.f32 %v1252_v47, %v154_v57  ;;  %v141_v61 = vmul.f32 %v1254_v58, %v136_v48  ;;  %v1815_v5 = vpop.eup %1255  ;;  %vm147_vm6 = vweird.f32 %v1254_v58  ;;  %v1157_v48 = vld [vmem:[%s2421_s5 + $0x540] sm:$0xff]  ;;  %v1155_v57 = vld [vmem:[%s2421_s5 + $0x530] sm:$0xff] }
 0x190   :  { %1257 = vrsqrt.f32 %v139_v59  ;;  %vm148_vm8 = vmor %vm146_vm7, %vm147_vm6  ;;  %v161_v15 = vmul.f32 %v1815_v5, %v1800_v54  ;;  %vm176_vm10 = vweird.f32 %v139_v59  ;;  %vm167_vm12 = vweird.f32 %v1815_v5  ;;  %v1147_v54 = vld [vmem:[%s2421_s5 + $0x4f0] sm:$0xff] }
 0x191   :  { %v159_v63 = vsel %vm158_vm5, %v1252_v47, %v155_v60  ;;  %v142_v0 = vmul.f32 %v1254_v58, %v141_v61  ;;  %v1149_v60 = vld [vmem:[%s2421_s5 + $0x500] sm:$0xff]  ;;  %v1150_v61 = vld [vmem:[%s2421_s5 + $0x508] sm:$0xff]  ;;  %vm1935_vm14 = vmor %vm166_vm13, %vm167_vm12  ;;  %vm1030_vm6 = vcmask 48128  }
 0x192   :  { %v181_v1 = vmul.f32 %v159_v63, %v1481_v50  ;;  %v162_v27 = vmul.f32 %v1815_v5, %v161_v15  ;;  %v1151_v63 = vld [vmem:[%s2421_s5 + $0x510] sm:$0xff] }
 0x193   :  { %v143_v3 = vmul.f32 0.5, %v142_v0  ;;  %v1152_v0 = vld [vmem:[%s2421_s5 + $0x518] sm:$0xff] }
 0x194   :  { %v189_v4 = vmul.f32 %v1806_v62, %v181_v1  ;;  %v163_v40 = vmul.f32 0.5, %v162_v27  ;;  %v1145_v1 = vld [vmem:[%s2421_s5 + $0x4e0] sm:$0xff]  ;;  %v1127_v27 = vld [vmem:[%s2421_s5 + $0x450] sm:$0xff] }
 0x195   :  { %v144_v6 = vsub.f32 1.5, %v143_v3  ;;  %v1146_v3 = vld [vmem:[%s2421_s5 + $0x4e8] sm:$0xff] }
 0x196   :  { %v1258_v7 = vpop.eup %1257  ;;  %v197_v8 = vadd.f32 %v1812_v2, %v189_v4  ;;  %v164_v47 = vsub.f32 1.5, %v163_v40  ;;  %v1244_v40 = vld [vmem:[%s2421_s5 + $0x7f8] sm:$0xff] }
 0x197   :  { %v145_v11 = vmul.f32 %v1254_v58, %v144_v6  ;;  %v171_v12 = vmul.f32 %v1258_v7, %v139_v59  ;;  %vm177_vm9 = vweird.f32 %v1258_v7  ;;  %v1148_v6 = vld [vmem:[%s2421_s5 + $0x4f8] sm:$0xff] }
 0x198   :  { %v201_v50 = vmax.f32 %v197_v8, 0.0  ;;  %vm178_vm11 = vmor %vm176_vm10, %vm177_vm9  ;;  %v165_v59 = vmul.f32 %v1815_v5, %v164_v47  ;;  %v1141_v8 = vld [vmem:[%s2421_s5 + $0x4c0] sm:$0xff]  ;;  %v1236_v47 = vld [vmem:[%s2421_s5 + $0x7b8] sm:$0xff] }
 0x199   :  { %v149_v13 = vsel %vm148_vm8, %v1254_v58, %v145_v11  ;;  %v172_v16 = vmul.f32 %v1258_v7, %v171_v12  ;;  %v1156_v58 = vld [vmem:[%s2421_s5 + $0x538] sm:$0xff]  ;;  %v1142_v11 = vld [vmem:[%s2421_s5 + $0x4c8] sm:$0xff]  ;;  %v1143_v12 = vld [vmem:[%s2421_s5 + $0x4d0] sm:$0xff] }
 0x19a   :  { %v180_v19 = vmul.f32 %v149_v13, %v1538_v10  ;;  %349 = vmatmul.f32.vlgmr.msra.gmra.mxu1 %v201_v50  ;;  %369 = vmatmul.f32.vlgmr.msra.gmra.mxu2 %v201_v50  ;;  %v1174_v10 = vld [vmem:[%s2421_s5 + $0x5c8] sm:$0xff]  ;;  %v1220_v4 = vld [vmem:[%s2421_s5 + $0x738] sm:$0xff] }
 0x19b   :  { %v173_v22 = vmul.f32 0.5, %v172_v16  ;;  %389 = vmatmul.f32.vlgmr.msra.gmra.mxu3 %v201_v50  ;;  %409 = vmatmul.f32.vlgmr.msrb.gmra.mxu0 %v201_v50  ;;  %v1137_v50 = vld [vmem:[%s2421_s5 + $0x4a0] sm:$0xff]  ;;  %v1138_v13 = vld [vmem:[%s2421_s5 + $0x4a8] sm:$0xff]  ;;  %v1139_v16 = vld [vmem:[%s2421_s5 + $0x4b0] sm:$0xff] }
 0x19c   :  { %558 = vmatpush.msra.mxu1 %v1177_v17  ;;  %578 = vmatpush.msra.mxu2 %v1178_v18  ;;  %v188_v26 = vmul.f32 %v1806_v62, %v180_v19  ;;  %v1140_v17 = vld [vmem:[%s2421_s5 + $0x4b8] sm:$0xff]  ;;  %v1133_v18 = vld [vmem:[%s2421_s5 + $0x480] sm:$0xff]  ;;  %v1135_v19 = vld [vmem:[%s2421_s5 + $0x490] sm:$0xff] }
 0x19d   :  { %v174_v28 = vsub.f32 1.5, %v173_v22  ;;  %598 = vmatpush.msra.mxu3 %v1179_v20  ;;  %618 = vmatpush.msrb.mxu0 %v1180_v21  ;;  %v1136_v20 = vld [vmem:[%s2421_s5 + $0x498] sm:$0xff]  ;;  %v1129_v21 = vld [vmem:[%s2421_s5 + $0x460] sm:$0xff]  ;;  %v1130_v22 = vld [vmem:[%s2421_s5 + $0x468] sm:$0xff] }
 0x19e   :  { %559 = vmatpush.msra.mxu1 %v1173_v23  ;;  %579 = vmatpush.msra.mxu2 %v1174_v10  ;;  %v196_v34 = vadd.f32 %v1812_v2, %v188_v26  ;;  %v1131_v23 = vld [vmem:[%s2421_s5 + $0x470] sm:$0xff]  ;;  %v1132_v10 = vld [vmem:[%s2421_s5 + $0x478] sm:$0xff]  ;;  %v1126_v26 = vld [vmem:[%s2421_s5 + $0x448] sm:$0xff] }
 0x19f   :  { %v175_v32 = vmul.f32 %v1258_v7, %v174_v28  ;;  %599 = vmatpush.msra.mxu3 %v1175_v24  ;;  %619 = vmatpush.msrb.mxu0 %v1176_v25  ;;  %v1125_v25 = vld [vmem:[%s2421_s5 + $0x440] sm:$0xff] }
 0x1a0   :  { %560 = vmatpush.msra.mxu1 %v1169_v29  ;;  %580 = vmatpush.msra.mxu2 %v1170_v14  ;;  %v200_v39 = vmax.f32 %v196_v34, 0.0  ;;  %v1121_v28 = vld [vmem:[%s2421_s5 + $0x420] sm:$0xff]  ;;  %v1122_v29 = vld [vmem:[%s2421_s5 + $0x428] sm:$0xff]  ;;  %v1123_v14 = vld [vmem:[%s2421_s5 + $0x430] sm:$0xff] }
 0x1a1   :  { %v179_v41 = vsel %vm178_vm11, %v1258_v7, %v175_v32  ;;  %600 = vmatpush.msra.mxu3 %v1171_v31  ;;  %620 = vmatpush.msrb.mxu0 %v1172_v33  ;;  %v169_v7 = vsel %vm1935_vm14, %v1815_v5, %v165_v59  ;;  %v1144_v5 = vld [vmem:[%s2421_s5 + $0x4d8] sm:$0xff]  ;;  %v1117_v34 = vld [vmem:[%s2421_s5 + $0x400] sm:$0xff]  ;;  %v1118_v32 = vld [vmem:[%s2421_s5 + $0x408] sm:$0xff] }
 0x1a2   :  { %v183_v42 = vmul.f32 %v179_v41, %v1589_v30  ;;  %561 = vmatpush.msra.mxu1 %v1165_v35  ;;  %581 = vmatpush.msra.mxu2 %v1166_v36  ;;  %v1164_v30 = vld [vmem:[%s2421_s5 + $0x578] sm:$0xff]  ;;  %v182_v15 = vmul.f32 %v169_v7, %v1534_v9  ;;  %v1134_v9 = vld [vmem:[%s2421_s5 + $0x488] sm:$0xff]  ;;  %v1119_v35 = vld [vmem:[%s2421_s5 + $0x410] sm:$0xff] }
 0x1a3   :  { %601 = vmatpush.msra.mxu3 %v1167_v37  ;;  %621 = vmatpush.msrb.mxu0 %v1168_v38  ;;  %v1124_v31 = vld [vmem:[%s2421_s5 + $0x438] sm:$0xff]  ;;  %v1241_v37 = vld [vmem:[%s2421_s5 + $0x7e0] sm:$0xff]  ;;  %v1242_v38 = vld [vmem:[%s2421_s5 + $0x7e8] sm:$0xff] }
 0x1a4   :  { %429 = vmatmul.f32.vlgmr.msrb.gmra.mxu1 %v200_v39  ;;  %449 = vmatmul.f32.vlgmr.msrb.gmra.mxu2 %v200_v39  ;;  %v191_v46 = vmul.f32 %v1806_v62, %v183_v42  ;;  %v190_v24 = vmul.f32 %v1806_v62, %v182_v15  ;;  %v1128_v62 = vld [vmem:[%s2421_s5 + $0x458] sm:$0xff]  ;;  %v1237_v41 = vld [vmem:[%s2421_s5 + $0x7c0] sm:$0xff]  ;;  %v1238_v42 = vld [vmem:[%s2421_s5 + $0x7c8] sm:$0xff] }
 0x1a5   :  { %469 = vmatmul.f32.vlgmr.msrb.gmra.mxu3 %v200_v39  ;;  %489 = vmatmul.f32.vlgmr.msra.gmra.mxu0 %v200_v39  ;;  %v1243_v39 = vld [vmem:[%s2421_s5 + $0x7f0] sm:$0xff]  ;;  %v1221_v59 = vld [vmem:[%s2421_s5 + $0x740] sm:$0xff]  ;;  %v1206_v15 = vld [vmem:[%s2421_s5 + $0x6c8] sm:$0xff] }
 0x1a6   :  { %562 = vmatpush.msra.mxu1 %v1161_v43  ;;  %582 = vmatpush.msra.mxu2 %v1162_v44  ;;  %v1900_v53 = vadd.f32 %v1812_v2, %v191_v46  ;;  %v198_v33 = vadd.f32 %v1812_v2, %v190_v24  ;;  %v1120_v2 = vld [vmem:[%s2421_s5 + $0x418] sm:$0xff]  ;;  %v1239_v43 = vld [vmem:[%s2421_s5 + $0x7d0] sm:$0xff]  ;;  %v1193_v24 = vld [vmem:[%s2421_s5 + $0x660] sm:$0xff] }
 0x1a7   :  { %602 = vmatpush.msra.mxu3 %v1163_v45  ;;  %622 = vmatpush.msrb.mxu0 %v1164_v30  ;;  %v1240_v44 = vld [vmem:[%s2421_s5 + $0x7d8] sm:$0xff]  ;;  %v1233_v45 = vld [vmem:[%s2421_s5 + $0x7a0] sm:$0xff]  ;;  %v1234_v30 = vld [vmem:[%s2421_s5 + $0x7a8] sm:$0xff] }
 0x1a8   :  { %563 = vmatpush.msra.mxu1 %v1157_v48  ;;  %583 = vmatpush.msra.mxu2 %v1158_v49  ;;  %v202_v36 = vmax.f32 %v198_v33, 0.0  ;;  %v1235_v46 = vld [vmem:[%s2421_s5 + $0x7b0] sm:$0xff]  ;;  %v1229_v48 = vld [vmem:[%s2421_s5 + $0x780] sm:$0xff]  ;;  %v1230_v49 = vld [vmem:[%s2421_s5 + $0x788] sm:$0xff] }
 0x1a9   :  { %603 = vmatpush.msra.mxu3 %v1159_v51  ;;  %623 = vmatpush.msrb.mxu0 %v1160_v52  ;;  %v1231_v51 = vld [vmem:[%s2421_s5 + $0x790] sm:$0xff]  ;;  %v1232_v52 = vld [vmem:[%s2421_s5 + $0x798] sm:$0xff]  ;;  %v1186_v33 = vld [vmem:[%s2421_s5 + $0x628] sm:$0xff] }
 0x1aa   :  { %564 = vmatpush.msra.mxu1 %v1153_v55  ;;  %584 = vmatpush.msra.mxu2 %v1154_v56  ;;  %v1225_v55 = vld [vmem:[%s2421_s5 + $0x760] sm:$0xff]  ;;  %v1226_v56 = vld [vmem:[%s2421_s5 + $0x768] sm:$0xff]  ;;  %v1215_v7 = vld [vmem:[%s2421_s5 + $0x710] sm:$0xff] }
 0x1ab   :  { %604 = vmatpush.msra.mxu3 %v1155_v57  ;;  %624 = vmatpush.msrb.mxu0 %v1156_v58  ;;  %v1227_v57 = vld [vmem:[%s2421_s5 + $0x770] sm:$0xff]  ;;  %v1228_v58 = vld [vmem:[%s2421_s5 + $0x778] sm:$0xff] }
 0x1ac   :  { %565 = vmatpush.msra.mxu1 %v1149_v60  ;;  %585 = vmatpush.msra.mxu2 %v1150_v61  ;;  %v1222_v60 = vld [vmem:[%s2421_s5 + $0x748] sm:$0xff]  ;;  %v1223_v61 = vld [vmem:[%s2421_s5 + $0x750] sm:$0xff] }
 0x1ad   :  { %605 = vmatpush.msra.mxu3 %v1151_v63  ;;  %625 = vmatpush.msrb.mxu0 %v1152_v0  ;;  %v1224_v63 = vld [vmem:[%s2421_s5 + $0x758] sm:$0xff]  ;;  %v1217_v0 = vld [vmem:[%s2421_s5 + $0x720] sm:$0xff] }
 0x1ae   :  { %566 = vmatpush.msra.mxu1 %v1145_v1  ;;  %586 = vmatpush.msra.mxu2 %v1146_v3  ;;  %v1218_v1 = vld [vmem:[%s2421_s5 + $0x728] sm:$0xff]  ;;  %v1219_v3 = vld [vmem:[%s2421_s5 + $0x730] sm:$0xff] }
 0x1af   :  { %606 = vmatpush.msra.mxu3 %v1147_v54  ;;  %626 = vmatpush.msrb.mxu0 %v1148_v6  ;;  %v1213_v54 = vld [vmem:[%s2421_s5 + $0x700] sm:$0xff]  ;;  %v1214_v6 = vld [vmem:[%s2421_s5 + $0x708] sm:$0xff] }
 0x1b0   :  { %567 = vmatpush.msra.mxu1 %v1141_v8  ;;  %587 = vmatpush.msra.mxu2 %v1142_v11  ;;  %v1216_v8 = vld [vmem:[%s2421_s5 + $0x718] sm:$0xff]  ;;  %v1209_v11 = vld [vmem:[%s2421_s5 + $0x6e0] sm:$0xff] }
 0x1b1   :  { %607 = vmatpush.msra.mxu3 %v1143_v12  ;;  %627 = vmatpush.msrb.mxu0 %v1144_v5  ;;  %v1210_v12 = vld [vmem:[%s2421_s5 + $0x6e8] sm:$0xff]  ;;  %v1211_v5 = vld [vmem:[%s2421_s5 + $0x6f0] sm:$0xff] }
 0x1b2   :  { %568 = vmatpush.msra.mxu1 %v1137_v50  ;;  %588 = vmatpush.msra.mxu2 %v1138_v13  ;;  %v1212_v50 = vld [vmem:[%s2421_s5 + $0x6f8] sm:$0xff]  ;;  %v1205_v13 = vld [vmem:[%s2421_s5 + $0x6c0] sm:$0xff] }
 0x1b3   :  { %608 = vmatpush.msra.mxu3 %v1139_v16  ;;  %628 = vmatpush.msrb.mxu0 %v1140_v17  ;;  %v1207_v16 = vld [vmem:[%s2421_s5 + $0x6d0] sm:$0xff]  ;;  %v1208_v17 = vld [vmem:[%s2421_s5 + $0x6d8] sm:$0xff] }
 0x1b4   :  { %569 = vmatpush.msra.mxu1 %v1133_v18  ;;  %589 = vmatpush.msra.mxu2 %v1134_v9  ;;  %v1201_v18 = vld [vmem:[%s2421_s5 + $0x6a0] sm:$0xff]  ;;  %v1202_v9 = vld [vmem:[%s2421_s5 + $0x6a8] sm:$0xff] }
 0x1b5   :  { %609 = vmatpush.msra.mxu3 %v1135_v19  ;;  %629 = vmatpush.msrb.mxu0 %v1136_v20  ;;  %v1203_v19 = vld [vmem:[%s2421_s5 + $0x6b0] sm:$0xff]  ;;  %v1204_v20 = vld [vmem:[%s2421_s5 + $0x6b8] sm:$0xff] }
 0x1b6   :  { %570 = vmatpush.msra.mxu1 %v1129_v21  ;;  %590 = vmatpush.msra.mxu2 %v1130_v22  ;;  %v1197_v21 = vld [vmem:[%s2421_s5 + $0x680] sm:$0xff]  ;;  %v1198_v22 = vld [vmem:[%s2421_s5 + $0x688] sm:$0xff] }
 0x1b7   :  { %610 = vmatpush.msra.mxu3 %v1131_v23  ;;  %630 = vmatpush.msrb.mxu0 %v1132_v10  ;;  %v1199_v23 = vld [vmem:[%s2421_s5 + $0x690] sm:$0xff]  ;;  %v1200_v10 = vld [vmem:[%s2421_s5 + $0x698] sm:$0xff] }
 0x1b8   :  { %571 = vmatpush.msra.mxu1 %v1125_v25  ;;  %591 = vmatpush.msra.mxu2 %v1126_v26  ;;  %v1194_v25 = vld [vmem:[%s2421_s5 + $0x668] sm:$0xff]  ;;  %v1195_v26 = vld [vmem:[%s2421_s5 + $0x670] sm:$0xff] }
 0x1b9   :  { %611 = vmatpush.msra.mxu3 %v1127_v27  ;;  %631 = vmatpush.msrb.mxu0 %v1128_v62  ;;  %v1196_v27 = vld [vmem:[%s2421_s5 + $0x678] sm:$0xff]  ;;  %v1189_v62 = vld [vmem:[%s2421_s5 + $0x640] sm:$0xff] }
 0x1ba   :  { %572 = vmatpush.msra.mxu1 %v1121_v28  ;;  %592 = vmatpush.msra.mxu2 %v1122_v29  ;;  %v1190_v28 = vld [vmem:[%s2421_s5 + $0x648] sm:$0xff]  ;;  %v1191_v29 = vld [vmem:[%s2421_s5 + $0x650] sm:$0xff] }
 0x1bb   :  { %612 = vmatpush.msra.mxu3 %v1123_v14  ;;  %632 = vmatpush.msrb.mxu0 %v1124_v31  ;;  %v1192_v14 = vld [vmem:[%s2421_s5 + $0x658] sm:$0xff]  ;;  %v1185_v31 = vld [vmem:[%s2421_s5 + $0x620] sm:$0xff] }
 0x1bc   :  { %573 = vmatpush.msra.mxu1 %v1117_v34  ;;  %593 = vmatpush.msra.mxu2 %v1118_v32  ;;  %v1187_v34 = vld [vmem:[%s2421_s5 + $0x630] sm:$0xff]  ;;  %v1188_v32 = vld [vmem:[%s2421_s5 + $0x638] sm:$0xff] }
 0x1bd   :  { %613 = vmatpush.msra.mxu3 %v1119_v35  ;;  %633 = vmatpush.msrb.mxu0 %v1120_v2  ;;  %v1181_v35 = vld [vmem:[%s2421_s5 + $0x600] sm:$0xff]  ;;  %v1182_v2 = vld [vmem:[%s2421_s5 + $0x608] sm:$0xff] }
 0x1be   :  { %574 = vmatmul.f32.vlgmr.msra.gmra.mxu1 %v202_v36  ;;  %594 = vmatmul.f32.vlgmr.msra.gmra.mxu2 %v202_v36 }
 0x1bf   :  { %614 = vmatmul.f32.vlgmr.msra.gmra.mxu3 %v202_v36  ;;  %634 = vmatmul.f32.vlgmr.msrb.gmra.mxu0 %v202_v36  ;;  %v1183_v36 = vld [vmem:[%s2421_s5 + $0x610] sm:$0xff] }
 0x1c0   :  { %707 = vmatpush.msrb.mxu1 %v1241_v37  ;;  %727 = vmatpush.msrb.mxu2 %v1242_v38  ;;  %v1184_v37 = vld [vmem:[%s2421_s5 + $0x618] sm:$0xff]  ;;  %v203_v38 = vmax.f32 %v1900_v53, 0.0 }
 0x1c1   :  { %747 = vmatpush.msrb.mxu3 %v1243_v39  ;;  %767 = vmatpush.msra.mxu0 %v1244_v40 }
 0x1c2   :  { %708 = vmatpush.msrb.mxu1 %v1237_v41  ;;  %728 = vmatpush.msrb.mxu2 %v1238_v42 }
 0x1c3   :  { %748 = vmatpush.msrb.mxu3 %v1239_v43  ;;  %768 = vmatpush.msra.mxu0 %v1240_v44 }
 0x1c4   :  { %709 = vmatpush.msrb.mxu1 %v1233_v45  ;;  %729 = vmatpush.msrb.mxu2 %v1234_v30 }
 0x1c5   :  { %749 = vmatpush.msrb.mxu3 %v1235_v46  ;;  %769 = vmatpush.msra.mxu0 %v1236_v47 }
 0x1c6   :  { %710 = vmatpush.msrb.mxu1 %v1229_v48  ;;  %730 = vmatpush.msrb.mxu2 %v1230_v49 }
 0x1c7   :  { %750 = vmatpush.msrb.mxu3 %v1231_v51  ;;  %770 = vmatpush.msra.mxu0 %v1232_v52 }
 0x1c8   :  { %711 = vmatpush.msrb.mxu1 %v1225_v55  ;;  %731 = vmatpush.msrb.mxu2 %v1226_v56  ;;  %v791_v55 = vld [vmem:[%s2422_s6] sm:$0xf] }
 0x1c9   :  { %751 = vmatpush.msrb.mxu3 %v1227_v57  ;;  %771 = vmatpush.msra.mxu0 %v1228_v58 }
 0x1ca   :  { %712 = vmatpush.msrb.mxu1 %v1221_v59  ;;  %732 = vmatpush.msrb.mxu2 %v1222_v60 }
 0x1cb   :  { %752 = vmatpush.msrb.mxu3 %v1223_v61  ;;  %772 = vmatpush.msra.mxu0 %v1224_v63 }
 0x1cc   :  { %713 = vmatpush.msrb.mxu1 %v1217_v0  ;;  %733 = vmatpush.msrb.mxu2 %v1218_v1  ;;  %v793_v0 = vperm.slane %v791_v55, 0  ;;  %v794_v1 = vperm.slane %v791_v55, 1 }
 0x1cd   :  { %753 = vmatpush.msrb.mxu3 %v1219_v3  ;;  %773 = vmatpush.msra.mxu0 %v1220_v4 }
 0x1ce   :  { %714 = vmatpush.msrb.mxu1 %v1213_v54  ;;  %734 = vmatpush.msrb.mxu2 %v1214_v6  ;;  %v796_v54 = vperm.slane %v791_v55, 3 }
 0x1cf   :  { %754 = vmatpush.msrb.mxu3 %v1215_v7  ;;  %774 = vmatpush.msra.mxu0 %v1216_v8 }
 0x1d0   :  { %715 = vmatpush.msrb.mxu1 %v1209_v11  ;;  %735 = vmatpush.msrb.mxu2 %v1210_v12  ;;  %v795_v11 = vperm.slane %v791_v55, 2  ;;  %v882_v55 = vld [vmem:[%s2425_s9 + $0x38] sm:$0xff] }
 0x1d1   :  { %755 = vmatpush.msrb.mxu3 %v1211_v5  ;;  %775 = vmatpush.msra.mxu0 %v1212_v50 }
 0x1d2   :  { %716 = vmatpush.msrb.mxu1 %v1205_v13  ;;  %736 = vmatpush.msrb.mxu2 %v1206_v15 }
 0x1d3   :  { %756 = vmatpush.msrb.mxu3 %v1207_v16  ;;  %776 = vmatpush.msra.mxu0 %v1208_v17 }
 0x1d4   :  { %717 = vmatpush.msrb.mxu1 %v1201_v18  ;;  %737 = vmatpush.msrb.mxu2 %v1202_v9 }
 0x1d5   :  { %757 = vmatpush.msrb.mxu3 %v1203_v19  ;;  %777 = vmatpush.msra.mxu0 %v1204_v20  ;;  %v890_v19 = vld [vmem:[%s2425_s9 + $0x78] sm:$0xff] }
 0x1d6   :  { %718 = vmatpush.msrb.mxu1 %v1197_v21  ;;  %738 = vmatpush.msrb.mxu2 %v1198_v22  ;;  %v906_v20 = vld [vmem:[%s2425_s9 + $0xf8] sm:$0xff] }
 0x1d7   :  { %758 = vmatpush.msrb.mxu3 %v1199_v23  ;;  %778 = vmatpush.msra.mxu0 %v1200_v10  ;;  %v922_v21 = vld [vmem:[%s2425_s9 + $0x178] sm:$0xff] }
 0x1d8   :  { %719 = vmatpush.msrb.mxu1 %v1193_v24  ;;  %739 = vmatpush.msrb.mxu2 %v1194_v25 }
 0x1d9   :  { %759 = vmatpush.msrb.mxu3 %v1195_v26  ;;  %779 = vmatpush.msra.mxu0 %v1196_v27 }
 0x1da   :  { %720 = vmatpush.msrb.mxu1 %v1189_v62  ;;  %740 = vmatpush.msrb.mxu2 %v1190_v28 }
 0x1db   :  { %760 = vmatpush.msrb.mxu3 %v1191_v29  ;;  %780 = vmatpush.msra.mxu0 %v1192_v14 }
 0x1dc   :  { %721 = vmatpush.msrb.mxu1 %v1185_v31  ;;  %741 = vmatpush.msrb.mxu2 %v1186_v33 }
 0x1dd   :  { %761 = vmatpush.msrb.mxu3 %v1187_v34  ;;  %781 = vmatpush.msra.mxu0 %v1188_v32  ;;  %v889_v32 = vld [vmem:[%s2425_s9 + $0x70] sm:$0xff] }
 0x1de   :  { %722 = vmatpush.msrb.mxu1 %v1181_v35  ;;  %742 = vmatpush.msrb.mxu2 %v1182_v2  ;;  %v905_v35 = vld [vmem:[%s2425_s9 + $0xf0] sm:$0xff] }
 0x1df   :  { %762 = vmatpush.msrb.mxu3 %v1183_v36  ;;  %782 = vmatpush.msra.mxu0 %v1184_v37  ;;  %v921_v2 = vld [vmem:[%s2425_s9 + $0x170] sm:$0xff]  ;;  %v888_v36 = vld [vmem:[%s2425_s9 + $0x68] sm:$0xff] }
 0x1e0   :  { %723 = vmatmul.f32.vlgmr.msrb.gmra.mxu1 %v203_v38  ;;  %743 = vmatmul.f32.vlgmr.msrb.gmra.mxu2 %v203_v38  ;;  %v904_v37 = vld [vmem:[%s2425_s9 + $0xe8] sm:$0xff] }
 0x1e1   :  { %763 = vmatmul.f32.vlgmr.msrb.gmra.mxu3 %v203_v38  ;;  %783 = vmatmul.f32.vlgmr.msra.gmra.mxu0 %v203_v38  ;;  %v920_v38 = vld [vmem:[%s2425_s9 + $0x168] sm:$0xff] }
 0x1e2   :  { %932 = vmatpush.msra.mxu1 %v890_v19  ;;  %952 = vmatpush.msra.mxu2 %v906_v20 }
 0x1e3   :  { %972 = vmatpush.msra.mxu3 %v922_v21 }
 0x1e4   :  { %933 = vmatpush.msra.mxu1 %v889_v32  ;;  %953 = vmatpush.msra.mxu2 %v905_v35 }
 0x1e5   :  { %973 = vmatpush.msra.mxu3 %v921_v2 }
 0x1e6   :  { %934 = vmatpush.msra.mxu1 %v888_v36  ;;  %954 = vmatpush.msra.mxu2 %v904_v37 }
 0x1e7   :  { %974 = vmatpush.msra.mxu3 %v920_v38 }
 0x217   :  { %v350_v39 = vpop.f32.mrf.mxu1 }
 0x218   :  { %v410_v40 = vpop.f32.mrf.mxu0 }
 0x21d   :  { %v370_v41 = vpop.f32.mrf.mxu2 }
 0x21e   :  { %v390_v42 = vpop.f32.mrf.mxu3 }
 0x221   :  { %v430_v43 = vpop.f32.mrf.mxu1 }
 0x222   :  { %v490_v44 = vpop.f32.mrf.mxu0  ;;  %v431_v51 = vadd.f32 %v430_v43, %v350_v39  ;;  %v887_v39 = vld [vmem:[%s2425_s9 + $0x60] sm:$0xff]  ;;  %v902_v43 = vld [vmem:[%s2425_s9 + $0xd8] sm:$0xff] }
 0x223   :  { %v491_v53 = vadd.f32 %v490_v44, %v410_v40  ;;  %v903_v40 = vld [vmem:[%s2425_s9 + $0xe0] sm:$0xff]  ;;  %935 = vmatpush.msra.mxu1 %v887_v39  ;;  %v918_v44 = vld [vmem:[%s2425_s9 + $0x158] sm:$0xff] }
 0x224   :  { %955 = vmatpush.msra.mxu2 %v903_v40 }
 0x226   :  { %956 = vmatpush.msra.mxu2 %v902_v43 }
 0x227   :  { %v450_v45 = vpop.f32.mrf.mxu2 }
 0x228   :  { %v470_v30 = vpop.f32.mrf.mxu3  ;;  %v451_v56 = vadd.f32 %v450_v45, %v370_v41  ;;  %v919_v41 = vld [vmem:[%s2425_s9 + $0x160] sm:$0xff]  ;;  %v885_v45 = vld [vmem:[%s2425_s9 + $0x50] sm:$0xff] }
 0x229   :  { %v471_v59 = vadd.f32 %v470_v30, %v390_v42  ;;  %975 = vmatpush.msra.mxu3 %v919_v41  ;;  %v886_v42 = vld [vmem:[%s2425_s9 + $0x58] sm:$0xff]  ;;  %v901_v30 = vld [vmem:[%s2425_s9 + $0xd0] sm:$0xff] }
 0x22a   :  { %936 = vmatpush.msra.mxu1 %v886_v42  ;;  %957 = vmatpush.msra.mxu2 %v901_v30 }
 0x22b   :  { %976 = vmatpush.msra.mxu3 %v918_v44 }
 0x22c   :  { %937 = vmatpush.msra.mxu1 %v885_v45 }
 0x23b   :  { %v575_v46 = vpop.f32.mrf.mxu1 }
 0x23c   :  { %v635_v47 = vpop.f32.mrf.mxu0  ;;  %v638_v57 = vadd.f32 %v575_v46, %v431_v51  ;;  %v917_v46 = vld [vmem:[%s2425_s9 + $0x150] sm:$0xff]  ;;  %v883_v51 = vld [vmem:[%s2425_s9 + $0x40] sm:$0xff] }
 0x23d   :  { %v641_v60 = vadd.f32 %v635_v47, %v491_v53  ;;  %977 = vmatpush.msra.mxu3 %v917_v46  ;;  %v884_v47 = vld [vmem:[%s2425_s9 + $0x48] sm:$0xff]  ;;  %v899_v53 = vld [vmem:[%s2425_s9 + $0xc0] sm:$0xff] }
 0x23e   :  { %938 = vmatpush.msra.mxu1 %v884_v47 }
 0x240   :  { %939 = vmatpush.msra.mxu1 %v883_v51 }
 0x241   :  { %v595_v48 = vpop.f32.mrf.mxu2 }
 0x242   :  { %v615_v49 = vpop.f32.mrf.mxu3  ;;  %v639_v61 = vadd.f32 %v595_v48, %v451_v56  ;;  %v900_v48 = vld [vmem:[%s2425_s9 + $0xc8] sm:$0xff]  ;;  %v898_v56 = vld [vmem:[%s2425_s9 + $0xb8] sm:$0xff]  ;;  %940 = vmatpush.msra.mxu1 %v882_v55 }
 0x243   :  { %v640_v3 = vadd.f32 %v615_v49, %v471_v59  ;;  %v916_v49 = vld [vmem:[%s2425_s9 + $0x148] sm:$0xff]  ;;  %958 = vmatpush.msra.mxu2 %v900_v48  ;;  %v897_v59 = vld [vmem:[%s2425_s9 + $0xb0] sm:$0xff] }
 0x244   :  { %978 = vmatpush.msra.mxu3 %v916_v49 }
 0x245   :  { %959 = vmatpush.msra.mxu2 %v899_v53 }
 0x247   :  { %960 = vmatpush.msra.mxu2 %v898_v56 }
 0x249   :  { %961 = vmatpush.msra.mxu2 %v897_v59 }
 0x25d   :  { %v724_v52 = vpop.f32.mrf.mxu1 }
 0x25e   :  { %v784_v58 = vpop.f32.mrf.mxu0  ;;  %v787_v63 = vadd.f32 %v724_v52, %v638_v57  ;;  %v915_v52 = vld [vmem:[%s2425_s9 + $0x140] sm:$0xff]  ;;  %v914_v57 = vld [vmem:[%s2425_s9 + $0x138] sm:$0xff] }
 0x25f   :  { %v790_v4 = vadd.f32 %v784_v58, %v641_v60  ;;  %979 = vmatpush.msra.mxu3 %v915_v52  ;;  %v881_v58 = vld [vmem:[%s2425_s9 + $0x30] sm:$0xff] }
 0x260   :  { %v801_v5 = vadd.f32 %v793_v0, %v787_v63  ;;  %v913_v60 = vld [vmem:[%s2425_s9 + $0x130] sm:$0xff]  ;;  %941 = vmatpush.msra.mxu1 %v881_v58  ;;  %v896_v63 = vld [vmem:[%s2425_s9 + $0xa8] sm:$0xff] }
 0x261   :  { %v804_v13 = vadd.f32 %v796_v54, %v790_v4  ;;  %980 = vmatpush.msra.mxu3 %v914_v57  ;;  %v912_v0 = vld [vmem:[%s2425_s9 + $0x128] sm:$0xff]  ;;  %962 = vmatpush.msra.mxu2 %v896_v63  ;;  %v911_v4 = vld [vmem:[%s2425_s9 + $0x120] sm:$0xff]  ;;  %v878_v54 = vld [vmem:[%s2425_s9 + $0x18] sm:$0xff] }
 0x263   :  { %v744_v6 = vpop.f32.mrf.mxu2  ;;  %v808_v18 = vsel %vm807_vm15, %v804_v13, 0.0  ;;  %981 = vmatpush.msra.mxu3 %v913_v60 }
 0x264   :  { %v788_v7 = vadd.f32 %v744_v6, %v639_v61  ;;  %v764_v8 = vpop.f32.mrf.mxu3  ;;  %v880_v61 = vld [vmem:[%s2425_s9 + $0x28] sm:$0xff]  ;;  %v894_v6 = vld [vmem:[%s2425_s9 + $0x98] sm:$0xff] }
 0x265   :  { %v789_v12 = vadd.f32 %v764_v8, %v640_v3  ;;  %942 = vmatpush.msra.mxu1 %v880_v61  ;;  %982 = vmatpush.msra.mxu3 %v912_v0  ;;  %v895_v3 = vld [vmem:[%s2425_s9 + $0xa0] sm:$0xff]  ;;  %v877_v8 = vld [vmem:[%s2425_s9 + $0x10] sm:$0xff] }
 0x266   :  { %v802_v50 = vadd.f32 %v794_v1, %v788_v7  ;;  %v879_v1 = vld [vmem:[%s2425_s9 + $0x20] sm:$0xff]  ;;  %963 = vmatpush.msra.mxu2 %v895_v3  ;;  %v910_v7 = vld [vmem:[%s2425_s9 + $0x118] sm:$0xff] }
 0x267   :  { %v803_v16 = vadd.f32 %v795_v11, %v789_v12  ;;  %943 = vmatpush.msra.mxu1 %v879_v1  ;;  %983 = vmatpush.msra.mxu3 %v911_v4  ;;  %v893_v11 = vld [vmem:[%s2425_s9 + $0x90] sm:$0xff] }
 0x268   :  { %v805_v15 = vadd.f32 %v802_v50, %v801_v5  ;;  %964 = vmatpush.msra.mxu2 %v894_v6  ;;  %v909_v12 = vld [vmem:[%s2425_s9 + $0x110] sm:$0xff] }
 0x269   :  { %944 = vmatpush.msra.mxu1 %v878_v54  ;;  %984 = vmatpush.msra.mxu3 %v910_v7 }
 0x26a   :  { %v806_v17 = vadd.f32 %v805_v15, %v803_v16  ;;  %965 = vmatpush.msra.mxu2 %v893_v11  ;;  %v924_v15 = vld [vmem:[%s2425_s9 + $0x188] sm:$0xff] }
 0x26b   :  { %945 = vmatpush.msra.mxu1 %v877_v8  ;;  %985 = vmatpush.msra.mxu3 %v909_v12 }
 0x26c   :  { %v809_v9 = vadd.f32 %v808_v18, %v806_v17  ;;  %1006 = vmatpush.msrb.mxu0 %v924_v15  ;;  %v891_v17 = vld [vmem:[%s2425_s9 + $0x80] sm:$0xff] }
 0x26d   :  { %v923_v18 = vld [vmem:[%s2425_s9 + $0x180] sm:$0xff] }
 0x26e   :  { %810 = vadd.xlane.f32.xlu2 %v809_v9  ;;  %v907_v9 = vld [vmem:[%s2425_s9 + $0x100] sm:$0xff]  ;;  %1007 = vmatpush.msrb.mxu0 %v923_v18 }
 0x2e1   :  { %v811_v22 = vpop.xlane.xlu2 %810 }
 0x2e2   :  { %v812_v23 = vmul.f32 0.0025, %v811_v22 }
 0x2e4   :  { %v2241_v10 = vsub.f32 %v801_v5, %v812_v23  ;;  %v2243_v24 = vsub.f32 %v802_v50, %v812_v23  ;;  %v2245_v25 = vsub.f32 %v803_v16, %v812_v23  ;;  %v2247_v26 = vsub.f32 %v804_v13, %v812_v23  ;;  %v876_v5 = vld [vmem:[%s2425_s9 + $0x8] sm:$0xff]  ;;  %v875_v16 = vld [vmem:[%s2425_s9] sm:$0xff] }
 0x2e5   :  { %v892_v50 = vld [vmem:[%s2425_s9 + $0x88] sm:$0xff]  ;;  %946 = vmatpush.msra.mxu1 %v876_v5 }
 0x2e6   :  { %v817_v27 = vmul.f32 %v2241_v10, %v2241_v10  ;;  %v818_v62 = vmul.f32 %v2243_v24, %v2243_v24  ;;  %v820_v28 = vmul.f32 %v2247_v26, %v2247_v26  ;;  %v819_v29 = vmul.f32 %v2245_v25, %v2245_v25  ;;  %v908_v13 = vld [vmem:[%s2425_s9 + $0x108] sm:$0xff]  ;;  %966 = vmatpush.msra.mxu2 %v892_v50 }
 0x2e7   :  { %986 = vmatpush.msra.mxu3 %v908_v13  ;;  %947 = vmatpush.msra.mxu1 %v875_v16 }
 0x2e8   :  { %v821_v14 = vadd.f32 %v818_v62, %v817_v27  ;;  %v823_v33 = vsel %vm807_vm15, %v820_v28, 0.0  ;;  %967 = vmatpush.msra.mxu2 %v891_v17  ;;  %v843_v28 = vld [vmem:[%s2423_s7] sm:$0xf] }
 0x2e9   :  { %987 = vmatpush.msra.mxu3 %v907_v9  ;;  %v846_v35 = vperm.slane %v843_v28, 1  ;;  %v847_v2 = vperm.slane %v843_v28, 2 }
 0x2ea   :  { %v822_v31 = vadd.f32 %v821_v14, %v819_v29  ;;  %v857_v14 = vld [vmem:[%s2424_s8] sm:$0xf] }
 0x2eb   :  { %v859_v32 = vperm.slane %v857_v14, 0  ;;  %v860_v37 = vperm.slane %v857_v14, 1  ;;  %v861_v38 = vperm.slane %v857_v14, 2  ;;  %v862_v39 = vperm.slane %v857_v14, 3 }
 0x2ec   :  { %v824_v34 = vadd.f32 %v823_v33, %v822_v31  ;;  %v848_v31 = vperm.slane %v843_v28, 3 }
 0x2ee   :  { %825 = vadd.xlane.f32.xlu0 %v824_v34  ;;  %v845_v34 = vperm.slane %v843_v28, 0 }
 0x361   :  { %v826_v19 = vpop.xlane.xlu0 %825 }
 0x362   :  { %v827_v20 = vmul.f32 0.0025, %v826_v19 }
 0x364   :  { %v828_v21 = vadd.f32 1e-05, %v827_v20 }
 0x366   :  { %1259 = vrsqrt.f32 %v828_v21  ;;  %vm835_vm1 = vweird.f32 %v828_v21 }
 0x36c   :  { %v1260_v22 = vpop.eup %1259 }
 0x36d   :  { %v830_v23 = vmul.f32 %v1260_v22, %v828_v21  ;;  %vm836_vm0 = vweird.f32 %v1260_v22 }
 0x36e   :  { %vm837_vm2 = vmor %vm835_vm1, %vm836_vm0 }
 0x36f   :  { %v831_v27 = vmul.f32 %v1260_v22, %v830_v23 }
 0x371   :  { %v832_v62 = vmul.f32 0.5, %v831_v27 }
 0x373   :  { %v833_v29 = vsub.f32 1.5, %v832_v62 }
 0x375   :  { %v834_v33 = vmul.f32 %v1260_v22, %v833_v29 }
 0x377   :  { %v838_v36 = vsel %vm837_vm2, %v1260_v22, %v834_v33 }
 0x378   :  { %v842_v40 = vmul.f32 %v838_v36, %v2247_v26  ;;  %v839_v41 = vmul.f32 %v838_v36, %v2241_v10  ;;  %v840_v42 = vmul.f32 %v838_v36, %v2243_v24  ;;  %v841_v43 = vmul.f32 %v838_v36, %v2245_v25  ;;  %v1250_v10 = vld [vmem:[%s2426_s10] ss:$0 sm:$0xff]  ;;  %s1291_s10 = smov [#allocation2]  }
 0x379   :  { %s1037_s19 = sshll.u32 %s1291_s10, 4  ;;  %s1038_s19 = int_to_ptr.vmem [resolvable:$true] %s1037_s19 }
 0x37a   :  { %v856_v44 = vmul.f32 %v848_v31, %v842_v40  ;;  %v853_v45 = vmul.f32 %v845_v34, %v839_v41  ;;  %v854_v30 = vmul.f32 %v846_v35, %v840_v42  ;;  %v855_v46 = vmul.f32 %v847_v2, %v841_v43 }
 0x37c   :  { %v867_v47 = vadd.f32 %v859_v32, %v853_v45  ;;  %v868_v48 = vadd.f32 %v860_v37, %v854_v30  ;;  %v869_v49 = vadd.f32 %v861_v38, %v855_v46  ;;  %v870_v51 = vadd.f32 %v862_v39, %v856_v44 }
 0x37e   :  { %v871_v53 = vmax.f32 %v867_v47, 0.0  ;;  %v872_v52 = vmax.f32 %v868_v48, 0.0  ;;  %v873_v55 = vmax.f32 %v869_v49, 0.0  ;;  %v874_v56 = vmax.f32 %v870_v51, 0.0 }
 0x380   :  { %948 = vmatmul.f32.vlgmr.msra.gmra.mxu1 %v871_v53  ;;  %968 = vmatmul.f32.vlgmr.msra.gmra.mxu2 %v872_v52 }
 0x381   :  { %988 = vmatmul.f32.vlgmr.msra.gmra.mxu3 %v873_v55  ;;  %1245 = vmatmul.msk.f32.vlgmr.msrb.gmra.mxu0 %vm807_vm15, %v874_v56 }
 0x3fd   :  { %v949_v24 = vpop.f32.mrf.mxu1 }
 0x3fe   :  { %v950_v25 = vadd.f32 %v1250_v10, %v949_v24  ;;  %v1009_v60 = vpop.f32.mrf.mxu0 }
 0x403   :  { %v969_v26 = vpop.f32.mrf.mxu2 }
 0x404   :  { %v970_v57 = vadd.f32 %v969_v26, %v950_v25  ;;  %v989_v58 = vpop.f32.mrf.mxu3 }
 0x406   :  { %v990_v59 = vadd.f32 %v989_v58, %v970_v57 }
 0x408   :  { %v1010_v61 = vadd.f32 %v1009_v60, %v990_v59 }
 0x40a   :  { %v1012_v63 = vsub.f32 0.0, %v1010_v61 }
 0x40c   :  { %v1013_v0 = vmul.f32 1.442695, %v1012_v63 }
 0x40e   :  { %1261 = vpow2.f32 %v1013_v0 }
 0x414   :  { %v1262_v1 = vpop.eup %1261 }
 0x415   :  { %v1015_v3 = vadd.f32 1.0, %v1262_v1 }
 0x417   :  { %1263 = vrcp.f32 %v1015_v3  ;;  %v1027_v7 = vand.u32 2147483648, %v1015_v3  ;;  %v1025_v11 = vand.u32 2147483647, %v1015_v3  ;;  %vm1021_vm4 = vweird.f32 %v1015_v3 }
 0x419   :  { %v1028_v5 = vor.u32 1.1754944e-38, %v1027_v7  ;;  %vm1026_vm7 = vcmp.eq.f32.partialorder %v1025_v11, 8.507059e+37 }
 0x41d   :  { %v1264_v4 = vpop.eup %1263 }
 0x41e   :  { %v1017_v54 = vmul.f32 %v1264_v4, %v1015_v3  ;;  %vm1022_vm3 = vweird.f32 %v1264_v4 }
 0x41f   :  { %vm1023_vm5 = vmor %vm1021_vm4, %vm1022_vm3 }
 0x420   :  { %v1018_v6 = vsub.f32 1.0, %v1017_v54 }
 0x422   :  { %v1019_v8 = vmul.f32 %v1264_v4, %v1018_v6 }
 0x424   :  { %v1020_v12 = vadd.f32 %v1264_v4, %v1019_v8 }
 0x426   :  { %v1024_v50 = vsel %vm1023_vm5, %v1264_v4, %v1020_v12 }
 0x427   :  { %v1029_v13 = vsel %vm1026_vm7, %v1028_v5, %v1024_v50 }
 0x428   :  { %1031 = vst.msk [vmem:[#allocation2] sm:$0xff] %vm1030_vm6, %v1029_v13 }
 0x429   :  { %1042 = dma.vmem_to_hbm [thread:$0]  %s1038_s19, 128, %s1040_s21, [#allocation3]  }
 0x42a   :  { %1289 = dma.done.wait [#allocation3], 128  }
 0x42b   :  { %1290 = vsyncadd [#allocation3], 4294967168 }
 0x42c   :  { %1047 = vsyncpa [#allocation3], 1 }

</bundles_post_ra>
